<compile_context>
chip_gen: v5e
topology: v5e:2x2
jax: 0.10.0
libtpu: 0.0.40
codegen_flags: <defaults>
</compile_context>

<pallas_src>
import math
from functools import partial

import jax
import jax.numpy as jnp
from jax import lax
from jax.experimental import pallas as pl
from jax.experimental.pallas import tpu as pltpu

LEAKY_SLOPE = 0.01            # PyTorch nn.LeakyReLU default
IN_CHANNELS = 1               # Critic(in_channels=1)
ACTION_DIM = 12               # actor_network_input
HIDDEN_LAYERS = [512, 256, 128, 64, 32]
OUT_NEURONS = 1
CONV_CH = 32                  # synthetic encoder conv channels
ENC_DIM = 64                  # encoder feature dim (stand-in for resnet50's 2048)
N_TAPS = 9                    # 3x3 kernel taps
MLP_IN = 2 * ENC_DIM + ACTION_DIM            # 140
MLP_IN_PAD = ((MLP_IN + 7) // 8) * 8         # 144: 8-aligned K for first matmul
N_MLP = len(HIDDEN_LAYERS) + 1               # 6


def _leaky_relu(x):
    return jnp.where(x > 0, x, LEAKY_SLOPE * x)


def _sample_stride(H, W):
    """Per-sample strip length: multiple of W (so column = lane % W) and of
    128 (lane alignment), >= (H+2)*W + 2 (H-padded rows plus guard zeros)."""
    unit = math.lcm(W, 128)
    need = (H + 2) * W + 2
    return ((need + unit - 1) // unit) * unit


# ---------------------------------------------------------------------------
# Fused kernel: in-kernel im2col + 2x encoder + concat + 6-layer MLP head,
# with the MLP weight stream overlapped (manual DMA from HBM) with the
# encoder compute.
# ---------------------------------------------------------------------------
def _critic_kernel(H, W, P,
                   imgs_ref,      # (2, 1, B*P)  f32  H-padded row-flattened strips
                   wconv_ref,     # (2, CONV_CH, 9)        f32
                   bconv_ref,     # (2, CONV_CH, 1)        f32
                   wproj_ref,     # (2, CONV_CH, ENC_DIM)  bf16
                   bproj_ref,     # (2, 1, ENC_DIM)        f32
                   action_ref,    # (B, ACTION_DIM)        f32
                   bias_ref,      # (N_MLP, max_width)     f32 packed bias slab
                   *rest):
    n_mlp = (len(rest) - 2) // 2
    w_hbm = rest[:n_mlp]                    # bf16 MLP weights, left in HBM (pl.ANY)
    out_ref = rest[n_mlp]                   # (B, OUT_NEURONS)
    w_vmem = rest[n_mlp + 1:2 * n_mlp + 1]  # bf16 VMEM landing slabs
    sems = rest[2 * n_mlp + 1]              # DMA semaphores, shape (n_mlp,)

    # Kick off the whole MLP weight stream now; it overlaps the encoders.
    copies = [pltpu.make_async_copy(w_hbm[i], w_vmem[i], sems.at[i])
              for i in range(n_mlp)]
    for c in copies:
        c.start()

    B = action_ref.shape[0]
    HW = H * W
    LOUT = (B - 1) * P + HW                 # conv-output strip length (lanes)

    # Per-lane column index (valid because P % W == 0): masks for taps that
    # straddle the left / right image edge.
    col = lax.broadcasted_iota(jnp.int32, (1, LOUT), 1) % W
    not_left = col != 0                     # invalid lanes for dw == 0
    not_right = col != (W - 1)              # invalid lanes for dw == 2

    # 0/(1/HW) pooling matrix: row b selects sample b's HW valid positions.
    q = lax.broadcasted_iota(jnp.int32, (B, LOUT), 1)
    b_idx = lax.broadcasted_iota(jnp.int32, (B, LOUT), 0)
    pool = jnp.where((q >= b_idx * P) & (q < b_idx * P + HW),
                     1.0 / HW, 0.0).astype(jnp.float32)

    feats = []
    for e in range(2):                      # the two encoders
        # In-kernel im2col: tap (dh, dw) is the strip shifted by dh*W + dw
        # (H padding is zero rows baked into the strip; W edges are masked).
        taps = []
        for dh in range(3):
            for dw in range(3):
                off = dh * W + dw
                t = imgs_ref[e, :, off:off + LOUT]        # (1, LOUT)
                if dw == 0:
                    t = jnp.where(not_left, t, 0.0)
                elif dw == 2:
                    t = jnp.where(not_right, t, 0.0)
                taps.append(t)
        taps9 = jnp.concatenate(taps, axis=0)             # (9, LOUT)

        # 3x3 conv as a single (C,9)x(9,LOUT) contraction on the idle MXU.
        conv = jnp.dot(wconv_ref[e], taps9,
                       preferred_element_type=jnp.float32)  # (C, LOUT)
        h = _leaky_relu(conv + bconv_ref[e])

        # Global average pool: one MXU contraction against the selection
        # matrix; garbage lanes between samples are zeroed by `pool`.
        pooled = lax.dot_general(pool, h, (((1,), (1,)), ((), ())),
                                 preferred_element_type=jnp.float32)  # (B, C)
        feat = jnp.dot(pooled.astype(jnp.bfloat16), wproj_ref[e],
                       preferred_element_type=jnp.float32) + bproj_ref[e]
        feats.append(feat)                                # (B, ENC_DIM) f32

    # torch.cat([enc1(img1), enc2(img2), action], dim=1), zero-padded to the
    # 8-aligned MLP input width (matching zero rows were added to W1).
    pad_cols = MLP_IN_PAD - MLP_IN
    pieces = [feats[0], feats[1], action_ref[...]]
    if pad_cols:
        pieces.append(jnp.zeros((B, pad_cols), jnp.float32))
    h = jnp.concatenate(pieces, axis=-1)                  # (B, MLP_IN_PAD) f32

    # 144 -> 512 -> 256 -> 128 -> 64 -> 32 -> 1 LeakyReLU head: bf16 operands
    # into the MXU, f32 accumulation and f32 activations.
    for i in range(n_mlp):
        copies[i].wait()                                  # weight i has landed
        w = w_vmem[i][...]                                # (d_in, d_out) bf16
        n_out = w.shape[1]
        z = jnp.dot(h.astype(jnp.bfloat16), w,
                    preferred_element_type=jnp.float32) + bias_ref[i:i + 1, :n_out]
        h = _leaky_relu(z) if i < n_mlp - 1 else z
    out_ref[...] = h                                      # (B, OUT_NEURONS)


# ---------------------------------------------------------------------------
# Wrapper: tiny pad/flatten of the raw images (no 9x im2col expansion), then
# one pallas_call for the whole forward pass.
# ---------------------------------------------------------------------------
def _flatten_strip(x_nchw, P):
    """(B, 1, H, W) -> (1, B*P): per sample [guard 0, (H+2) zero-padded rows
    flattened row-major (stride W), guard 0, zeros...]."""
    B, C, H, W = x_nchw.shape
    assert C == IN_CHANNELS == 1
    x = x_nchw[:, 0]                                      # (B, H, W)
    rows = jnp.pad(x, ((0, 0), (1, 1), (0, 0)))           # zero row above/below
    flat = rows.reshape(B, (H + 2) * W)
    strip = jnp.pad(flat, ((0, 0), (1, P - (H + 2) * W - 1)))
    return strip.reshape(1, B * P)


def critic_forward(params, input_image_1, input_image_2, action_input):
    (wconv, bconv, wproj, bproj), mlp_ws, bias_slab = params
    B, _, H, W = input_image_1.shape
    P = _sample_stride(H, W)
    imgs = jnp.stack([_flatten_strip(input_image_1, P),
                      _flatten_strip(input_image_2, P)], axis=0)  # (2, 1, B*P)

    vmem = pl.BlockSpec(memory_space=pltpu.MemorySpace.VMEM)
    hbm = pl.BlockSpec(memory_space=pl.ANY)
    n = len(mlp_ws)
    return pl.pallas_call(
        partial(_critic_kernel, H, W, P),
        out_shape=jax.ShapeDtypeStruct((B, OUT_NEURONS), jnp.float32),
        in_specs=[vmem] * 7 + [hbm] * n,
        out_specs=vmem,
        scratch_shapes=[pltpu.VMEM(w.shape, w.dtype) for w in mlp_ws]
                       + [pltpu.SemaphoreType.DMA((n,))],
    )(imgs, wconv, bconv, wproj, bproj, action_input, bias_slab, *mlp_ws)


# ---------------------------------------------------------------------------
# Deterministic parameter construction (synthetic, no checkpoint).
# ---------------------------------------------------------------------------
def init_params(key):
    k_e1, k_e2, k_mlp = jax.random.split(key, 3)

    def enc_one(k):
        k1, k2, k3, k4 = jax.random.split(k, 4)
        wconv = jax.random.normal(k1, (CONV_CH, N_TAPS), jnp.float32) / jnp.sqrt(N_TAPS)
        bconv = 0.01 * jax.random.normal(k2, (CONV_CH, 1), jnp.float32)
        wproj = (jax.random.normal(k3, (CONV_CH, ENC_DIM), jnp.float32)
                 / jnp.sqrt(CONV_CH)).astype(jnp.bfloat16)
        bproj = 0.01 * jax.random.normal(k4, (1, ENC_DIM), jnp.float32)
        return wconv, bconv, wproj, bproj

    e1, e2 = enc_one(k_e1), enc_one(k_e2)
    enc = tuple(jnp.stack([a, b], axis=0) for a, b in zip(e1, e2))

    dims = [MLP_IN] + HIDDEN_LAYERS + [OUT_NEURONS]
    ws = []
    bias_slab = jnp.zeros((N_MLP, max(dims[1:])), jnp.float32)
    k = k_mlp
    for i in range(N_MLP):
        k, kw, kb = jax.random.split(k, 3)
        d_in, d_out = dims[i], dims[i + 1]
        w = jax.random.normal(kw, (d_in, d_out), jnp.float32) / jnp.sqrt(d_in)
        if i == 0:                       # K padded 140 -> 144 with zero rows
            w = jnp.pad(w, ((0, MLP_IN_PAD - MLP_IN), (0, 0)))
        ws.append(w.astype(jnp.bfloat16))
        b = 0.01 * jax.random.normal(kb, (d_out,), jnp.float32)
        bias_slab = bias_slab.at[i, :d_out].set(b)
    return enc, tuple(ws), bias_slab


# Pure-JAX reference (same bf16 weight quantization / cast points).
def reference_forward(params, img1, img2, action):
    (wconv, bconv, wproj, bproj), mlp_ws, bias_slab = params
    B, _, H, W = img1.shape
    feats = []
    for e, img in enumerate((img1, img2)):
        x = img[:, 0]
        xp = jnp.pad(x, ((0, 0), (1, 1), (1, 1)))
        taps = jnp.stack([xp[:, dh:dh + H, dw:dw + W]
                          for dh in range(3) for dw in range(3)], axis=1)  # (B,9,H,W)
        conv = jnp.einsum('ct,bthw->bchw', wconv[e], taps)
        h = _leaky_relu(conv + bconv[e].reshape(1, CONV_CH, 1, 1))
        pooled = jnp.mean(h, axis=(2, 3))                                  # (B,C)
        feat = jnp.dot(pooled.astype(jnp.bfloat16), wproj[e],
                       preferred_element_type=jnp.float32) + bproj[e]
        feats.append(feat)
    h = jnp.concatenate([feats[0], feats[1], action,
                         jnp.zeros((B, MLP_IN_PAD - MLP_IN), jnp.float32)], axis=-1)
    for i, w in enumerate(mlp_ws):
        n_out = w.shape[1]
        z = jnp.dot(h.astype(jnp.bfloat16), w,
                    preferred_element_type=jnp.float32) + bias_slab[i:i + 1, :n_out]
        h = _leaky_relu(z) if i < len(mlp_ws) - 1 else z
    return h


if __name__ == "__main__":
    key = jax.random.PRNGKey(0)
    k_img1, k_img2, k_act, k_params = jax.random.split(key, 4)

    B, H, W = 2, 16, 16
    input_image_1 = jax.random.normal(k_img1, (B, IN_CHANNELS, H, W), jnp.float32)
    input_image_2 = jax.random.normal(k_img2, (B, IN_CHANNELS, H, W), jnp.float32)
    action_input = jax.random.normal(k_act, (B, ACTION_DIM), jnp.float32)

    params = init_params(k_params)

    out = jax.jit(critic_forward)(params, input_image_1, input_image_2,
                                  action_input)
    out = jax.block_until_ready(out)
    assert out.shape == (B, OUT_NEURONS), out.shape
    assert out.dtype == jnp.float32
    assert bool(jnp.all(jnp.isfinite(out)))

    ref = reference_forward(params, input_image_1, input_image_2, action_input)
    assert jnp.allclose(out, ref, atol=5e-2, rtol=5e-2), (out, ref)
    print("KERNEL_OK")
</pallas_src>

<mosaic_0001>
module attributes {stable_mosaic.version = 11 : i64} {
  func.func @_critic_kernel(%arg0: memref<2x1x768xf32, #tpu.memory_space<vmem>>, %arg1: memref<2x32x9xf32, #tpu.memory_space<vmem>>, %arg2: memref<2x32x1xf32, #tpu.memory_space<vmem>>, %arg3: memref<2x32x64xbf16, #tpu.memory_space<vmem>>, %arg4: memref<2x1x64xf32, #tpu.memory_space<vmem>>, %arg5: memref<2x12xf32, #tpu.memory_space<vmem>>, %arg6: memref<6x512xf32, #tpu.memory_space<vmem>>, %arg7: memref<144x512xbf16, #tpu.memory_space<any>>, %arg8: memref<512x256xbf16, #tpu.memory_space<any>>, %arg9: memref<256x128xbf16, #tpu.memory_space<any>>, %arg10: memref<128x64xbf16, #tpu.memory_space<any>>, %arg11: memref<64x32xbf16, #tpu.memory_space<any>>, %arg12: memref<32x1xbf16, #tpu.memory_space<any>>, %arg13: memref<2x1xf32, #tpu.memory_space<vmem>>, %arg14: memref<144x512xbf16, #tpu.memory_space<vmem>>, %arg15: memref<512x256xbf16, #tpu.memory_space<vmem>>, %arg16: memref<256x128xbf16, #tpu.memory_space<vmem>>, %arg17: memref<128x64xbf16, #tpu.memory_space<vmem>>, %arg18: memref<64x32xbf16, #tpu.memory_space<vmem>>, %arg19: memref<32x1xbf16, #tpu.memory_space<vmem>>, %arg20: memref<6x!tpu.dma_semaphore, #tpu.memory_space<semaphore_mem>>) attributes {dimension_semantics = [], scalar_prefetch = 0 : i64, scratch_operands = 7 : i64, tpu.core_type = #tpu.core_type<tc>} {
    %c0_i32 = arith.constant 0 : i32
    %0 = tpu.memref_slice %arg20[%c0_i32] : memref<6x!tpu.dma_semaphore, #tpu.memory_space<semaphore_mem>> -> memref<1x!tpu.dma_semaphore, #tpu.memory_space<semaphore_mem>>
    %1 = tpu.memref_squeeze %0 : memref<1x!tpu.dma_semaphore, #tpu.memory_space<semaphore_mem>> -> memref<!tpu.dma_semaphore, #tpu.memory_space<semaphore_mem>>
    tpu.enqueue_dma source(%arg7 : memref<144x512xbf16, #tpu.memory_space<any>>) target(%arg14 : memref<144x512xbf16, #tpu.memory_space<vmem>>) target_semaphore(%1 : memref<!tpu.dma_semaphore, #tpu.memory_space<semaphore_mem>>)
    %c1_i32 = arith.constant 1 : i32
    %2 = tpu.memref_slice %arg20[%c1_i32] : memref<6x!tpu.dma_semaphore, #tpu.memory_space<semaphore_mem>> -> memref<1x!tpu.dma_semaphore, #tpu.memory_space<semaphore_mem>>
    %3 = tpu.memref_squeeze %2 : memref<1x!tpu.dma_semaphore, #tpu.memory_space<semaphore_mem>> -> memref<!tpu.dma_semaphore, #tpu.memory_space<semaphore_mem>>
    tpu.enqueue_dma source(%arg8 : memref<512x256xbf16, #tpu.memory_space<any>>) target(%arg15 : memref<512x256xbf16, #tpu.memory_space<vmem>>) target_semaphore(%3 : memref<!tpu.dma_semaphore, #tpu.memory_space<semaphore_mem>>)
    %c2_i32 = arith.constant 2 : i32
    %4 = tpu.memref_slice %arg20[%c2_i32] : memref<6x!tpu.dma_semaphore, #tpu.memory_space<semaphore_mem>> -> memref<1x!tpu.dma_semaphore, #tpu.memory_space<semaphore_mem>>
    %5 = tpu.memref_squeeze %4 : memref<1x!tpu.dma_semaphore, #tpu.memory_space<semaphore_mem>> -> memref<!tpu.dma_semaphore, #tpu.memory_space<semaphore_mem>>
    tpu.enqueue_dma source(%arg9 : memref<256x128xbf16, #tpu.memory_space<any>>) target(%arg16 : memref<256x128xbf16, #tpu.memory_space<vmem>>) target_semaphore(%5 : memref<!tpu.dma_semaphore, #tpu.memory_space<semaphore_mem>>)
    %c3_i32 = arith.constant 3 : i32
    %6 = tpu.memref_slice %arg20[%c3_i32] : memref<6x!tpu.dma_semaphore, #tpu.memory_space<semaphore_mem>> -> memref<1x!tpu.dma_semaphore, #tpu.memory_space<semaphore_mem>>
    %7 = tpu.memref_squeeze %6 : memref<1x!tpu.dma_semaphore, #tpu.memory_space<semaphore_mem>> -> memref<!tpu.dma_semaphore, #tpu.memory_space<semaphore_mem>>
    tpu.enqueue_dma source(%arg10 : memref<128x64xbf16, #tpu.memory_space<any>>) target(%arg17 : memref<128x64xbf16, #tpu.memory_space<vmem>>) target_semaphore(%7 : memref<!tpu.dma_semaphore, #tpu.memory_space<semaphore_mem>>)
    %c4_i32 = arith.constant 4 : i32
    %8 = tpu.memref_slice %arg20[%c4_i32] : memref<6x!tpu.dma_semaphore, #tpu.memory_space<semaphore_mem>> -> memref<1x!tpu.dma_semaphore, #tpu.memory_space<semaphore_mem>>
    %9 = tpu.memref_squeeze %8 : memref<1x!tpu.dma_semaphore, #tpu.memory_space<semaphore_mem>> -> memref<!tpu.dma_semaphore, #tpu.memory_space<semaphore_mem>>
    tpu.enqueue_dma source(%arg11 : memref<64x32xbf16, #tpu.memory_space<any>>) target(%arg18 : memref<64x32xbf16, #tpu.memory_space<vmem>>) target_semaphore(%9 : memref<!tpu.dma_semaphore, #tpu.memory_space<semaphore_mem>>)
    %c5_i32 = arith.constant 5 : i32
    %10 = tpu.memref_slice %arg20[%c5_i32] : memref<6x!tpu.dma_semaphore, #tpu.memory_space<semaphore_mem>> -> memref<1x!tpu.dma_semaphore, #tpu.memory_space<semaphore_mem>>
    %11 = tpu.memref_squeeze %10 : memref<1x!tpu.dma_semaphore, #tpu.memory_space<semaphore_mem>> -> memref<!tpu.dma_semaphore, #tpu.memory_space<semaphore_mem>>
    tpu.enqueue_dma source(%arg12 : memref<32x1xbf16, #tpu.memory_space<any>>) target(%arg19 : memref<32x1xbf16, #tpu.memory_space<vmem>>) target_semaphore(%11 : memref<!tpu.dma_semaphore, #tpu.memory_space<semaphore_mem>>)
    %12 = tpu.iota {dimensions = array<i32: 1>} : vector<1x640xi32>
    %c16_i32 = arith.constant 16 : i32
    %c0_i32_0 = arith.constant 0 : i32
    %13 = arith.cmpi eq, %c16_i32, %c0_i32_0 : i32
    %c1_i32_1 = arith.constant 1 : i32
    %14 = arith.select %13, %c1_i32_1, %c16_i32 : i32
    %15 = vector.broadcast %14 : i32 to vector<1x640xi32>
    %16 = arith.remsi %12, %15 : vector<1x640xi32>
    %c0_i32_2 = arith.constant 0 : i32
    %17 = vector.broadcast %c0_i32_2 : i32 to vector<1x640xi32>
    %18 = arith.cmpi ne, %16, %17 : vector<1x640xi32>
    %c0_i32_3 = arith.constant 0 : i32
    %19 = vector.broadcast %c0_i32_3 : i32 to vector<1x640xi32>
    %20 = arith.cmpi slt, %16, %19 : vector<1x640xi32>
    %c0_i32_4 = arith.constant 0 : i32
    %21 = arith.cmpi slt, %14, %c0_i32_4 : i32
    %22 = vector.broadcast %21 : i1 to vector<1x640xi1>
    %23 = vector.broadcast %22 : vector<1x640xi1> to vector<1x640xi1>
    %24 = arith.xori %20, %23 : vector<1x640xi1>
    %25 = arith.andi %24, %18 : vector<1x640xi1>
    %26 = vector.broadcast %14 : i32 to vector<1x640xi32>
    %27 = arith.addi %16, %26 : vector<1x640xi32>
    %28 = arith.select %25, %27, %16 : vector<1x640xi1>, vector<1x640xi32>
    %c0_i32_5 = arith.constant 0 : i32
    %29 = vector.broadcast %c0_i32_5 : i32 to vector<1x640xi32>
    %30 = arith.cmpi ne, %28, %29 : vector<1x640xi32>
    %c15_i32 = arith.constant 15 : i32
    %31 = vector.broadcast %c15_i32 : i32 to vector<1x640xi32>
    %32 = arith.cmpi ne, %28, %31 : vector<1x640xi32>
    %33 = tpu.iota {dimensions = array<i32: 1>} : vector<2x640xi32>
    %34 = tpu.iota {dimensions = array<i32: 0>} : vector<2x640xi32>
    %c384_i32 = arith.constant 384 : i32
    %35 = vector.broadcast %c384_i32 : i32 to vector<2x640xi32>
    %36 = arith.muli %34, %35 : vector<2x640xi32>
    %37 = arith.cmpi sge, %33, %36 : vector<2x640xi32>
    %c384_i32_6 = arith.constant 384 : i32
    %38 = vector.broadcast %c384_i32_6 : i32 to vector<2x640xi32>
    %39 = arith.muli %34, %38 : vector<2x640xi32>
    %c256_i32 = arith.constant 256 : i32
    %40 = vector.broadcast %c256_i32 : i32 to vector<2x640xi32>
    %41 = arith.addi %39, %40 : vector<2x640xi32>
    %42 = arith.cmpi slt, %33, %41 : vector<2x640xi32>
    %43 = arith.andi %37, %42 : vector<2x640xi1>
    %cst = arith.constant 3.906250e-03 : f32
    %cst_7 = arith.constant 0.000000e+00 : f32
    %44 = vector.broadcast %cst : f32 to vector<2x640xf32>
    %45 = vector.broadcast %cst_7 : f32 to vector<2x640xf32>
    %46 = arith.select %43, %44, %45 : vector<2x640xi1>, vector<2x640xf32>
    %c0 = arith.constant 0 : index
    %c0_8 = arith.constant 0 : index
    %c0_9 = arith.constant 0 : index
    %47 = vector.load %arg0[%c0, %c0_8, %c0_9] : memref<2x1x768xf32, #tpu.memory_space<vmem>>, vector<1x1x640xf32>
    %48 = vector.shape_cast %47 : vector<1x1x640xf32> to vector<1x640xf32>
    %cst_10 = arith.constant 0.000000e+00 : f32
    %49 = vector.broadcast %cst_10 : f32 to vector<1x640xf32>
    %50 = arith.select %30, %48, %49 : vector<1x640xi1>, vector<1x640xf32>
    %c0_11 = arith.constant 0 : index
    %c0_12 = arith.constant 0 : index
    %c1 = arith.constant 1 : index
    %51 = vector.load %arg0[%c0_11, %c0_12, %c1] : memref<2x1x768xf32, #tpu.memory_space<vmem>>, vector<1x1x640xf32>
    %52 = vector.shape_cast %51 : vector<1x1x640xf32> to vector<1x640xf32>
    %c0_13 = arith.constant 0 : index
    %c0_14 = arith.constant 0 : index
    %c2 = arith.constant 2 : index
    %53 = vector.load %arg0[%c0_13, %c0_14, %c2] : memref<2x1x768xf32, #tpu.memory_space<vmem>>, vector<1x1x640xf32>
    %54 = vector.shape_cast %53 : vector<1x1x640xf32> to vector<1x640xf32>
    %cst_15 = arith.constant 0.000000e+00 : f32
    %55 = vector.broadcast %cst_15 : f32 to vector<1x640xf32>
    %56 = arith.select %32, %54, %55 : vector<1x640xi1>, vector<1x640xf32>
    %c0_16 = arith.constant 0 : index
    %c0_17 = arith.constant 0 : index
    %c16 = arith.constant 16 : index
    %57 = vector.load %arg0[%c0_16, %c0_17, %c16] : memref<2x1x768xf32, #tpu.memory_space<vmem>>, vector<1x1x640xf32>
    %58 = vector.shape_cast %57 : vector<1x1x640xf32> to vector<1x640xf32>
    %cst_18 = arith.constant 0.000000e+00 : f32
    %59 = vector.broadcast %cst_18 : f32 to vector<1x640xf32>
    %60 = arith.select %30, %58, %59 : vector<1x640xi1>, vector<1x640xf32>
    %c0_19 = arith.constant 0 : index
    %c0_20 = arith.constant 0 : index
    %c17 = arith.constant 17 : index
    %61 = vector.load %arg0[%c0_19, %c0_20, %c17] : memref<2x1x768xf32, #tpu.memory_space<vmem>>, vector<1x1x640xf32>
    %62 = vector.shape_cast %61 : vector<1x1x640xf32> to vector<1x640xf32>
    %c0_21 = arith.constant 0 : index
    %c0_22 = arith.constant 0 : index
    %c18 = arith.constant 18 : index
    %63 = vector.load %arg0[%c0_21, %c0_22, %c18] : memref<2x1x768xf32, #tpu.memory_space<vmem>>, vector<1x1x640xf32>
    %64 = vector.shape_cast %63 : vector<1x1x640xf32> to vector<1x640xf32>
    %cst_23 = arith.constant 0.000000e+00 : f32
    %65 = vector.broadcast %cst_23 : f32 to vector<1x640xf32>
    %66 = arith.select %32, %64, %65 : vector<1x640xi1>, vector<1x640xf32>
    %c0_24 = arith.constant 0 : index
    %c0_25 = arith.constant 0 : index
    %c32 = arith.constant 32 : index
    %67 = vector.load %arg0[%c0_24, %c0_25, %c32] : memref<2x1x768xf32, #tpu.memory_space<vmem>>, vector<1x1x640xf32>
    %68 = vector.shape_cast %67 : vector<1x1x640xf32> to vector<1x640xf32>
    %cst_26 = arith.constant 0.000000e+00 : f32
    %69 = vector.broadcast %cst_26 : f32 to vector<1x640xf32>
    %70 = arith.select %30, %68, %69 : vector<1x640xi1>, vector<1x640xf32>
    %c0_27 = arith.constant 0 : index
    %c0_28 = arith.constant 0 : index
    %c33 = arith.constant 33 : index
    %71 = vector.load %arg0[%c0_27, %c0_28, %c33] : memref<2x1x768xf32, #tpu.memory_space<vmem>>, vector<1x1x640xf32>
    %72 = vector.shape_cast %71 : vector<1x1x640xf32> to vector<1x640xf32>
    %c0_29 = arith.constant 0 : index
    %c0_30 = arith.constant 0 : index
    %c34 = arith.constant 34 : index
    %73 = vector.load %arg0[%c0_29, %c0_30, %c34] : memref<2x1x768xf32, #tpu.memory_space<vmem>>, vector<1x1x640xf32>
    %74 = vector.shape_cast %73 : vector<1x1x640xf32> to vector<1x640xf32>
    %cst_31 = arith.constant 0.000000e+00 : f32
    %75 = vector.broadcast %cst_31 : f32 to vector<1x640xf32>
    %76 = arith.select %32, %74, %75 : vector<1x640xi1>, vector<1x640xf32>
    %77 = tpu.concatenate %50, %52, %56, %60, %62, %66, %70, %72, %76 in 0 : vector<1x640xf32>, vector<1x640xf32>, vector<1x640xf32>, vector<1x640xf32>, vector<1x640xf32>, vector<1x640xf32>, vector<1x640xf32>, vector<1x640xf32>, vector<1x640xf32> -> vector<9x640xf32>
    %c0_32 = arith.constant 0 : index
    %c0_33 = arith.constant 0 : index
    %c0_34 = arith.constant 0 : index
    %78 = vector.load %arg1[%c0_32, %c0_33, %c0_34] : memref<2x32x9xf32, #tpu.memory_space<vmem>>, vector<1x32x9xf32>
    %79 = vector.shape_cast %78 : vector<1x32x9xf32> to vector<32x9xf32>
    %cst_35 = arith.constant dense<0.000000e+00> : vector<32x640xf32>
    %80 = tpu.matmul %79, %77, %cst_35 {dimension_numbers = #tpu.dot_dimension_numbers<[1], [0], [0], [1], [0, 0, 1, 1], [], []>} : vector<32x9xf32>, vector<9x640xf32>, vector<32x640xf32> -> vector<32x640xf32>
    %c0_36 = arith.constant 0 : index
    %c0_37 = arith.constant 0 : index
    %c0_38 = arith.constant 0 : index
    %81 = vector.load %arg2[%c0_36, %c0_37, %c0_38] : memref<2x32x1xf32, #tpu.memory_space<vmem>>, vector<1x32x1xf32>
    %82 = vector.shape_cast %81 : vector<1x32x1xf32> to vector<32x1xf32>
    %83 = vector.broadcast %82 : vector<32x1xf32> to vector<32x640xf32>
    %84 = arith.addf %80, %83 : vector<32x640xf32>
    %cst_39 = arith.constant 0.000000e+00 : f32
    %85 = vector.broadcast %cst_39 : f32 to vector<32x640xf32>
    %86 = arith.cmpf ogt, %84, %85 : vector<32x640xf32>
    %cst_40 = arith.constant 0.00999999977 : f32
    %87 = vector.broadcast %cst_40 : f32 to vector<32x640xf32>
    %88 = arith.mulf %87, %84 : vector<32x640xf32>
    %89 = arith.select %86, %84, %88 : vector<32x640xi1>, vector<32x640xf32>
    %cst_41 = arith.constant dense<0.000000e+00> : vector<2x32xf32>
    %90 = tpu.matmul %46, %89, %cst_41 {dimension_numbers = #tpu.dot_dimension_numbers<[1], [1], [0], [0], [0, 0, 1, 0], [], []>} : vector<2x640xf32>, vector<32x640xf32>, vector<2x32xf32> -> vector<2x32xf32>
    %91 = arith.truncf %90 : vector<2x32xf32> to vector<2x32xbf16>
    %c0_42 = arith.constant 0 : index
    %c0_43 = arith.constant 0 : index
    %c0_44 = arith.constant 0 : index
    %92 = vector.load %arg3[%c0_42, %c0_43, %c0_44] : memref<2x32x64xbf16, #tpu.memory_space<vmem>>, vector<1x32x64xbf16>
    %93 = vector.shape_cast %92 : vector<1x32x64xbf16> to vector<32x64xbf16>
    %cst_45 = arith.constant dense<0.000000e+00> : vector<2x64xf32>
    %94 = tpu.matmul %91, %93, %cst_45 {dimension_numbers = #tpu.dot_dimension_numbers<[1], [0], [0], [1], [0, 0, 1, 1], [], []>} : vector<2x32xbf16>, vector<32x64xbf16>, vector<2x64xf32> -> vector<2x64xf32>
    %c0_46 = arith.constant 0 : index
    %c0_47 = arith.constant 0 : index
    %c0_48 = arith.constant 0 : index
    %95 = vector.load %arg4[%c0_46, %c0_47, %c0_48] : memref<2x1x64xf32, #tpu.memory_space<vmem>>, vector<1x1x64xf32>
    %96 = vector.shape_cast %95 : vector<1x1x64xf32> to vector<1x64xf32>
    %97 = vector.broadcast %96 : vector<1x64xf32> to vector<2x64xf32>
    %98 = arith.addf %94, %97 : vector<2x64xf32>
    %c1_49 = arith.constant 1 : index
    %c0_50 = arith.constant 0 : index
    %c0_51 = arith.constant 0 : index
    %99 = vector.load %arg0[%c1_49, %c0_50, %c0_51] : memref<2x1x768xf32, #tpu.memory_space<vmem>>, vector<1x1x640xf32>
    %100 = vector.shape_cast %99 : vector<1x1x640xf32> to vector<1x640xf32>
    %cst_52 = arith.constant 0.000000e+00 : f32
    %101 = vector.broadcast %cst_52 : f32 to vector<1x640xf32>
    %102 = arith.select %30, %100, %101 : vector<1x640xi1>, vector<1x640xf32>
    %c1_53 = arith.constant 1 : index
    %c0_54 = arith.constant 0 : index
    %c1_55 = arith.constant 1 : index
    %103 = vector.load %arg0[%c1_53, %c0_54, %c1_55] : memref<2x1x768xf32, #tpu.memory_space<vmem>>, vector<1x1x640xf32>
    %104 = vector.shape_cast %103 : vector<1x1x640xf32> to vector<1x640xf32>
    %c1_56 = arith.constant 1 : index
    %c0_57 = arith.constant 0 : index
    %c2_58 = arith.constant 2 : index
    %105 = vector.load %arg0[%c1_56, %c0_57, %c2_58] : memref<2x1x768xf32, #tpu.memory_space<vmem>>, vector<1x1x640xf32>
    %106 = vector.shape_cast %105 : vector<1x1x640xf32> to vector<1x640xf32>
    %cst_59 = arith.constant 0.000000e+00 : f32
    %107 = vector.broadcast %cst_59 : f32 to vector<1x640xf32>
    %108 = arith.select %32, %106, %107 : vector<1x640xi1>, vector<1x640xf32>
    %c1_60 = arith.constant 1 : index
    %c0_61 = arith.constant 0 : index
    %c16_62 = arith.constant 16 : index
    %109 = vector.load %arg0[%c1_60, %c0_61, %c16_62] : memref<2x1x768xf32, #tpu.memory_space<vmem>>, vector<1x1x640xf32>
    %110 = vector.shape_cast %109 : vector<1x1x640xf32> to vector<1x640xf32>
    %cst_63 = arith.constant 0.000000e+00 : f32
    %111 = vector.broadcast %cst_63 : f32 to vector<1x640xf32>
    %112 = arith.select %30, %110, %111 : vector<1x640xi1>, vector<1x640xf32>
    %c1_64 = arith.constant 1 : index
    %c0_65 = arith.constant 0 : index
    %c17_66 = arith.constant 17 : index
    %113 = vector.load %arg0[%c1_64, %c0_65, %c17_66] : memref<2x1x768xf32, #tpu.memory_space<vmem>>, vector<1x1x640xf32>
    %114 = vector.shape_cast %113 : vector<1x1x640xf32> to vector<1x640xf32>
    %c1_67 = arith.constant 1 : index
    %c0_68 = arith.constant 0 : index
    %c18_69 = arith.constant 18 : index
    %115 = vector.load %arg0[%c1_67, %c0_68, %c18_69] : memref<2x1x768xf32, #tpu.memory_space<vmem>>, vector<1x1x640xf32>
    %116 = vector.shape_cast %115 : vector<1x1x640xf32> to vector<1x640xf32>
    %cst_70 = arith.constant 0.000000e+00 : f32
    %117 = vector.broadcast %cst_70 : f32 to vector<1x640xf32>
    %118 = arith.select %32, %116, %117 : vector<1x640xi1>, vector<1x640xf32>
    %c1_71 = arith.constant 1 : index
    %c0_72 = arith.constant 0 : index
    %c32_73 = arith.constant 32 : index
    %119 = vector.load %arg0[%c1_71, %c0_72, %c32_73] : memref<2x1x768xf32, #tpu.memory_space<vmem>>, vector<1x1x640xf32>
    %120 = vector.shape_cast %119 : vector<1x1x640xf32> to vector<1x640xf32>
    %cst_74 = arith.constant 0.000000e+00 : f32
    %121 = vector.broadcast %cst_74 : f32 to vector<1x640xf32>
    %122 = arith.select %30, %120, %121 : vector<1x640xi1>, vector<1x640xf32>
    %c1_75 = arith.constant 1 : index
    %c0_76 = arith.constant 0 : index
    %c33_77 = arith.constant 33 : index
    %123 = vector.load %arg0[%c1_75, %c0_76, %c33_77] : memref<2x1x768xf32, #tpu.memory_space<vmem>>, vector<1x1x640xf32>
    %124 = vector.shape_cast %123 : vector<1x1x640xf32> to vector<1x640xf32>
    %c1_78 = arith.constant 1 : index
    %c0_79 = arith.constant 0 : index
    %c34_80 = arith.constant 34 : index
    %125 = vector.load %arg0[%c1_78, %c0_79, %c34_80] : memref<2x1x768xf32, #tpu.memory_space<vmem>>, vector<1x1x640xf32>
    %126 = vector.shape_cast %125 : vector<1x1x640xf32> to vector<1x640xf32>
    %cst_81 = arith.constant 0.000000e+00 : f32
    %127 = vector.broadcast %cst_81 : f32 to vector<1x640xf32>
    %128 = arith.select %32, %126, %127 : vector<1x640xi1>, vector<1x640xf32>
    %129 = tpu.concatenate %102, %104, %108, %112, %114, %118, %122, %124, %128 in 0 : vector<1x640xf32>, vector<1x640xf32>, vector<1x640xf32>, vector<1x640xf32>, vector<1x640xf32>, vector<1x640xf32>, vector<1x640xf32>, vector<1x640xf32>, vector<1x640xf32> -> vector<9x640xf32>
    %c1_82 = arith.constant 1 : index
    %c0_83 = arith.constant 0 : index
    %c0_84 = arith.constant 0 : index
    %130 = vector.load %arg1[%c1_82, %c0_83, %c0_84] : memref<2x32x9xf32, #tpu.memory_space<vmem>>, vector<1x32x9xf32>
    %131 = vector.shape_cast %130 : vector<1x32x9xf32> to vector<32x9xf32>
    %cst_85 = arith.constant dense<0.000000e+00> : vector<32x640xf32>
    %132 = tpu.matmul %131, %129, %cst_85 {dimension_numbers = #tpu.dot_dimension_numbers<[1], [0], [0], [1], [0, 0, 1, 1], [], []>} : vector<32x9xf32>, vector<9x640xf32>, vector<32x640xf32> -> vector<32x640xf32>
    %c1_86 = arith.constant 1 : index
    %c0_87 = arith.constant 0 : index
    %c0_88 = arith.constant 0 : index
    %133 = vector.load %arg2[%c1_86, %c0_87, %c0_88] : memref<2x32x1xf32, #tpu.memory_space<vmem>>, vector<1x32x1xf32>
    %134 = vector.shape_cast %133 : vector<1x32x1xf32> to vector<32x1xf32>
    %135 = vector.broadcast %134 : vector<32x1xf32> to vector<32x640xf32>
    %136 = arith.addf %132, %135 : vector<32x640xf32>
    %cst_89 = arith.constant 0.000000e+00 : f32
    %137 = vector.broadcast %cst_89 : f32 to vector<32x640xf32>
    %138 = arith.cmpf ogt, %136, %137 : vector<32x640xf32>
    %cst_90 = arith.constant 0.00999999977 : f32
    %139 = vector.broadcast %cst_90 : f32 to vector<32x640xf32>
    %140 = arith.mulf %139, %136 : vector<32x640xf32>
    %141 = arith.select %138, %136, %140 : vector<32x640xi1>, vector<32x640xf32>
    %cst_91 = arith.constant dense<0.000000e+00> : vector<2x32xf32>
    %142 = tpu.matmul %46, %141, %cst_91 {dimension_numbers = #tpu.dot_dimension_numbers<[1], [1], [0], [0], [0, 0, 1, 0], [], []>} : vector<2x640xf32>, vector<32x640xf32>, vector<2x32xf32> -> vector<2x32xf32>
    %143 = arith.truncf %142 : vector<2x32xf32> to vector<2x32xbf16>
    %c1_92 = arith.constant 1 : index
    %c0_93 = arith.constant 0 : index
    %c0_94 = arith.constant 0 : index
    %144 = vector.load %arg3[%c1_92, %c0_93, %c0_94] : memref<2x32x64xbf16, #tpu.memory_space<vmem>>, vector<1x32x64xbf16>
    %145 = vector.shape_cast %144 : vector<1x32x64xbf16> to vector<32x64xbf16>
    %cst_95 = arith.constant dense<0.000000e+00> : vector<2x64xf32>
    %146 = tpu.matmul %143, %145, %cst_95 {dimension_numbers = #tpu.dot_dimension_numbers<[1], [0], [0], [1], [0, 0, 1, 1], [], []>} : vector<2x32xbf16>, vector<32x64xbf16>, vector<2x64xf32> -> vector<2x64xf32>
    %c1_96 = arith.constant 1 : index
    %c0_97 = arith.constant 0 : index
    %c0_98 = arith.constant 0 : index
    %147 = vector.load %arg4[%c1_96, %c0_97, %c0_98] : memref<2x1x64xf32, #tpu.memory_space<vmem>>, vector<1x1x64xf32>
    %148 = vector.shape_cast %147 : vector<1x1x64xf32> to vector<1x64xf32>
    %149 = vector.broadcast %148 : vector<1x64xf32> to vector<2x64xf32>
    %150 = arith.addf %146, %149 : vector<2x64xf32>
    %c0_99 = arith.constant 0 : index
    %c0_100 = arith.constant 0 : index
    %151 = vector.load %arg5[%c0_99, %c0_100] : memref<2x12xf32, #tpu.memory_space<vmem>>, vector<2x12xf32>
    %cst_101 = arith.constant 0.000000e+00 : f32
    %152 = vector.broadcast %cst_101 : f32 to vector<2x4xf32>
    %153 = tpu.concatenate %98, %150, %151, %152 in 1 : vector<2x64xf32>, vector<2x64xf32>, vector<2x12xf32>, vector<2x4xf32> -> vector<2x144xf32>
    %c0_i32_102 = arith.constant 0 : i32
    %154 = tpu.memref_slice %arg20[%c0_i32_102] : memref<6x!tpu.dma_semaphore, #tpu.memory_space<semaphore_mem>> -> memref<1x!tpu.dma_semaphore, #tpu.memory_space<semaphore_mem>>
    %155 = tpu.memref_squeeze %154 : memref<1x!tpu.dma_semaphore, #tpu.memory_space<semaphore_mem>> -> memref<!tpu.dma_semaphore, #tpu.memory_space<semaphore_mem>>
    tpu.wait_dma2 semaphore(%155 : memref<!tpu.dma_semaphore, #tpu.memory_space<semaphore_mem>>) src(%arg7 : memref<144x512xbf16, #tpu.memory_space<any>>) dst(%arg14 : memref<144x512xbf16, #tpu.memory_space<vmem>>)
    %c0_103 = arith.constant 0 : index
    %c0_104 = arith.constant 0 : index
    %156 = vector.load %arg14[%c0_103, %c0_104] : memref<144x512xbf16, #tpu.memory_space<vmem>>, vector<144x512xbf16>
    %157 = arith.truncf %153 : vector<2x144xf32> to vector<2x144xbf16>
    %cst_105 = arith.constant dense<0.000000e+00> : vector<2x512xf32>
    %158 = tpu.matmul %157, %156, %cst_105 {dimension_numbers = #tpu.dot_dimension_numbers<[1], [0], [0], [1], [0, 0, 1, 1], [], []>} : vector<2x144xbf16>, vector<144x512xbf16>, vector<2x512xf32> -> vector<2x512xf32>
    %c0_106 = arith.constant 0 : index
    %c0_107 = arith.constant 0 : index
    %159 = vector.load %arg6[%c0_106, %c0_107] : memref<6x512xf32, #tpu.memory_space<vmem>>, vector<1x512xf32>
    %160 = vector.broadcast %159 : vector<1x512xf32> to vector<2x512xf32>
    %161 = arith.addf %158, %160 : vector<2x512xf32>
    %cst_108 = arith.constant 0.000000e+00 : f32
    %162 = vector.broadcast %cst_108 : f32 to vector<2x512xf32>
    %163 = arith.cmpf ogt, %161, %162 : vector<2x512xf32>
    %cst_109 = arith.constant 0.00999999977 : f32
    %164 = vector.broadcast %cst_109 : f32 to vector<2x512xf32>
    %165 = arith.mulf %164, %161 : vector<2x512xf32>
    %166 = arith.select %163, %161, %165 : vector<2x512xi1>, vector<2x512xf32>
    %c1_i32_110 = arith.constant 1 : i32
    %167 = tpu.memref_slice %arg20[%c1_i32_110] : memref<6x!tpu.dma_semaphore, #tpu.memory_space<semaphore_mem>> -> memref<1x!tpu.dma_semaphore, #tpu.memory_space<semaphore_mem>>
    %168 = tpu.memref_squeeze %167 : memref<1x!tpu.dma_semaphore, #tpu.memory_space<semaphore_mem>> -> memref<!tpu.dma_semaphore, #tpu.memory_space<semaphore_mem>>
    tpu.wait_dma2 semaphore(%168 : memref<!tpu.dma_semaphore, #tpu.memory_space<semaphore_mem>>) src(%arg8 : memref<512x256xbf16, #tpu.memory_space<any>>) dst(%arg15 : memref<512x256xbf16, #tpu.memory_space<vmem>>)
    %c0_111 = arith.constant 0 : index
    %c0_112 = arith.constant 0 : index
    %169 = vector.load %arg15[%c0_111, %c0_112] : memref<512x256xbf16, #tpu.memory_space<vmem>>, vector<512x256xbf16>
    %170 = arith.truncf %166 : vector<2x512xf32> to vector<2x512xbf16>
    %cst_113 = arith.constant dense<0.000000e+00> : vector<2x256xf32>
    %171 = tpu.matmul %170, %169, %cst_113 {dimension_numbers = #tpu.dot_dimension_numbers<[1], [0], [0], [1], [0, 0, 1, 1], [], []>} : vector<2x512xbf16>, vector<512x256xbf16>, vector<2x256xf32> -> vector<2x256xf32>
    %c1_114 = arith.constant 1 : index
    %c0_115 = arith.constant 0 : index
    %172 = vector.load %arg6[%c1_114, %c0_115] : memref<6x512xf32, #tpu.memory_space<vmem>>, vector<1x256xf32>
    %173 = vector.broadcast %172 : vector<1x256xf32> to vector<2x256xf32>
    %174 = arith.addf %171, %173 : vector<2x256xf32>
    %cst_116 = arith.constant 0.000000e+00 : f32
    %175 = vector.broadcast %cst_116 : f32 to vector<2x256xf32>
    %176 = arith.cmpf ogt, %174, %175 : vector<2x256xf32>
    %cst_117 = arith.constant 0.00999999977 : f32
    %177 = vector.broadcast %cst_117 : f32 to vector<2x256xf32>
    %178 = arith.mulf %177, %174 : vector<2x256xf32>
    %179 = arith.select %176, %174, %178 : vector<2x256xi1>, vector<2x256xf32>
    %c2_i32_118 = arith.constant 2 : i32
    %180 = tpu.memref_slice %arg20[%c2_i32_118] : memref<6x!tpu.dma_semaphore, #tpu.memory_space<semaphore_mem>> -> memref<1x!tpu.dma_semaphore, #tpu.memory_space<semaphore_mem>>
    %181 = tpu.memref_squeeze %180 : memref<1x!tpu.dma_semaphore, #tpu.memory_space<semaphore_mem>> -> memref<!tpu.dma_semaphore, #tpu.memory_space<semaphore_mem>>
    tpu.wait_dma2 semaphore(%181 : memref<!tpu.dma_semaphore, #tpu.memory_space<semaphore_mem>>) src(%arg9 : memref<256x128xbf16, #tpu.memory_space<any>>) dst(%arg16 : memref<256x128xbf16, #tpu.memory_space<vmem>>)
    %c0_119 = arith.constant 0 : index
    %c0_120 = arith.constant 0 : index
    %182 = vector.load %arg16[%c0_119, %c0_120] : memref<256x128xbf16, #tpu.memory_space<vmem>>, vector<256x128xbf16>
    %183 = arith.truncf %179 : vector<2x256xf32> to vector<2x256xbf16>
    %cst_121 = arith.constant dense<0.000000e+00> : vector<2x128xf32>
    %184 = tpu.matmul %183, %182, %cst_121 {dimension_numbers = #tpu.dot_dimension_numbers<[1], [0], [0], [1], [0, 0, 1, 1], [], []>} : vector<2x256xbf16>, vector<256x128xbf16>, vector<2x128xf32> -> vector<2x128xf32>
    %c2_122 = arith.constant 2 : index
    %c0_123 = arith.constant 0 : index
    %185 = vector.load %arg6[%c2_122, %c0_123] : memref<6x512xf32, #tpu.memory_space<vmem>>, vector<1x128xf32>
    %186 = vector.broadcast %185 : vector<1x128xf32> to vector<2x128xf32>
    %187 = arith.addf %184, %186 : vector<2x128xf32>
    %cst_124 = arith.constant 0.000000e+00 : f32
    %188 = vector.broadcast %cst_124 : f32 to vector<2x128xf32>
    %189 = arith.cmpf ogt, %187, %188 : vector<2x128xf32>
    %cst_125 = arith.constant 0.00999999977 : f32
    %190 = vector.broadcast %cst_125 : f32 to vector<2x128xf32>
    %191 = arith.mulf %190, %187 : vector<2x128xf32>
    %192 = arith.select %189, %187, %191 : vector<2x128xi1>, vector<2x128xf32>
    %c3_i32_126 = arith.constant 3 : i32
    %193 = tpu.memref_slice %arg20[%c3_i32_126] : memref<6x!tpu.dma_semaphore, #tpu.memory_space<semaphore_mem>> -> memref<1x!tpu.dma_semaphore, #tpu.memory_space<semaphore_mem>>
    %194 = tpu.memref_squeeze %193 : memref<1x!tpu.dma_semaphore, #tpu.memory_space<semaphore_mem>> -> memref<!tpu.dma_semaphore, #tpu.memory_space<semaphore_mem>>
    tpu.wait_dma2 semaphore(%194 : memref<!tpu.dma_semaphore, #tpu.memory_space<semaphore_mem>>) src(%arg10 : memref<128x64xbf16, #tpu.memory_space<any>>) dst(%arg17 : memref<128x64xbf16, #tpu.memory_space<vmem>>)
    %c0_127 = arith.constant 0 : index
    %c0_128 = arith.constant 0 : index
    %195 = vector.load %arg17[%c0_127, %c0_128] : memref<128x64xbf16, #tpu.memory_space<vmem>>, vector<128x64xbf16>
    %196 = arith.truncf %192 : vector<2x128xf32> to vector<2x128xbf16>
    %cst_129 = arith.constant dense<0.000000e+00> : vector<2x64xf32>
    %197 = tpu.matmul %196, %195, %cst_129 {dimension_numbers = #tpu.dot_dimension_numbers<[1], [0], [0], [1], [0, 0, 1, 1], [], []>} : vector<2x128xbf16>, vector<128x64xbf16>, vector<2x64xf32> -> vector<2x64xf32>
    %c3 = arith.constant 3 : index
    %c0_130 = arith.constant 0 : index
    %198 = vector.load %arg6[%c3, %c0_130] : memref<6x512xf32, #tpu.memory_space<vmem>>, vector<1x64xf32>
    %199 = vector.broadcast %198 : vector<1x64xf32> to vector<2x64xf32>
    %200 = arith.addf %197, %199 : vector<2x64xf32>
    %cst_131 = arith.constant 0.000000e+00 : f32
    %201 = vector.broadcast %cst_131 : f32 to vector<2x64xf32>
    %202 = arith.cmpf ogt, %200, %201 : vector<2x64xf32>
    %cst_132 = arith.constant 0.00999999977 : f32
    %203 = vector.broadcast %cst_132 : f32 to vector<2x64xf32>
    %204 = arith.mulf %203, %200 : vector<2x64xf32>
    %205 = arith.select %202, %200, %204 : vector<2x64xi1>, vector<2x64xf32>
    %c4_i32_133 = arith.constant 4 : i32
    %206 = tpu.memref_slice %arg20[%c4_i32_133] : memref<6x!tpu.dma_semaphore, #tpu.memory_space<semaphore_mem>> -> memref<1x!tpu.dma_semaphore, #tpu.memory_space<semaphore_mem>>
    %207 = tpu.memref_squeeze %206 : memref<1x!tpu.dma_semaphore, #tpu.memory_space<semaphore_mem>> -> memref<!tpu.dma_semaphore, #tpu.memory_space<semaphore_mem>>
    tpu.wait_dma2 semaphore(%207 : memref<!tpu.dma_semaphore, #tpu.memory_space<semaphore_mem>>) src(%arg11 : memref<64x32xbf16, #tpu.memory_space<any>>) dst(%arg18 : memref<64x32xbf16, #tpu.memory_space<vmem>>)
    %c0_134 = arith.constant 0 : index
    %c0_135 = arith.constant 0 : index
    %208 = vector.load %arg18[%c0_134, %c0_135] : memref<64x32xbf16, #tpu.memory_space<vmem>>, vector<64x32xbf16>
    %209 = arith.truncf %205 : vector<2x64xf32> to vector<2x64xbf16>
    %cst_136 = arith.constant dense<0.000000e+00> : vector<2x32xf32>
    %210 = tpu.matmul %209, %208, %cst_136 {dimension_numbers = #tpu.dot_dimension_numbers<[1], [0], [0], [1], [0, 0, 1, 1], [], []>} : vector<2x64xbf16>, vector<64x32xbf16>, vector<2x32xf32> -> vector<2x32xf32>
    %c4 = arith.constant 4 : index
    %c0_137 = arith.constant 0 : index
    %211 = vector.load %arg6[%c4, %c0_137] : memref<6x512xf32, #tpu.memory_space<vmem>>, vector<1x32xf32>
    %212 = vector.broadcast %211 : vector<1x32xf32> to vector<2x32xf32>
    %213 = arith.addf %210, %212 : vector<2x32xf32>
    %cst_138 = arith.constant 0.000000e+00 : f32
    %214 = vector.broadcast %cst_138 : f32 to vector<2x32xf32>
    %215 = arith.cmpf ogt, %213, %214 : vector<2x32xf32>
    %cst_139 = arith.constant 0.00999999977 : f32
    %216 = vector.broadcast %cst_139 : f32 to vector<2x32xf32>
    %217 = arith.mulf %216, %213 : vector<2x32xf32>
    %218 = arith.select %215, %213, %217 : vector<2x32xi1>, vector<2x32xf32>
    %c5_i32_140 = arith.constant 5 : i32
    %219 = tpu.memref_slice %arg20[%c5_i32_140] : memref<6x!tpu.dma_semaphore, #tpu.memory_space<semaphore_mem>> -> memref<1x!tpu.dma_semaphore, #tpu.memory_space<semaphore_mem>>
    %220 = tpu.memref_squeeze %219 : memref<1x!tpu.dma_semaphore, #tpu.memory_space<semaphore_mem>> -> memref<!tpu.dma_semaphore, #tpu.memory_space<semaphore_mem>>
    tpu.wait_dma2 semaphore(%220 : memref<!tpu.dma_semaphore, #tpu.memory_space<semaphore_mem>>) src(%arg12 : memref<32x1xbf16, #tpu.memory_space<any>>) dst(%arg19 : memref<32x1xbf16, #tpu.memory_space<vmem>>)
    %c0_141 = arith.constant 0 : index
    %c0_142 = arith.constant 0 : index
    %221 = vector.load %arg19[%c0_141, %c0_142] : memref<32x1xbf16, #tpu.memory_space<vmem>>, vector<32x1xbf16>
    %222 = arith.truncf %218 : vector<2x32xf32> to vector<2x32xbf16>
    %cst_143 = arith.constant dense<0.000000e+00> : vector<2x1xf32>
    %223 = tpu.matmul %222, %221, %cst_143 {dimension_numbers = #tpu.dot_dimension_numbers<[1], [0], [0], [1], [0, 0, 1, 1], [], []>} : vector<2x32xbf16>, vector<32x1xbf16>, vector<2x1xf32> -> vector<2x1xf32>
    %c5 = arith.constant 5 : index
    %c0_144 = arith.constant 0 : index
    %224 = vector.load %arg6[%c5, %c0_144] : memref<6x512xf32, #tpu.memory_space<vmem>>, vector<1x1xf32>
    %225 = vector.broadcast %224 : vector<1x1xf32> to vector<2x1xf32>
    %226 = arith.addf %223, %225 : vector<2x1xf32>
    %c0_145 = arith.constant 0 : index
    %c0_146 = arith.constant 0 : index
    %227 = vector.load %arg13[%c0_145, %c0_146] : memref<2x1xf32, #tpu.memory_space<vmem>>, vector<2x1xf32>
    tpu.vector_store %arg13[%c0_145, %c0_146], %226 {strides = array<i32>} : memref<2x1xf32, #tpu.memory_space<vmem>>, vector<2x1xf32>,
    return
  }
}

</mosaic_0001>

<bundles_post_ra>
// kernel: critic_forward.1
= control target key start
LH: loop header
LB: loop body
LE: loop exit
PB: predicated region body
PF: predicated region fallthrough
CT: control target
= control target key end

     0   :  { %s4074_s28 = smov [#allocation2]   ;;  %s4075_s25 = smov [#allocation3]   ;;  %s5380_s0 = inlined_call_operand.vmem [shape: f32[2,1,768], index: 0, kind: input, shape index: {}]   ;;  %s5381_s1 = inlined_call_operand.vmem [shape: f32[2,32,9], index: 1, kind: input, shape index: {}]   ;;  %s5382_s2 = inlined_call_operand.vmem [shape: f32[2,32,1], index: 2, kind: input, shape index: {}]   ;;  %s5383_s3 = inlined_call_operand.vmem [shape: bf16[2,32,64], index: 3, kind: input, shape index: {}]   ;;  %s5384_s4 = inlined_call_operand.vmem [shape: f32[2,1,64], index: 4, kind: input, shape index: {}]   ;;  %s5385_s5 = inlined_call_operand.vmem [shape: f32[2,12], index: 5, kind: input, shape index: {}]   ;;  %s5386_s6 = inlined_call_operand.vmem [shape: f32[6,512], index: 6, kind: input, shape index: {}]   ;;  %s5387_s7 = inlined_call_operand.hbm [shape: bf16[144,512], index: 7, kind: input, shape index: {}]   ;;  %s5388_s10 = inlined_call_operand.vmem [shape: bf16[128,64], index: 10, kind: input, shape index: {}]   ;;  %s5389_s11 = inlined_call_operand.vmem [shape: bf16[64,32], index: 11, kind: input, shape index: {}]   ;;  %s5390_s12 = inlined_call_operand.vmem [shape: bf16[32,1], index: 12, kind: input, shape index: {}]   ;;  %s5391_s13 = inlined_call_operand.vmem [shape: f32[2,1], index: 13, kind: output, shape index: {}]   ;;  %s5392_s9 = inlined_call_operand.vmem [shape: bf16[256,128], index: 9, kind: input, shape index: {}]   ;;  %s5393_s8 = inlined_call_operand.hbm [shape: bf16[512,256], index: 8, kind: input, shape index: {}]  }
   0x1   :  { %s40_s27 = sshll.u32 %s5387_s7, 4  ;;  %s42_s29 = sshll.u32 %s4074_s28, 4  ;;  %v71_v0 = vld [vmem:[%s5392_s9] sm:$0xff]  ;;  %v73_v1 = vld [vmem:[%s5392_s9 + $0x8] sm:$0xff]  ;;  %v75_v2 = vld [vmem:[%s5392_s9 + $0x10] sm:$0xff]  ;;  %s41_s27 = int_to_ptr.hbm [resolvable:$true] %s40_s27  ;;  %s43_s29 = int_to_ptr.vmem [resolvable:$true] %s42_s29 }
   0x2   :  { %72 = vst [vmem:[#allocation4 + $0x30] sm:$0xff] %v71_v0  ;;  %v77_v3 = vld [vmem:[%s5392_s9 + $0x18] sm:$0xff]  ;;  %45 = dma.hbm_to_vmem [thread:$0]  %s41_s27, 4608, %s43_s29, [#allocation8]  ;;  %v79_v4 = vld [vmem:[%s5392_s9 + $0x20] sm:$0xff]  ;;  %v81_v5 = vld [vmem:[%s5392_s9 + $0x28] sm:$0xff] }
   0x3   :  { %74 = vst [vmem:[#allocation4] sm:$0xff] %v73_v1  ;;  %s54_s24 = sshll.u32 %s5393_s8, 4  ;;  %s56_s26 = sshll.u32 %s4075_s25, 4  ;;  %v83_v6 = vld [vmem:[%s5392_s9 + $0x30] sm:$0xff]  ;;  %v85_v7 = vld [vmem:[%s5392_s9 + $0x38] sm:$0xff]  ;;  %v87_v8 = vld [vmem:[%s5392_s9 + $0x40] sm:$0xff]  ;;  %s55_s24 = int_to_ptr.hbm [resolvable:$true] %s54_s24  ;;  %s57_s26 = int_to_ptr.vmem [resolvable:$true] %s56_s26 }
   0x4   :  { %76 = vst [vmem:[#allocation4 + $0x58] sm:$0xff] %v75_v2  ;;  %59 = dma.hbm_to_vmem [thread:$0]  %s55_s24, 8192, %s57_s26, [#allocation8 + $0x1]  ;;  %v89_v9 = vld [vmem:[%s5392_s9 + $0x48] sm:$0xff]  ;;  %v91_v10 = vld [vmem:[%s5392_s9 + $0x50] sm:$0xff]  ;;  %v93_v11 = vld [vmem:[%s5392_s9 + $0x58] sm:$0xff] }
   0x5   :  { %78 = vst [vmem:[#allocation4 + $0x18] sm:$0xff] %v77_v3  ;;  %v95_v12 = vld [vmem:[%s5392_s9 + $0x60] sm:$0xff]  ;;  %v97_v13 = vld [vmem:[%s5392_s9 + $0x68] sm:$0xff]  ;;  %v99_v14 = vld [vmem:[%s5392_s9 + $0x70] sm:$0xff] }
   0x6   :  { %80 = vst [vmem:[#allocation4 + $0x50] sm:$0xff] %v79_v4  ;;  %v101_v15 = vld [vmem:[%s5392_s9 + $0x78] sm:$0xff] }
   0x7   :  { %82 = vst [vmem:[#allocation4 + $0x68] sm:$0xff] %v81_v5 }
   0x8   :  { %84 = vst [vmem:[#allocation4 + $0x8] sm:$0xff] %v83_v6 }
   0x9   :  { %86 = vst [vmem:[#allocation4 + $0x48] sm:$0xff] %v85_v7 }
   0xa   :  { %88 = vst [vmem:[#allocation4 + $0x40] sm:$0xff] %v87_v8 }
   0xb   :  { %90 = vst [vmem:[#allocation4 + $0x20] sm:$0xff] %v89_v9 }
   0xc   :  { %92 = vst [vmem:[#allocation4 + $0x10] sm:$0xff] %v91_v10 }
   0xd   :  { %94 = vst [vmem:[#allocation4 + $0x38] sm:$0xff] %v93_v11 }
   0xe   :  { %96 = vst [vmem:[#allocation4 + $0x60] sm:$0xff] %v95_v12 }
   0xf   :  { %98 = vst [vmem:[#allocation4 + $0x70] sm:$0xff] %v97_v13 }
  0x10   :  { %100 = vst [vmem:[#allocation4 + $0x78] sm:$0xff] %v99_v14 }
  0x11   :  { %102 = vst [vmem:[#allocation4 + $0x28] sm:$0xff] %v101_v15 }
  0x12   :  { %108 = vsyncadd [#allocation8 + $0x2], 2048  ;;  %v120_v16 = vld [vmem:[%s5388_s10] sm:$0xff]  ;;  %v122_v17 = vld [vmem:[%s5388_s10 + $0x8] sm:$0xff] }
  0x13   :  { %121 = vst [vmem:[#allocation5 + $0x28] sm:$0xff] %v120_v16  ;;  %v124_v18 = vld [vmem:[%s5388_s10 + $0x10] sm:$0xff]  ;;  %v126_v19 = vld [vmem:[%s5388_s10 + $0x18] sm:$0xff]  ;;  %v128_v20 = vld [vmem:[%s5388_s10 + $0x20] sm:$0xff] }
  0x14   :  { %123 = vst [vmem:[#allocation5] sm:$0xff] %v122_v17  ;;  %v130_v21 = vld [vmem:[%s5388_s10 + $0x28] sm:$0xff]  ;;  %v132_v22 = vld [vmem:[%s5388_s10 + $0x30] sm:$0xff]  ;;  %v134_v23 = vld [vmem:[%s5388_s10 + $0x38] sm:$0xff] }
  0x15   :  { %125 = vst [vmem:[#allocation5 + $0x10] sm:$0xff] %v124_v18 }
  0x16   :  { %127 = vst [vmem:[#allocation5 + $0x20] sm:$0xff] %v126_v19 }
  0x17   :  { %129 = vst [vmem:[#allocation5 + $0x18] sm:$0xff] %v128_v20 }
  0x18   :  { %131 = vst [vmem:[#allocation5 + $0x8] sm:$0xff] %v130_v21 }
  0x19   :  { %133 = vst [vmem:[#allocation5 + $0x38] sm:$0xff] %v132_v22 }
  0x1a   :  { %135 = vst [vmem:[#allocation5 + $0x30] sm:$0xff] %v134_v23 }
  0x1b   :  { %141 = vsyncadd [#allocation8 + $0x3], 1024  ;;  %v153_v24 = vld [vmem:[%s5389_s11] sm:$0xff]  ;;  %v155_v25 = vld [vmem:[%s5389_s11 + $0x8] sm:$0xff] }
  0x1c   :  { %154 = vst [vmem:[#allocation6 + $0x10] sm:$0xff] %v153_v24  ;;  %v157_v26 = vld [vmem:[%s5389_s11 + $0x10] sm:$0xff]  ;;  %v159_v27 = vld [vmem:[%s5389_s11 + $0x18] sm:$0xff] }
  0x1d   :  { %156 = vst [vmem:[#allocation6] sm:$0xff] %v155_v25 }
  0x1e   :  { %158 = vst [vmem:[#allocation6 + $0x8] sm:$0xff] %v157_v26 }
  0x1f   :  { %160 = vst [vmem:[#allocation6 + $0x18] sm:$0xff] %v159_v27 }
  0x20   :  { %166 = vsyncadd [#allocation8 + $0x4], 512  ;;  %v178_v28 = vld [vmem:[%s5390_s12] sm:$0xff]  ;;  %v180_v29 = vld [vmem:[%s5390_s12 + $0x8] sm:$0xff] }
  0x21   :  { %179 = vst [vmem:[#allocation7] sm:$0xff] %v178_v28  ;;  %v305_v30 = vld [vmem:[%s5380_s0] sm:$0x3f] }
  0x22   :  { %181 = vst [vmem:[#allocation7 + $0x8] sm:$0xff] %v180_v29 }
  0x23   :  { %187 = vsyncadd [#allocation8 + $0x5], 256  ;;  %v307_v31 = vperm.slane %v305_v30, 0  ;;  %v308_v32 = vperm.slane %v305_v30, 1  ;;  %s4076_s11 = smov 96   ;;  %s4077_s20 = smov 127   ;;  %v5420_v54 = vlaneseq }
  0x24   :  { %s4078_s7 = smov 126   ;;  %s4079_s12 = smov 111   ;;  %v309_v34 = vperm.slane %v305_v30, 2  ;;  %v310_v35 = vperm.slane %v305_v30, 3  ;;  %v311_v37 = vperm.slane %v305_v30, 4  ;;  %v312_v38 = vperm.slane %v305_v30, 5 }
  0x25   :  { %v3819_v33 = vpack.i.bf16 %v308_v32, %v307_v31  ;;  %s4080_s21 = smov 110   ;;  %s4081_s22 = smov 112   ;;  %v4084_v39 = vmov 0   ;;  %v630_v41 = vld [vmem:[%s5382_s2 + $0x10] sm:$0xff]  ;;  %v629_v42 = vld [vmem:[%s5382_s2 + $0x8] sm:$0xff]  ;;  %v631_v43 = vld [vmem:[%s5382_s2 + $0x18] sm:$0xff] }
  0x26   :  { %s4082_s23 = smov 95   ;;  %s4083_s24 = smov 94   ;;  %v3844_v36 = vpack.i.bf16 %v310_v35, %v309_v34  ;;  %3905 = vset.pattern.permute.xlu1 %v4084_v39  ;;  %3904 = vset.pattern.permute.xlu0 %v4084_v39  ;;  %v3864_v40 = vpack.i.bf16 %v312_v38, %v311_v37  ;;  %v4295_v44 = vld [vmem:[%s5380_s0 + $0x6] sm:$0x3f]  ;;  %v4324_v56 = vand.u32 127, %v5420_v54  ;;  %vm5408_vm0 = vcmask 1031168  }
  0x27   :  { %3820 = vrot.lane.b32.xlu2 %v3819_v33, %s4076_s11  ;;  %3810 = vrot.lane.b32.xlu1 %v3819_v33, %s4077_s20  ;;  %v1043_v45 = vperm.slane %v4295_v44, 0  ;;  %v1044_v46 = vperm.slane %v4295_v44, 1  ;;  %v628_v48 = vld [vmem:[%s5382_s2] sm:$0xff]  ;;  %v1045_v51 = vperm.slane %v4295_v44, 2  ;;  %v1046_v52 = vperm.slane %v4295_v44, 3 }
  0x28   :  { %3800 = vrot.lane.b32.xlu0 %v3819_v33, %s4078_s7  ;;  %3906 = vset.pattern.permute.xlu2 %v4084_v39  ;;  %v198_v57 = vand.u32 15, %v4324_v56  ;;  %v4334_v59 = vld [vmem:[%s5380_s0] sm:$0x1f]  ;;  %vm5405_vm1 = vcmask 785408   ;;  %vm5409_vm4 = vcmask 1039360   ;;  %v1047_v9 = vperm.slane %v4295_v44, 4 }
  0x29   :  { %v3907_v47 = vpack.i.bf16 %v1044_v46, %v1043_v45  ;;  %v3947_v53 = vpack.i.bf16 %v1046_v52, %v1045_v51  ;;  %v290_v2 = vperm.slane %v4334_v59, 0  ;;  %v1048_v10 = vperm.slane %v4295_v44, 5 }
  0x2a   :  { %vm4346_vm2 = vcmp.ne.s32.totalorder %v198_v57, 0  ;;  %vm4352_vm3 = vcmp.ne.s32.totalorder %v198_v57, 15  ;;  %vm5406_vm5 = vcmask 908288   ;;  %vm5407_vm6 = vcmask 1040384  }
  0x2b   :  { %v300_v11 = vsel %vm4346_vm2, %v290_v2, 0.0  ;;  %vm5401_vm7 = vcmask 900096   ;;  %vm5400_vm8 = vcmask 916480   ;;  %vm5394_vm9 = vcmask 1041408  }
  0x2c   :  { %v4391_v23 = vpack.i.bf16 %v1048_v10, %v1047_v9  ;;  %vm5404_vm10 = vcmask 1042432   ;;  %vm5395_vm11 = vcmask 777216   ;;  %vm5399_vm12 = vcmask 1043456  }
  0x2d   :  { %vm5403_vm13 = vcmask 769024   ;;  %vm5398_vm14 = vcmask 1044480   ;;  %vm5397_vm15 = vcmask 1045504   ;;  %v4441_v57 = vadd.s32 256, %v4324_v56 }
  0x2f   :  { %3825 = vrot.lane.b32.xlu2 %v3819_v33, %s4079_s12  ;;  %3815 = vrot.lane.b32.xlu1 %v3819_v33, %s4080_s21 }
  0x30   :  { %3805 = vrot.lane.b32.xlu0 %v3819_v33, %s4081_s22 }
  0x37   :  { %3830 = vrot.lane.b32.xlu2 %v3819_v33, %s4082_s23  ;;  %427 = vrot.lane.b32.xlu1 %v308_v32, %s4083_s24 }
  0x38   :  { %425 = vrot.lane.b32.xlu0 %v307_v31, %s4083_s24 }
  0x3f   :  { %3845 = vrot.lane.b32.xlu2 %v3844_v36, %s4077_s20  ;;  %3840 = vrot.lane.b32.xlu1 %v3844_v36, %s4081_s22 }
  0x40   :  { %3835 = vrot.lane.b32.xlu0 %v3844_v36, %s4078_s7 }
  0x47   :  { %3855 = vrot.lane.b32.xlu1 %v3844_v36, %s4076_s11  ;;  %3860 = vrot.lane.b32.xlu2 %v3844_v36, %s4079_s12 }
  0x48   :  { %3850 = vrot.lane.b32.xlu0 %v3844_v36, %s4080_s21 }
  0x4f   :  { %431 = vrot.lane.b32.xlu1 %v310_v35, %s4083_s24  ;;  %3865 = vrot.lane.b32.xlu2 %v3864_v40, %s4078_s7 }
  0x50   :  { %429 = vrot.lane.b32.xlu0 %v309_v34, %s4083_s24 }
  0x57   :  { %3875 = vrot.lane.b32.xlu1 %v3864_v40, %s4081_s22  ;;  %3880 = vrot.lane.b32.xlu2 %v3864_v40, %s4077_s20 }
  0x58   :  { %3870 = vrot.lane.b32.xlu0 %v3844_v36, %s4082_s23 }
  0x5f   :  { %3890 = vrot.lane.b32.xlu1 %v3864_v40, %s4076_s11  ;;  %3895 = vrot.lane.b32.xlu2 %v3864_v40, %s4079_s12 }
  0x60   :  { %3885 = vrot.lane.b32.xlu0 %v3864_v40, %s4080_s21 }
  0x67   :  { %435 = vrot.lane.b32.xlu1 %v312_v38, %s4083_s24  ;;  %3900 = vrot.lane.b32.xlu2 %v3864_v40, %s4082_s23 }
  0x68   :  { %433 = vrot.lane.b32.xlu0 %v311_v37, %s4083_s24 }
  0x6f   :  { %644 = vperm.xlu1 %3905, %v630_v41   ;;  %639 = vperm.xlu2 %3906, %v629_v42  }
  0x70   :  { %649 = vperm.xlu0 %3904, %v631_v43  }
  0x77   :  { %634 = vperm.xlu1 %3905, %v628_v48   ;;  %3908 = vrot.lane.b32.xlu2 %v3907_v47, %s4078_s7 }
  0x78   :  { %3913 = vrot.lane.b32.xlu0 %v3907_v47, %s4081_s22 }
  0x7f   :  { %3918 = vrot.lane.b32.xlu1 %v3907_v47, %s4077_s20  ;;  %3923 = vrot.lane.b32.xlu2 %v3907_v47, %s4080_s21 }
  0x80   :  { %3928 = vrot.lane.b32.xlu0 %v3907_v47, %s4076_s11 }
  0x81   :  { %v4307_v49 = vpop.permute.xlu2 %3820 }
  0x82   :  { %v3823_v62 = vunpack.i.h.bf16 %v4307_v49  ;;  %v3822_v63 = vunpack.i.l.bf16 %v4307_v49 }
  0x84   :  { %v410_v8 = vsel %vm5405_vm1, %v3822_v63, %v3823_v62  ;;  %v4446_v63 = vld [vmem:[%s5381_s1 + $0x18] sm:$0xff] }
  0x85   :  { %v420_v15 = vsel %vm4346_vm2, %v410_v8, 0.0 }
  0x86   :  { %v549_v41 = vrot.slane %v420_v15, 2 }
  0x87   :  { %3933 = vrot.lane.b32.xlu1 %v3907_v47, %s4079_s12  ;;  %1157 = vrot.lane.b32.xlu2 %v1043_v45, %s4083_s24 }
  0x88   :  { %1159 = vrot.lane.b32.xlu0 %v1044_v46, %s4083_s24 }
  0x89   :  { %v4312_v50 = vpop.permute.xlu2 %3825 }
  0x8a   :  { %v3828_v20 = vunpack.i.h.bf16 %v4312_v50  ;;  %v3827_v24 = vunpack.i.l.bf16 %v4312_v50  ;;  %v5459_v50 = vmov 0 }
  0x8c   :  { %v519_v36 = vsel %vm5406_vm5, %v3827_v24, %v3828_v20  ;;  %v4484_v24 = vadd.s32 512, %v4324_v56 }
  0x8f   :  { %3938 = vrot.lane.b32.xlu1 %v3907_v47, %s4082_s23  ;;  %3943 = vrot.lane.b32.xlu2 %v3947_v53, %s4078_s7 }
  0x90   :  { %3948 = vrot.lane.b32.xlu0 %v3947_v53, %s4081_s22 }
  0x91   :  { %v4321_v55 = vpop.permute.xlu2 %3830 }
  0x92   :  { %v3833_v30 = vunpack.i.h.bf16 %v4321_v55  ;;  %v3832_v31 = vunpack.i.l.bf16 %v4321_v55 }
  0x94   :  { %v572_v42 = vsel %vm5395_vm11, %v3832_v31, %v3833_v30  ;;  %vm5402_vm11 = vcmask 72704  }
  0x97   :  { %3953 = vrot.lane.b32.xlu1 %v3947_v53, %s4077_s20  ;;  %3958 = vrot.lane.b32.xlu2 %v3947_v53, %s4080_s21 }
  0x98   :  { %3963 = vrot.lane.b32.xlu0 %v3947_v53, %s4076_s11 }
  0x99   :  { %v4329_v58 = vpop.permute.xlu2 %3845  ;;  %v4336_v60 = vpop.permute.xlu1 %3810 }
  0x9a   :  { %v4339_v61 = vpop.permute.xlu0 %3800  ;;  %v3813_v4 = vunpack.i.h.bf16 %v4336_v60  ;;  %v3812_v5 = vunpack.i.l.bf16 %v4336_v60  ;;  %v3848_v31 = vunpack.i.h.bf16 %v4329_v58 }
  0x9b   :  { %v3803_v0 = vunpack.i.h.bf16 %v4339_v61  ;;  %v3802_v1 = vunpack.i.l.bf16 %v4339_v61 }
  0x9c   :  { %v466_v16 = vsel %vm5409_vm4, %v3812_v5, %v3813_v4 }
  0x9d   :  { %v326_v7 = vsel %vm5408_vm0, %v3802_v1, %v3803_v0  ;;  %v583_v27 = vsel %vm5407_vm6, %v300_v11, %v466_v16  ;;  %v4449_v1 = vadd.s32 128, %v4324_v56  ;;  %v292_v16 = vperm.slane %v4334_v59, 2 }
  0x9e   :  { %v336_v12 = vsel %vm4352_vm3, %v326_v7, 0.0  ;;  %v212_v7 = vand.u32 15, %v4441_v57 }
  0x9f   :  { %3968 = vrot.lane.b32.xlu1 %v3947_v53, %s4079_s12  ;;  %1161 = vrot.lane.b32.xlu2 %v1045_v51, %s4083_s24  ;;  %v481_v25 = vrot.slane %v336_v12, 6  ;;  %v205_v11 = vand.u32 15, %v4449_v1 }
  0xa0   :  { %3973 = vrot.lane.b32.xlu0 %v3947_v53, %s4082_s23  ;;  %v4438_v53 = vld [vmem:[%s5381_s1] sm:$0xff] }
  0xa1   :  { %v4370_v13 = vpop.permute.xlu1 %3815  ;;  %v4372_v14 = vpop.permute.xlu2 %3860  ;;  %v589_v35 = vsel %vm5394_vm9, %v583_v27, %v481_v25  ;;  %vm5396_vm9 = vcmask 1046528  }
  0xa2   :  { %v3818_v17 = vunpack.i.h.bf16 %v4370_v13  ;;  %v3817_v18 = vunpack.i.l.bf16 %v4370_v13  ;;  %v4382_v19 = vpop.permute.xlu0 %3805 }
  0xa3   :  { %v3808_v21 = vunpack.i.h.bf16 %v4382_v19  ;;  %v3807_v22 = vunpack.i.l.bf16 %v4382_v19 }
  0xa4   :  { %v382_v26 = vsel %vm5401_vm7, %v3817_v18, %v3818_v17  ;;  %v4476_v18 = vld [vmem:[%s5381_s1 + $0x8] sm:$0xff] }
  0xa5   :  { %v392_v28 = vsel %vm4352_vm3, %v382_v26, 0.0  ;;  %v354_v29 = vsel %vm5400_vm8, %v3807_v22, %v3808_v21  ;;  %v291_v22 = vperm.slane %v4334_v59, 1 }
  0xa6   :  { %v364_v32 = vsel %vm4346_vm2, %v354_v29, 0.0  ;;  %v534_v33 = vrot.slane %v392_v28, 3 }
  0xa7   :  { %v496_v34 = vrot.slane %v364_v32, 5  ;;  %3978 = vrot.lane.b32.xlu1 %v4391_v23, %s4078_s7  ;;  %3983 = vrot.lane.b32.xlu2 %v4391_v23, %s4081_s22  ;;  %v3847_v32 = vunpack.i.l.bf16 %v4329_v58 }
  0xa8   :  { %3988 = vrot.lane.b32.xlu0 %v4391_v23, %s4077_s20 }
  0xa9   :  { %v4415_v37 = vpop.permute.xlu1 %427  ;;  %v4417_v38 = vpop.permute.xlu2 %3865  ;;  %v595_v39 = vsel %vm5404_vm10, %v589_v35, %v496_v34  ;;  %v467_v44 = vsel %vm5409_vm4, %v3813_v4, %v3847_v32 }
  0xaa   :  { %v426_v40 = vpop.permute.xlu0 %425  ;;  %v601_v43 = vsel %vm5399_vm12, %v595_v39, %v519_v36  ;;  %vm4501_vm12 = vcmp.ne.s32.totalorder %v212_v7, 15  ;;  %v226_v39 = vand.u32 15, %v4484_v24 }
  0xab   :  { %v438_v45 = vsel %vm5403_vm13, %v426_v40, %v4415_v37  ;;  %v607_v46 = vsel %vm5398_vm14, %v601_v43, %v534_v33  ;;  %vm4492_vm14 = vcmp.ne.s32.totalorder %v205_v11, 15  ;;  %v5446_v33 = vmov 0 }
  0xac   :  { %v448_v47 = vsel %vm4352_vm3, %v438_v45, 0.0  ;;  %v613_v48 = vsel %vm5397_vm15, %v607_v46, %v549_v41  ;;  %vm4487_vm15 = vcmp.ne.s32.totalorder %v205_v11, 0  ;;  %v5447_v33 = vsel %vm4501_vm12, 4294967295, %v5446_v33 }
  0xad   :  { %3024 = vmatpush.msk.msra.mxu0 %vm5407_vm6, %v448_v47  ;;  %3784 = vmatpush.msk.msra.mxu1 %vm5407_vm6, %v448_v47  ;;  %v619_v51 = vsel %vm5396_vm9, %v613_v48, %v572_v42  ;;  %vm4478_vm9 = vcmp.ne.s32.totalorder %v212_v7, 0  ;;  %5448 = vst [vmem:[#allocation26_spill] sm:$0xff] %v5447_v33  ;;  %v301_v36 = vsel %vm4487_vm15, %v291_v22, 0.0  ;;  %v468_v45 = vsel %vm5409_vm4, %v3847_v32, %v3848_v31  ;;  %v4557_v7 = vld [vmem:[%s5381_s1 + $0x10] sm:$0xff] }
  0xae   :  { %v302_v61 = vsel %vm4478_vm9, %v292_v16, 0.0  ;;  %v3863_v46 = vunpack.i.h.bf16 %v4372_v14  ;;  %v584_v32 = vsel %vm5407_vm6, %v301_v36, %v467_v44  ;;  %v3867_v44 = vunpack.i.l.bf16 %v4417_v38 }
  0xaf   :  { %695 = vmatpush.msra.mxu0 %v619_v51  ;;  %3785 = vmatpush.msra.mxu1 %v619_v51 }
  0xb0   :  { %3993 = vrot.lane.b32.xlu1 %v4391_v23, %s4080_s21  ;;  %3025 = vmatmul.msk.f32.vlgmr.msra.gmra.mxu0 %vm5402_vm11, %v4438_v53 }
  0xb1   :  { %v4455_v2 = vpop.permute.xlu1 %3840  ;;  %v4457_v5 = vpop.permute.xlu2 %3880  ;;  %3028 = vmatmul.msk.f32.vlgmr.msra.gmra.mxu1 %vm5402_vm11, %v4446_v63  ;;  %1163 = vrot.lane.b32.xlu0 %v1046_v52, %s4083_s24  ;;  %v5439_v52 = vmov 0 }
  0xb2   :  { %v4465_v8 = vpop.permute.xlu0 %3835  ;;  %3998 = vrot.lane.b32.xlu2 %v4391_v23, %s4076_s11  ;;  %v5440_v52 = vsel %vm4478_vm9, 4294967295, %v5439_v52  ;;  %v3842_v25 = vunpack.i.l.bf16 %v4455_v2  ;;  %v3843_v27 = vunpack.i.h.bf16 %v4455_v2 }
  0xb3   :  { %v3837_v12 = vunpack.i.l.bf16 %v4465_v8  ;;  %v3838_v15 = vunpack.i.h.bf16 %v4465_v8  ;;  %5441 = vst [vmem:[#allocation25_spill] sm:$0xff] %v5440_v52 }
  0xb4   :  { %v355_v40 = vsel %vm5400_vm8, %v3808_v21, %v3842_v25 }
  0xb5   :  { %v327_v29 = vsel %vm5408_vm0, %v3803_v0, %v3837_v12  ;;  %v328_v34 = vsel %vm5408_vm0, %v3837_v12, %v3838_v15  ;;  %v365_v47 = vsel %vm4487_vm15, %v355_v40, 0.0  ;;  %v3862_v12 = vunpack.i.l.bf16 %v4372_v14 }
  0xb6   :  { %v337_v41 = vsel %vm4492_vm14, %v327_v29, 0.0  ;;  %v338_v43 = vsel %vm4501_vm12, %v328_v34, 0.0  ;;  %v585_v29 = vsel %vm5407_vm6, %v302_v61, %v468_v45  ;;  %v497_v34 = vrot.slane %v365_v47, 5 }
  0xb7   :  { %v482_v48 = vrot.slane %v337_v41, 6  ;;  %v483_v4 = vrot.slane %v338_v43, 6  ;;  %v521_v13 = vsel %vm5406_vm5, %v3862_v12, %v3863_v46 }
  0xb8   :  { %4003 = vrot.lane.b32.xlu1 %v4391_v23, %s4079_s12  ;;  %3026 = vmatmul.msk.f32.gmra.mxu0 %vm5402_vm11, %v4476_v18 }
  0xb9   :  { %v4514_v0 = vpop.permute.xlu1 %3855  ;;  %v4516_v35 = vpop.permute.xlu2 %3895  ;;  %1167 = vrot.lane.b32.xlu0 %v1048_v10, %s4083_s24  ;;  %v356_v10 = vsel %vm5400_vm8, %v3842_v25, %v3843_v27  ;;  %vm4563_vm8 = vcmp.ne.s32.totalorder %v226_v39, 15 }
  0xba   :  { %v4529_v42 = vpop.permute.xlu0 %3850  ;;  %1165 = vrot.lane.b32.xlu2 %v1047_v9, %s4083_s24  ;;  %v4548_v9 = vadd.s32 384, %v4324_v56  ;;  %v3857_v51 = vunpack.i.l.bf16 %v4514_v0  ;;  %v366_v60 = vsel %vm4478_vm9, %v356_v10, 0.0  ;;  %v3858_v11 = vunpack.i.h.bf16 %v4514_v0 }
  0xbb   :  { %v3853_v19 = vunpack.i.h.bf16 %v4529_v42  ;;  %v3852_v21 = vunpack.i.l.bf16 %v4529_v42 }
  0xbc   :  { %v219_v40 = vand.u32 15, %v4548_v9  ;;  %v411_v61 = vsel %vm5405_vm1, %v3823_v62, %v3857_v51  ;;  %v3868_v62 = vunpack.i.h.bf16 %v4417_v38 }
  0xbd   :  { %v383_v22 = vsel %vm5401_vm7, %v3818_v17, %v3852_v21  ;;  %v384_v25 = vsel %vm5401_vm7, %v3852_v21, %v3853_v19  ;;  %v498_v17 = vrot.slane %v366_v60, 5  ;;  %vm5451_vm7 = vcmask 1041408  }
  0xbe   :  { %v590_v10 = vsel %vm5451_vm7, %v584_v32, %v482_v48  ;;  %v393_v43 = vsel %vm4492_vm14, %v383_v22, 0.0  ;;  %v394_v21 = vsel %vm4501_vm12, %v384_v25, 0.0 }
  0xbf   :  { %v535_v25 = vrot.slane %v393_v43, 3  ;;  %v330_v43 = vsel %vm5408_vm0, %v3867_v44, %v3868_v62 }
  0xc0   :  { %4008 = vrot.lane.b32.xlu1 %v4391_v23, %s4082_s23  ;;  %3027 = vmatmul.msk.f32.gmra.mxu0 %vm5402_vm11, %v4557_v7  ;;  %v412_v23 = vsel %vm5405_vm1, %v3857_v51, %v3858_v11  ;;  %vm5452_vm11 = vmmov %vm5451_vm7  ;;  %v421_v51 = vsel %vm4487_vm15, %v411_v61, 0.0  ;;  %vm4617_vm7 = vcmp.ne.s32.totalorder %v219_v40, 15  ;;  %vm4638_vm1 = vcmp.ne.s32.totalorder %v219_v40, 0 }
  0xc1   :  { %v4586_v41 = vpop.permute.xlu1 %431  ;;  %v4588_v36 = vpop.permute.xlu2 %3900  ;;  %v591_v49 = vsel %vm5452_vm11, %v585_v29, %v483_v4  ;;  %v596_v4 = vsel %vm5404_vm10, %v590_v10, %v497_v34  ;;  %v422_v38 = vsel %vm4478_vm9, %v412_v23, 0.0  ;;  %v536_v29 = vrot.slane %v394_v21, 3 }
  0xc2   :  { %v430_v45 = vpop.permute.xlu0 %429  ;;  %vm4621_vm11 = vcmp.ne.s32.totalorder %v226_v39, 0  ;;  %v293_v34 = vperm.slane %v4334_v59, 3  ;;  %v294_v10 = vperm.slane %v4334_v59, 4  ;;  %v520_v23 = vsel %vm5406_vm5, %v3828_v20, %v3862_v12 }
  0xc3   :  { %v439_v47 = vsel %vm5403_vm13, %v4415_v37, %v430_v45  ;;  %v440_v48 = vsel %vm5403_vm13, %v430_v45, %v4586_v41  ;;  %v597_v37 = vsel %vm5404_vm10, %v591_v49, %v498_v17  ;;  %v329_v17 = vsel %vm5408_vm0, %v3838_v15, %v3867_v44 }
  0xc4   :  { %v449_v60 = vsel %vm4492_vm14, %v439_v47, 0.0  ;;  %v450_v22 = vsel %vm4501_vm12, %v440_v48, 0.0  ;;  %v3883_v21 = vunpack.i.h.bf16 %v4457_v5  ;;  %v550_v39 = vrot.slane %v421_v51, 2 }
  0xc5   :  { %3029 = vmatpush.msk.msrb.mxu1 %vm5407_vm6, %v449_v60  ;;  %3034 = vmatpush.msk.msra.mxu2 %vm5407_vm6, %v450_v22  ;;  %vm5457_vm13 = vcmask 1043456   ;;  %v551_v49 = vrot.slane %v422_v38, 2  ;;  %v3882_v59 = vunpack.i.l.bf16 %v4457_v5  ;;  %v5460_v50 = vsel %vm4638_vm1, 4294967295, %v5459_v50 }
  0xc6   :  { %v602_v45 = vsel %vm5457_vm13, %v596_v4, %v520_v23  ;;  %vm5458_vm10 = vmmov %vm5457_vm13  ;;  %vm5461_vm5 = vcmask 1044480   ;;  %v340_v62 = vsel %vm4563_vm8, %v330_v43, 0.0  ;;  %v304_v44 = vsel %vm4621_vm11, %v294_v10, 0.0 }
  0xc7   :  { %v603_v47 = vsel %vm5458_vm10, %v597_v37, %v521_v13  ;;  %v608_v12 = vsel %vm5461_vm5, %v602_v45, %v535_v25  ;;  %vm5462_vm6 = vmmov %vm5461_vm5  ;;  %v339_v40 = vsel %vm4617_vm7, %v329_v17, 0.0  ;;  %v470_v51 = vsel %vm5409_vm4, %v3882_v59, %v3883_v21 }
  0xc8   :  { %v609_v8 = vsel %vm5462_vm6, %v603_v47, %v536_v29  ;;  %vm5463_vm5 = vcmask 916480   ;;  %vm5465_vm10 = vcmask 1045504   ;;  %vm5467_vm0 = vcmask 777216  }
  0xc9   :  { %v3876_v20 = vpop.permute.xlu1 %3875  ;;  %v4644_v15 = vpop.permute.xlu2 %639  ;;  %vm5464_vm6 = vmmov %vm5463_vm5  ;;  %v614_v25 = vsel %vm5465_vm10, %v608_v12, %v550_v39  ;;  %v303_v43 = vsel %vm4638_vm1, %v293_v34, 0.0  ;;  %v484_v39 = vrot.slane %v339_v40, 6  ;;  %v3897_v34 = vunpack.i.l.bf16 %v4516_v35 }
  0xca   :  { %v3878_v13 = vunpack.i.h.bf16 %v3876_v20  ;;  %v3877_v48 = vunpack.i.l.bf16 %v3876_v20  ;;  %v4650_v5 = vpop.permute.xlu0 %3870  ;;  %vm5466_vm13 = vmmov %vm5465_vm10  ;;  %vm5471_vm10 = vcmask 1039360   ;;  %vm5481_vm9 = vcmask 1042432  }
  0xcb   :  { %v3873_v60 = vunpack.i.h.bf16 %v4650_v5  ;;  %v3872_v22 = vunpack.i.l.bf16 %v4650_v5  ;;  %v615_v29 = vsel %vm5466_vm13, %v609_v8, %v551_v49  ;;  %vm5468_vm4 = vmmov %vm5467_vm0  ;;  %v469_v45 = vsel %vm5471_vm10, %v3848_v31, %v3882_v59 }
  0xcc   :  { %v357_v4 = vsel %vm5463_vm5, %v3843_v27, %v3877_v48  ;;  %v358_v38 = vsel %vm5464_vm6, %v3877_v48, %v3878_v13  ;;  %v485_v27 = vrot.slane %v340_v62, 6  ;;  %vm5469_vm5 = vcmask 1046528  }
  0xcd   :  { %v367_v37 = vsel %vm4638_vm1, %v357_v4, 0.0  ;;  %v368_v10 = vsel %vm4621_vm11, %v358_v38, 0.0  ;;  %v573_v23 = vsel %vm5467_vm0, %v3833_v30, %v3872_v22  ;;  %v574_v2 = vsel %vm5468_vm4, %v3872_v22, %v3873_v60  ;;  %vm5470_vm6 = vmmov %vm5469_vm5 }
  0xce   :  { %v620_v17 = vsel %vm5469_vm5, %v614_v25, %v573_v23  ;;  %v621_v21 = vsel %vm5470_vm6, %v615_v29, %v574_v2  ;;  %vm5472_vm13 = vcmask 1040384   ;;  %v3898_v30 = vunpack.i.h.bf16 %v4516_v35 }
  0xcf   :  { %v587_v55 = vsel %vm5472_vm13, %v304_v44, %v470_v51  ;;  %724 = vmatpush.msrb.mxu1 %v620_v17  ;;  %753 = vmatpush.msra.mxu2 %v621_v21  ;;  %v499_v49 = vrot.slane %v367_v37, 5  ;;  %v500_v47 = vrot.slane %v368_v10, 5  ;;  %vm5473_vm0 = vcmask 72704   ;;  %vm5475_vm5 = vmmov %vm5472_vm13 }
  0xd0   :  { %3030 = vmatmul.msk.f32.vlgmr.msrb.gmra.mxu1 %vm5473_vm0, %v4438_v53  ;;  %vm5474_vm4 = vmmov %vm5473_vm0  ;;  %v586_v31 = vsel %vm5475_vm5, %v303_v43, %v469_v45  ;;  %vm5476_vm6 = vcmask 1041408   ;;  %vm5478_vm13 = vcmask 908288   ;;  %vm5479_vm0 = vcmask 785408  }
  0xd1   :  { %3035 = vmatmul.msk.f32.vlgmr.msra.gmra.mxu2 %vm5474_vm4, %v4438_v53  ;;  %v3891_v20 = vpop.permute.xlu1 %3890  ;;  %v4687_v58 = vpop.permute.xlu2 %3908  ;;  %v593_v59 = vsel %vm5476_vm6, %v587_v55, %v485_v27  ;;  %vm5477_vm10 = vmmov %vm5476_vm6  ;;  %v523_v13 = vsel %vm5478_vm13, %v3897_v34, %v3898_v30  ;;  %vm5483_vm6 = vcmask 900096   ;;  %v3903_v37 = vunpack.i.h.bf16 %v4588_v36 }
  0xd2   :  { %v3893_v12 = vunpack.i.h.bf16 %v3891_v20  ;;  %v3892_v8 = vunpack.i.l.bf16 %v3891_v20  ;;  %v3886_v62 = vpop.permute.xlu0 %3885  ;;  %v592_v44 = vsel %vm5477_vm10, %v586_v31, %v484_v39  ;;  %vm5480_vm4 = vmmov %vm5479_vm0 }
  0xd3   :  { %v3888_v48 = vunpack.i.h.bf16 %v3886_v62  ;;  %v3887_v40 = vunpack.i.l.bf16 %v3886_v62  ;;  %v598_v22 = vsel %vm5481_vm9, %v592_v44, %v499_v49  ;;  %vm5482_vm5 = vmmov %vm5481_vm9  ;;  %vm5485_vm9 = vcmask 72704  }
  0xd4   :  { %v413_v35 = vsel %vm5479_vm0, %v3858_v11, %v3892_v8  ;;  %v414_v51 = vsel %vm5480_vm4, %v3892_v8, %v3893_v12  ;;  %v599_v4 = vsel %vm5482_vm5, %v593_v59, %v500_v47  ;;  %vm5484_vm10 = vmmov %vm5483_vm6  ;;  %v522_v11 = vsel %vm5478_vm13, %v3863_v46, %v3897_v34  ;;  %v3071_v59 = vld [vmem:[%s5382_s2 + $0x30] sm:$0xff]  ;;  %v3070_v12 = vld [vmem:[%s5382_s2 + $0x28] sm:$0xff] }
  0xd5   :  { %v423_v38 = vsel %vm4638_vm1, %v413_v35, 0.0  ;;  %v424_v25 = vsel %vm4621_vm11, %v414_v51, 0.0  ;;  %v385_v29 = vsel %vm5483_vm6, %v3853_v19, %v3887_v40  ;;  %v386_v0 = vsel %vm5484_vm10, %v3887_v40, %v3888_v48  ;;  %vm5486_vm0 = vmmov %vm5485_vm9  ;;  %1367 = vperm.xlu0 %3904, %v3071_v59   ;;  %1362 = vperm.xlu1 %3905, %v3070_v12  }
  0xd6   :  { %v395_v10 = vsel %vm4617_vm7, %v385_v29, 0.0  ;;  %v396_v23 = vsel %vm4563_vm8, %v386_v0, 0.0  ;;  %v552_v43 = vrot.slane %v423_v38, 2  ;;  %v553_v42 = vrot.slane %v424_v25, 2  ;;  %v4783_v38 = vld [vmem:[%s5380_s0 + $0x6] sm:$0x1f] }
  0xd7   :  { %v537_v2 = vrot.slane %v395_v10, 3  ;;  %v538_v27 = vrot.slane %v396_v23, 3  ;;  %v3902_v19 = vunpack.i.l.bf16 %v4588_v36  ;;  %vm5487_vm4 = vcmask 1043456   ;;  %v3072_v29 = vld [vmem:[%s5382_s2 + $0x38] sm:$0xff] }
  0xd8   :  { %3031 = vmatmul.msk.f32.gmra.mxu1 %vm5485_vm9, %v4476_v18  ;;  %v604_v14 = vsel %vm5487_vm4, %v598_v22, %v522_v11  ;;  %vm5488_vm5 = vmmov %vm5487_vm4  ;;  %vm5489_vm6 = vcmask 1044480   ;;  %vm5491_vm13 = vcmask 777216   ;;  %vm5492_vm1 = vcmask 769024   ;;  %1372 = vperm.xlu2 %3906, %v3072_v29  }
  0xd9   :  { %3036 = vmatmul.msk.f32.gmra.mxu2 %vm5486_vm0, %v4476_v18  ;;  %v605_v46 = vsel %vm5488_vm5, %v599_v4, %v523_v13  ;;  %v436_v17 = vpop.permute.xlu1 %435  ;;  %v610_v21 = vsel %vm5489_vm6, %v604_v14, %v537_v2  ;;  %vm5490_vm10 = vmmov %vm5489_vm6  ;;  %v576_v55 = vsel %vm5491_vm13, %v3902_v19, %v3903_v37  ;;  %v4725_v30 = vpop.permute.xlu2 %3923  ;;  %vm5494_vm0 = vcmask 1045504  }
  0xda   :  { %v611_v39 = vsel %vm5490_vm10, %v605_v46, %v538_v27  ;;  %v434_v45 = vpop.permute.xlu0 %433  ;;  %vm5493_vm9 = vmmov %vm5492_vm1  ;;  %v616_v47 = vsel %vm5494_vm0, %v610_v21, %v552_v43  ;;  %vm5499_vm10 = vcmask 1046528   ;;  %v3910_v13 = vunpack.i.l.bf16 %v4687_v58 }
  0xdb   :  { %v442_v36 = vsel %vm5492_vm1, %v434_v45, %v436_v17  ;;  %v441_v49 = vsel %vm5493_vm9, %v4586_v41, %v434_v45  ;;  %vm5495_vm4 = vmmov %vm5494_vm0  ;;  %vm5496_vm1 = vcmask 1040384   ;;  %vm5501_vm9 = vcmask 72704  }
  0xdc   :  { %v617_v34 = vsel %vm5495_vm4, %v611_v39, %v553_v42  ;;  %v451_v20 = vsel %vm4617_vm7, %v441_v49, 0.0  ;;  %v452_v31 = vsel %vm4563_vm8, %v442_v36, 0.0  ;;  %vm5497_vm5 = vmmov %vm5496_vm1  ;;  %v3911_v48 = vunpack.i.h.bf16 %v4687_v58 }
  0xdd   :  { %3039 = vmatpush.msk.msra.mxu3 %vm5496_vm1, %v451_v20  ;;  %3044 = vmatpush.msk.msrb.mxu0 %vm5497_vm5, %v452_v31  ;;  %vm5498_vm6 = vmmov %vm5491_vm13  ;;  %v5418_v27 = vunpack.i.h.bf16 %v4725_v30 }
  0xde   :  { %v575_v41 = vsel %vm5498_vm6, %v3873_v60, %v3902_v19  ;;  %vm5500_vm13 = vmmov %vm5499_vm10 }
  0xdf   :  { %v622_v8 = vsel %vm5499_vm10, %v616_v47, %v575_v41  ;;  %v623_v62 = vsel %vm5500_vm13, %v617_v34, %v576_v55  ;;  %vm5502_vm0 = vmmov %vm5501_vm9 }
  0xe0   :  { %782 = vmatpush.msra.mxu3 %v622_v8  ;;  %811 = vmatpush.msrb.mxu0 %v623_v62  ;;  %vm5503_vm4 = vmmov %vm5502_vm0 }
  0xe1   :  { %3032 = vmatmul.msk.f32.gmra.mxu1 %vm5501_vm9, %v4557_v7  ;;  %3037 = vmatmul.msk.f32.gmra.mxu2 %vm5502_vm0, %v4557_v7  ;;  %vm5504_vm1 = vmmov %vm5502_vm0  ;;  %v4757_v5 = vpop.permute.xlu1 %644  ;;  %v1158_v44 = vpop.permute.xlu2 %1157  ;;  %vm5509_vm9 = vcmask 1031168  }
  0xe2   :  { %3040 = vmatmul.msk.f32.vlgmr.msra.gmra.mxu3 %vm5503_vm4, %v4438_v53  ;;  %3045 = vmatmul.msk.f32.vlgmr.msrb.gmra.mxu0 %vm5504_vm1, %v4438_v53  ;;  %v4759_v60 = vpop.permute.xlu0 %649  ;;  %vm5505_vm5 = vmmov %vm5502_vm0  ;;  %v1061_v4 = vsel %vm5509_vm9, %v3910_v13, %v3911_v48  ;;  %v1027_v13 = vperm.slane %v4783_v38, 1 }
  0xe3   :  { %vm5506_vm6 = vmmov %vm5502_vm0  ;;  %v1071_v0 = vsel %vm4352_vm3, %v1061_v4, 0.0 }
  0xe4   :  { %vm5507_vm10 = vmmov %vm5502_vm0  ;;  %v1211_v10 = vrot.slane %v1071_v0, 6 }
  0xe5   :  { %vm5508_vm13 = vmmov %vm5502_vm0 }
  0xe6   :  { %vm5510_vm0 = vmmov %vm5509_vm9  ;;  %vm5516_vm9 = vcmask 900096  }
  0xe7   :  { %vm5511_vm4 = vmmov %vm5510_vm0 }
  0xe9   :  { %3033 = vmatmul.msk.f32.gmra.mxu1 %vm5505_vm5, %v4446_v63  ;;  %3038 = vmatmul.msk.f32.gmra.mxu2 %vm5506_vm6, %v4446_v63  ;;  %v4770_v53 = vpop.permute.xlu1 %634  ;;  %v4775_v35 = vpop.permute.xlu2 %3943  ;;  %vm5512_vm5 = vmmov %vm5504_vm1  ;;  %vm5513_vm6 = vcmask 1039360  }
  0xea   :  { %3041 = vmatmul.msk.f32.gmra.mxu3 %vm5507_vm10, %v4476_v18  ;;  %3046 = vmatmul.msk.f32.gmra.mxu0 %vm5508_vm13, %v4476_v18  ;;  %v4773_v40 = vpop.permute.xlu0 %3913  ;;  %v3946_v51 = vunpack.i.h.bf16 %v4775_v35  ;;  %v3945_v22 = vunpack.i.l.bf16 %v4775_v35  ;;  %v1026_v18 = vperm.slane %v4783_v38, 0  ;;  %vm5514_vm10 = vcmask 1040384  }
  0xeb   :  { %vm5515_vm13 = vcmask 1041408   ;;  %v5417_v20 = vunpack.i.h.bf16 %v4773_v40 }
  0xec   :  { %v1062_v25 = vsel %vm5510_vm0, %v3911_v48, %v3945_v22  ;;  %v1063_v58 = vsel %vm5511_vm4, %v3945_v22, %v3946_v51  ;;  %v1036_v37 = vsel %vm4346_vm2, %v1026_v18, 0.0  ;;  %vm5517_vm0 = vmmov %vm5516_vm9 }
  0xed   :  { %vm5519_vm4 = vmmov %vm5504_vm1  ;;  %v1072_v18 = vsel %vm4492_vm14, %v1062_v25, 0.0  ;;  %v1073_v29 = vsel %vm4501_vm12, %v1063_v58, 0.0 }
  0xf1   :  { %v3919_v11 = vpop.permute.xlu1 %3918  ;;  %v4804_v42 = vpop.permute.xlu2 %3958 }
  0xf2   :  { %3042 = vmatmul.msk.f32.gmra.mxu3 %vm5504_vm1, %v4557_v7  ;;  %3047 = vmatmul.msk.f32.gmra.mxu0 %vm5512_vm5, %v4557_v7  ;;  %v3921_v23 = vunpack.i.h.bf16 %v3919_v11  ;;  %v3920_v2 = vunpack.i.l.bf16 %v3919_v11  ;;  %v4802_v43 = vpop.permute.xlu0 %3928  ;;  %v5421_v14 = vunpack.i.h.bf16 %v4804_v42  ;;  %v3960_v46 = vunpack.i.l.bf16 %v4804_v42  ;;  %v3069_v7 = vld [vmem:[%s5382_s2 + $0x20] sm:$0xff] }
  0xf3   :  { %1357 = vperm.xlu2 %3906, %v3069_v7   ;;  %vm5520_vm5 = vcmask 769024   ;;  %v5416_v0 = vunpack.i.h.bf16 %v4802_v43 }
  0xf4   :  { %v1196_v19 = vsel %vm5513_vm6, %v3920_v2, %v3921_v23  ;;  %v4819_v39 = vsel %vm5516_vm9, %v5418_v27, %v3960_v46  ;;  %v4824_v45 = vsel %vm5517_vm0, %v3960_v46, %v5421_v14  ;;  %vm5521_vm6 = vmmov %vm5520_vm5  ;;  %vm5526_vm0 = vnez %v5440_v52 }
  0xf5   :  { %v1310_v17 = vsel %vm5514_vm10, %v1036_v37, %v1196_v19  ;;  %5518 = vst [vmem:[#allocation27_spill] sm:$0xff] %v4824_v45  ;;  %vm5522_vm10 = vcmask 916480   ;;  %v1037_v37 = vsel %vm4487_vm15, %v1027_v13, 0.0  ;;  %v1212_v2 = vrot.slane %v1072_v18, 6 }
  0xf6   :  { %v4814_v21 = vsel %vm5515_vm13, %v1310_v17, %v1211_v10  ;;  %vm5523_vm13 = vmmov %vm5522_vm10  ;;  %v1213_v19 = vrot.slane %v1073_v29, 6 }
  0xf7   :  { %vm5525_vm9 = vmmov %vm5522_vm10 }
  0xf9   :  { %v4830_v55 = vpop.permute.xlu1 %3933  ;;  %v4835_v47 = vpop.permute.xlu2 %1161 }
  0xfa   :  { %3043 = vmatmul.msk.f32.gmra.mxu3 %vm5519_vm4, %v4446_v63  ;;  %3048 = vmatmul.msk.f32.gmra.mxu0 %vm5504_vm1, %v4446_v63  ;;  %v1160_v36 = vpop.permute.xlu0 %1159  ;;  %vm5527_vm4 = vcmask 1039360  }
  0xfb   :  { %v4833_v49 = vsel %vm5520_vm5, %v1158_v44, %v1160_v36  ;;  %v4839_v34 = vsel %vm5521_vm6, %v1160_v36, %v4835_v47  ;;  %v1028_v44 = vperm.slane %v4783_v38, 2  ;;  %vm5528_vm1 = vmmov %vm5527_vm4  ;;  %vm5529_vm5 = vcmask 1040384  }
  0xfc   :  { %vm5530_vm6 = vmmov %vm5529_vm5 }
  0xfd   :  { %v1038_v10 = vsel %vm5526_vm0, %v1028_v44, 0.0 }
 0x101   :  { %v4842_v31 = vpop.permute.xlu1 %3938  ;;  %v3984_v63 = vpop.permute.xlu2 %3983 }
 0x102   :  { %v3949_v59 = vpop.permute.xlu0 %3948  ;;  %v3986_v8 = vunpack.i.h.bf16 %v3984_v63  ;;  %v3985_v62 = vunpack.i.l.bf16 %v3984_v63  ;;  %v3940_v26 = vunpack.i.l.bf16 %v4842_v31 }
 0x103   :  { %v3951_v12 = vunpack.i.h.bf16 %v3949_v59  ;;  %v3950_v41 = vunpack.i.l.bf16 %v3949_v59 }
 0x104   :  { %v4855_v4 = vsel %vm5525_vm9, %v3985_v62, %v3986_v8  ;;  %vm5534_vm9 = vcmask 1041408  }
 0x105   :  { %v4849_v48 = vsel %vm5522_vm10, %v5417_v20, %v3950_v41  ;;  %v4852_v22 = vsel %vm5523_vm13, %v3950_v41, %v3951_v12  ;;  %vm5531_vm10 = vcmask 785408   ;;  %vm5535_vm12 = vmmov %vm5534_vm9  ;;  %v1102_v6 = vsel %vm4621_vm11, %v4855_v4, 0.0 }
 0x106   :  { %5524 = vst [vmem:[#allocation28_spill] sm:$0xff] %v4852_v22  ;;  %vm5532_vm13 = vmmov %vm5531_vm10 }
 0x109   :  { %v3954_v11 = vpop.permute.xlu1 %3953 }
 0x10a   :  { %v3956_v46 = vunpack.i.h.bf16 %v3954_v11  ;;  %v3955_v7 = vunpack.i.l.bf16 %v3954_v11  ;;  %v3964_v17 = vpop.permute.xlu0 %3963 }
 0x10b   :  { %v3966_v36 = vunpack.i.h.bf16 %v3964_v17  ;;  %v3965_v59 = vunpack.i.l.bf16 %v3964_v17 }
 0x10c   :  { %v1197_v25 = vsel %vm5527_vm4, %v3921_v23, %v3955_v7  ;;  %v1198_v58 = vsel %vm5528_vm1, %v3955_v7, %v3956_v46  ;;  %v3999_v23 = vpop.permute.xlu2 %3998  ;;  %vm5537_vm4 = vmmov %vm5531_vm10  ;;  %vm5538_vm1 = vcmask 908288  }
 0x10d   :  { %v1311_v41 = vsel %vm5529_vm5, %v1037_v37, %v1197_v25  ;;  %v1312_v63 = vsel %vm5530_vm6, %v1038_v10, %v1198_v58  ;;  %v4873_v8 = vsel %vm5531_vm10, %v5416_v0, %v3965_v59  ;;  %v4876_v13 = vsel %vm5532_vm13, %v3965_v59, %v3966_v36 }
 0x10e   :  { %5533 = vst [vmem:[#allocation29_spill] sm:$0xff] %v4876_v13  ;;  %v4879_v44 = vsel %vm5534_vm9, %v1311_v41, %v1212_v2  ;;  %v4882_v18 = vsel %vm5535_vm12, %v1312_v63, %v1213_v19  ;;  %v4001_v29 = vunpack.i.h.bf16 %v3999_v23  ;;  %v4000_v11 = vunpack.i.l.bf16 %v3999_v23  ;;  %vm5539_vm12 = vmmov %vm5538_vm1 }
 0x10f   :  { %5536 = vst [vmem:[#allocation30_spill] sm:$0xff] %v4882_v18  ;;  %v5419_v37 = vunpack.i.h.bf16 %v4830_v55  ;;  %v1030_v59 = vperm.slane %v4783_v38, 4  ;;  %vm5541_vm5 = vcmask 1031168   ;;  %vm5542_vm6 = vcmask 1039360  }
 0x110   :  { %v4886_v7 = vsel %vm5537_vm4, %v4000_v11, %v4001_v29  ;;  %vm5543_vm10 = vmmov %vm5541_vm5  ;;  %vm5544_vm13 = vcmask 1040384   ;;  %vm5545_vm4 = vcmask 916480  }
 0x111   :  { %v3969_v10 = vpop.permute.xlu1 %3968  ;;  %v1156_v4 = vsel %vm4621_vm11, %v4886_v7, 0.0 }
 0x112   :  { %v3971_v17 = vunpack.i.h.bf16 %v3969_v10  ;;  %v3970_v25 = vunpack.i.l.bf16 %v3969_v10  ;;  %v4888_v58 = vpop.permute.xlu0 %3973  ;;  %v1040_v10 = vsel %vm4621_vm11, %v1030_v59, 0.0 }
 0x114   :  { %v4893_v2 = vsel %vm5538_vm1, %v5419_v37, %v3970_v25  ;;  %v4896_v19 = vsel %vm5539_vm12, %v3970_v25, %v3971_v17  ;;  %vm5546_vm1 = vnez %v5460_v50  ;;  %vm5547_vm12 = vmmov %vm5542_vm6 }
 0x115   :  { %5540 = vst [vmem:[#allocation31_spill] sm:$0xff] %v4896_v19 }
 0x119   :  { %v3979_v41 = vpop.permute.xlu1 %3978 }
 0x11a   :  { %v3981_v63 = vunpack.i.h.bf16 %v3979_v41  ;;  %v3980_v23 = vunpack.i.l.bf16 %v3979_v41  ;;  %v3989_v0 = vpop.permute.xlu0 %3988  ;;  %v1029_v41 = vperm.slane %v4783_v38, 3 }
 0x11b   :  { %v3991_v29 = vunpack.i.h.bf16 %v3989_v0  ;;  %v3990_v20 = vunpack.i.l.bf16 %v3989_v0 }
 0x11c   :  { %v1065_v27 = vsel %vm5541_vm5, %v3980_v23, %v3981_v63  ;;  %v1064_v25 = vsel %vm5543_vm10, %v3946_v51, %v3980_v23  ;;  %v1091_v63 = vsel %vm5545_vm4, %v3951_v12, %v3985_v62  ;;  %v1039_v35 = vsel %vm5546_vm1, %v1029_v41, 0.0  ;;  %vm5554_vm4 = vmmov %vm5544_vm13 }
 0x11d   :  { %v1075_v37 = vsel %vm4563_vm8, %v1065_v27, 0.0  ;;  %v1200_v54 = vsel %vm5542_vm6, %v3990_v20, %v3991_v29  ;;  %v1074_v59 = vsel %vm4617_vm7, %v1064_v25, 0.0  ;;  %v4916_v27 = vpop.permute.xlu2 %1165  ;;  %v1199_v51 = vsel %vm5547_vm12, %v3956_v46, %v3990_v20 }
 0x11e   :  { %v1215_v14 = vrot.slane %v1075_v37, 6  ;;  %v1314_v19 = vsel %vm5544_vm13, %v1040_v10, %v1200_v54  ;;  %v1214_v54 = vrot.slane %v1074_v59, 6  ;;  %vm5548_vm5 = vcmask 769024  }
 0x11f   :  { %vm5550_vm6 = vmmov %vm5548_vm5  ;;  %vm5551_vm10 = vcmask 900096   ;;  %v1313_v10 = vsel %vm5544_vm13, %v1039_v35, %v1199_v51  ;;  %v5552_v46 = vunpack.i.h.bf16 %v4804_v42  ;;  %vm5555_vm12 = vcmask 1041408  }
 0x120   :  { %v4911_v0 = vsel %vm5534_vm9, %v1314_v19, %v1215_v14  ;;  %v1101_v14 = vsel %vm5546_vm1, %v1091_v63, 0.0  ;;  %vm5553_vm9 = vmmov %vm5551_vm10 }
 0x121   :  { %v1229_v41 = vrot.slane %v1101_v14, 5 }
 0x122   :  { %v3994_v29 = vpop.permute.xlu1 %3993 }
 0x123   :  { %v3996_v37 = vunpack.i.h.bf16 %v3994_v29  ;;  %v3995_v38 = vunpack.i.l.bf16 %v3994_v29  ;;  %v1164_v23 = vpop.permute.xlu0 %1163 }
 0x124   :  { %v4925_v19 = vsel %vm5548_vm5, %v4835_v47, %v1164_v23  ;;  %v1172_v12 = vsel %vm5550_vm6, %v1164_v23, %v4916_v27  ;;  %v1318_v47 = vsel %vm5555_vm12, %v1313_v10, %v1214_v54  ;;  %vm5556_vm5 = vcmask 785408  }
 0x125   :  { %5549 = vst [vmem:[#allocation32_spill] sm:$0xff] %v4925_v19  ;;  %v4930_v62 = vsel %vm5551_vm10, %v3995_v38, %v3996_v37  ;;  %v1182_v20 = vsel %vm4617_vm7, %v1172_v12, 0.0  ;;  %v1118_v25 = vsel %vm5553_vm9, %v5552_v46, %v3995_v38  ;;  %v1145_v63 = vsel %vm5556_vm5, %v3966_v36, %v4000_v11 }
 0x126   :  { %3088 = vmatpush.msk.msra.mxu0 %vm5554_vm4, %v1182_v20  ;;  %v1128_v59 = vsel %vm4617_vm7, %v1118_v25, 0.0  ;;  %vm5557_vm6 = vcmask 1042432   ;;  %v1155_v42 = vsel %vm5546_vm1, %v1145_v63, 0.0  ;;  %vm5558_vm10 = vcmask 908288   ;;  %v4966_v63 = vld [vmem:[%s5381_s1 + $0x20] sm:$0xff] }
 0x127   :  { %v1323_v51 = vsel %vm5557_vm6, %v1318_v47, %v1229_v41  ;;  %v1266_v23 = vrot.slane %v1128_v59, 3  ;;  %vm5559_vm13 = vmmov %vm5558_vm10  ;;  %vm5560_vm9 = vcmask 1043456   ;;  %v1281_v10 = vrot.slane %v1155_v42, 2 }
 0x128   :  { %vm5561_vm7 = vcmask 1044480   ;;  %v5422_v20 = vunpack.i.h.bf16 %v4888_v58  ;;  %vm5562_vm1 = vcmask 1045504   ;;  %vm5563_vm12 = vcmask 777216  }
 0x129   :  { %vm5564_vm5 = vcmask 1046528   ;;  %vm5565_vm6 = vcmask 72704  }
 0x12a   :  { %v4004_v29 = vpop.permute.xlu1 %4003 }
 0x12b   :  { %v4006_v37 = vunpack.i.h.bf16 %v4004_v29  ;;  %v4005_v35 = vunpack.i.l.bf16 %v4004_v29  ;;  %v1168_v28 = vpop.permute.xlu0 %1167 }
 0x12d   :  { %v1251_v38 = vsel %vm5558_vm10, %v3971_v17, %v4005_v35  ;;  %v4948_v14 = vsel %vm5559_vm13, %v4005_v35, %v4006_v37  ;;  %v697_v54 = vpop.f32.mrf.mxu0  ;;  %vm5566_vm10 = vmmov %vm5565_vm6 }
 0x12e   :  { %v1328_v32 = vsel %vm5560_vm9, %v1323_v51, %v1251_v38  ;;  %v706_v12 = vpop.f32.mrf.mxu1  ;;  %v4975_v51 = vld [vmem:[%s5381_s1 + $0x28] sm:$0xff]  ;;  %v698_v42 = vadd.f32 %v697_v54, %v4770_v53 }
 0x12f   :  { %v707_v36 = vadd.f32 %v706_v12, %v4759_v60  ;;  %v1333_v11 = vsel %vm5561_vm7, %v1328_v32, %v1266_v23 }
 0x130   :  { %v1338_v25 = vsel %vm5562_vm1, %v1333_v11, %v1281_v10  ;;  %v845_v10 = vmul.f32 0.01, %v698_v42  ;;  %v4984_v11 = vld [vmem:[%s5381_s1 + $0x30] sm:$0xff]  ;;  %vm825_vm7 = vcmp.gt.f32.partialorder %v698_v42, 0.0 }
 0x131   :  { %vm840_vm4 = vcmp.gt.f32.partialorder %v707_v36, 0.0  ;;  %v860_v46 = vmul.f32 0.01, %v707_v36  ;;  %5567 = vst [vmem:[#allocation33_spill] sm:$0xff] %v4984_v11 }
 0x132   :  { %v4954_v50 = vpop.permute.xlu1 %4008  ;;  %v865_v54 = vsel %vm825_vm7, %v698_v42, %v845_v10  ;;  %v5571_v42 = vlaneseq }
 0x133   :  { %v5423_v17 = vunpack.i.l.bf16 %v4954_v50  ;;  %v880_v41 = vsel %vm840_vm4, %v707_v36, %v860_v46  ;;  %vm5568_vm4 = vmmov %vm5565_vm6  ;;  %v5615_v16 = vunpack.i.l.bf16 %v4954_v50 }
 0x134   :  { %897 = vmatpush.xpose.msra.mxu1 %v880_v41  ;;  %vm5570_vm1 = vmmov %vm5568_vm4 }
 0x135   :  { %v700_v47 = vpop.f32.mrf.mxu0  ;;  %v1303_v59 = vsel %vm5563_vm12, %v5422_v20, %v5423_v17  ;;  %vm5573_vm12 = vcmask 900096   ;;  %v3930_v17 = vunpack.i.l.bf16 %v4802_v43 }
 0x136   :  { %v1343_v29 = vsel %vm5564_vm5, %v1338_v25, %v1303_v59  ;;  %v701_v37 = vadd.f32 %v700_v47, %v4644_v15  ;;  %v4991_v25 = vld [vmem:[%s5381_s1 + $0x38] sm:$0xff]  ;;  %vm5575_vm5 = vcmask 916480  }
 0x137   :  { %1504 = vmatpush.msra.mxu0 %v1343_v29  ;;  %5569 = vst [vmem:[#allocation34_spill] sm:$0xff] %v4991_v25 }
 0x138   :  { %3089 = vmatmul.msk.f32.vlgmr.msra.gmra.mxu0 %vm5565_vm6, %v4966_v63  ;;  %v850_v38 = vmul.f32 0.01, %v701_v37  ;;  %vm830_vm9 = vcmp.gt.f32.partialorder %v701_v37, 0.0  ;;  %vm5577_vm6 = vcmask 785408  }
 0x13a   :  { %v870_v36 = vsel %vm830_vm9, %v701_v37, %v850_v38  ;;  %v265_v38 = vshrl.u32 %v5571_v42, 7 }
 0x13d   :  { %v703_v35 = vpop.f32.mrf.mxu0 }
 0x13e   :  { %v704_v23 = vadd.f32 %v703_v35, %v4757_v5  ;;  %v3925_v35 = vunpack.i.l.bf16 %v4725_v30 }
 0x140   :  { %v855_v32 = vmul.f32 0.01, %v704_v23  ;;  %3090 = vmatmul.msk.f32.gmra.mxu0 %vm5566_vm10, %v4975_v51  ;;  %vm835_vm13 = vcmp.gt.f32.partialorder %v704_v23, 0.0 }
 0x142   :  { %v875_v12 = vsel %vm835_vm13, %v704_v23, %v855_v32  ;;  %v3915_v23 = vunpack.i.l.bf16 %v4773_v40  ;;  %v5572_v32 = vunpack.i.h.bf16 %v4725_v30 }
 0x143   :  { %898 = vmatpush.xpose.msra.mxu1 %v875_v12 }
 0x144   :  { %v1115_v12 = vsel %vm5573_vm12, %v3925_v35, %v5572_v32 }
 0x145   :  { %v1125_v13 = vsel %vm4352_vm3, %v1115_v12, 0.0 }
 0x147   :  { %899 = vmatpush.xpose.msra.mxu1 %v870_v36  ;;  %v5005_v36 = vmul.u32 384, %v265_v38 }
 0x148   :  { %3091 = vmatmul.msk.f32.gmra.mxu0 %vm5568_vm4, %v4984_v11 }
 0x149   :  { %vm267_vm13 = vcmp.ge.s32.totalorder %v4324_v56, %v5005_v36 }
 0x14b   :  { %900 = vmatpush.xpose.msra.mxu1 %v865_v54  ;;  %v5574_v54 = vunpack.i.h.bf16 %v4773_v40  ;;  %v5022_v40 = vadd.s32 256, %v5005_v36 }
 0x14d   :  { %v726_v46 = vpop.f32.mrf.mxu1  ;;  %v1088_v20 = vsel %vm5575_vm5, %v3915_v23, %v5574_v54  ;;  %v5576_v23 = vunpack.i.h.bf16 %v4802_v43  ;;  %vm273_vm9 = vcmp.lt.s32.totalorder %v4324_v56, %v5022_v40  ;;  %v5428_v56 = vmov 0.00390625  }
 0x14e   :  { %v1098_v38 = vsel %vm4346_vm2, %v1088_v20, 0.0  ;;  %vm5035_vm7 = vmand %vm267_vm13, %vm273_vm9  ;;  %v727_v45 = vadd.f32 %v726_v46, %v4770_v53  ;;  %vm5591_vm13 = vcmask 1045504  }
 0x14f   :  { %v1142_v32 = vsel %vm5577_vm6, %v3930_v17, %v5576_v23  ;;  %v1226_v20 = vrot.slane %v1098_v38, 5  ;;  %v5578_v17 = vmov 0  ;;  %v3935_v23 = vunpack.i.l.bf16 %v4830_v55  ;;  %3049 = vmatmul.msk.f32.vlgmr.msra.gmra.mxu1 %vm5035_vm7, %v5428_v56 }
 0x150   :  { %3092 = vmatmul.msk.f32.gmra.mxu0 %vm5570_vm1, %v4991_v25  ;;  %v5579_v17 = vsel %vm5035_vm7, 4294967295, %v5578_v17  ;;  %vm5582_vm1 = vcmask 908288   ;;  %vm5584_vm6 = vcmask 777216   ;;  %vm5593_vm9 = vcmp.gt.f32.partialorder %v727_v45, 0.0 }
 0x151   :  { %5580 = vst [vmem:[#allocation35_spill] sm:$0xff] %v5579_v17 }
 0x154   :  { %v4995_v41 = vpop.f32.mrf.mxu2 }
 0x155   :  { %v729_v47 = vpop.f32.mrf.mxu1 }
 0x156   :  { %v730_v12 = vadd.f32 %v729_v47, %v4644_v15 }
 0x158   :  { %v851_v25 = vmul.f32 0.01, %v730_v12  ;;  %vm831_vm12 = vcmp.gt.f32.partialorder %v730_v12, 0.0 }
 0x15c   :  { %v758_v59 = vpop.f32.mrf.mxu2 }
 0x15d   :  { %v759_v56 = vadd.f32 %v758_v59, %v4644_v15  ;;  %v846_v59 = vmul.f32 0.01, %v727_v45 }
 0x15e   :  { %v732_v29 = vpop.f32.mrf.mxu1 }
 0x15f   :  { %v4997_v37 = vpop.f32.mrf.mxu0  ;;  %v733_v42 = vadd.f32 %v732_v29, %v4757_v5  ;;  %v1263_v29 = vrot.slane %v1125_v13, 3  ;;  %v1152_v13 = vsel %vm4346_vm2, %v1142_v32, 0.0 }
 0x160   :  { %v1278_v22 = vrot.slane %v1152_v13, 2  ;;  %v852_v13 = vmul.f32 0.01, %v759_v56 }
 0x161   :  { %v856_v43 = vmul.f32 0.01, %v733_v42  ;;  %vm836_vm4 = vcmp.gt.f32.partialorder %v733_v42, 0.0 }
 0x163   :  { %v876_v52 = vsel %vm836_vm4, %v733_v42, %v856_v43  ;;  %v5583_v42 = vunpack.i.l.bf16 %v4888_v58  ;;  %vm5586_vm4 = vcmask 1043456  }
 0x164   :  { %v761_v10 = vpop.f32.mrf.mxu2 }
 0x165   :  { %v5011_v19 = vpop.f32.mrf.mxu3 }
 0x166   :  { %v735_v18 = vpop.f32.mrf.mxu1 }
 0x167   :  { %v736_v30 = vadd.f32 %v735_v18, %v4759_v60  ;;  %v5017_v35 = vpop.f32.mrf.mxu0  ;;  %v1099_v18 = vsel %vm4487_vm15, %v4849_v48, 0.0  ;;  %v1126_v48 = vsel %vm4492_vm14, %v4819_v39, 0.0  ;;  %v1153_v39 = vsel %vm4487_vm15, %v4873_v8, 0.0 }
 0x168   :  { %v1227_v38 = vrot.slane %v1099_v18, 5  ;;  %v1264_v11 = vrot.slane %v1126_v48, 3  ;;  %v1279_v8 = vrot.slane %v1153_v39, 2 }
 0x169   :  { %vm841_vm10 = vcmp.gt.f32.partialorder %v736_v30, 0.0  ;;  %v861_v54 = vmul.f32 0.01, %v736_v30 }
 0x16b   :  { %v881_v33 = vsel %vm841_vm10, %v736_v30, %v861_v54  ;;  %v3941_v30 = vunpack.i.h.bf16 %v4842_v31  ;;  %v762_v54 = vadd.f32 %v761_v10, %v4757_v5  ;;  %v5581_v10 = vunpack.i.h.bf16 %v4830_v55 }
 0x16c   :  { %v764_v47 = vpop.f32.mrf.mxu2  ;;  %917 = vmatpush.xpose.msrb.mxu2 %v881_v33  ;;  %v756_v55 = vadd.f32 %v4995_v41, %v4770_v53  ;;  %vm5585_vm10 = vcmask 1042432  }
 0x16d   :  { %v765_v3 = vadd.f32 %v764_v47, %v4759_v60  ;;  %v5051_v32 = vpop.f32.mrf.mxu3  ;;  %v1248_v47 = vsel %vm5582_vm1, %v3935_v23, %v5581_v10  ;;  %v857_v46 = vmul.f32 0.01, %v762_v54  ;;  %vm837_vm15 = vcmp.gt.f32.partialorder %v762_v54, 0.0 }
 0x16e   :  { %v1301_v43 = vsel %vm5584_vm6, %v3941_v30, %v5583_v42  ;;  %v871_v23 = vsel %vm831_vm12, %v730_v12, %v851_v25  ;;  %vm5588_vm1 = vcmask 1044480   ;;  %vm5589_vm12 = vmmov %vm5584_vm6 }
 0x16f   :  { %v819_v17 = vpop.f32.mrf.mxu0  ;;  %vm842_vm2 = vcmp.gt.f32.partialorder %v765_v3, 0.0  ;;  %v862_v18 = vmul.f32 0.01, %v765_v3  ;;  %v877_v41 = vsel %vm837_vm15, %v762_v54, %v857_v46  ;;  %v1300_v12 = vsel %vm5589_vm12, %v3940_v26, %v3941_v30  ;;  %vm5590_vm6 = vmmov %vm5586_vm4 }
 0x170   :  { %918 = vmatpush.xpose.msrb.mxu2 %v876_v52  ;;  %v1321_v52 = vsel %vm5585_vm10, %v4879_v44, %v1227_v38  ;;  %vm5592_vm5 = vmmov %vm5588_vm1  ;;  %vm5596_vm15 = vcmp.lt.s32.totalorder %v4449_v1, %v5022_v40  ;;  %vm827_vm12 = vcmp.gt.f32.partialorder %v756_v55, 0.0  ;;  %v5601_v54 = vmov 0.00390625  }
 0x171   :  { %v882_v33 = vsel %vm842_vm2, %v765_v3, %v862_v18  ;;  %v1326_v31 = vsel %vm5586_vm4, %v1321_v52, %v4893_v2  ;;  %vm5587_vm2 = vmmov %vm5585_vm10  ;;  %vm832_vm10 = vcmp.gt.f32.partialorder %v759_v56, 0.0  ;;  %v866_v2 = vsel %vm5593_vm9, %v727_v45, %v846_v59 }
 0x172   :  { %937 = vmatpush.xpose.msrb.mxu3 %v882_v33  ;;  %v1320_v48 = vsel %vm5587_vm2, %v4814_v21, %v1226_v20  ;;  %v1331_v25 = vsel %vm5588_vm1, %v1326_v31, %v1264_v11  ;;  %vm5594_vm4 = vcmask 1046528   ;;  %vm5595_vm2 = vmmov %vm5591_vm13  ;;  %v820_v11 = vadd.f32 %v819_v17, %v4757_v5 }
 0x173   :  { %v1325_v44 = vsel %vm5590_vm6, %v1320_v48, %v1248_v47  ;;  %v1336_v38 = vsel %vm5591_vm13, %v1331_v25, %v1279_v8  ;;  %vm5597_vm13 = vcmp.ge.s32.totalorder %v4449_v1, %v5005_v36  ;;  %vm5600_vm9 = vmmov %vm5594_vm4  ;;  %v872_v30 = vsel %vm832_vm10, %v759_v56, %v852_v13 }
 0x174   :  { %919 = vmatpush.xpose.msrb.mxu2 %v871_v23  ;;  %v1330_v39 = vsel %vm5592_vm5, %v1325_v44, %v1263_v29  ;;  %v5085_v18 = vsel %vm5594_vm4, %v1336_v38, %v1301_v43  ;;  %vm5096_vm5 = vmand %vm5597_vm13, %vm5596_vm15  ;;  %vm269_vm6 = vcmp.ge.s32.totalorder %v4441_v57, %v5005_v36  ;;  %vm275_vm4 = vcmp.lt.s32.totalorder %v4441_v57, %v5022_v40 }
 0x175   :  { %v790_v3 = vpop.f32.mrf.mxu3  ;;  %v1335_v21 = vsel %vm5595_vm2, %v1330_v39, %v1278_v22  ;;  %v847_v22 = vmul.f32 0.01, %v756_v55  ;;  %v817_v1 = vadd.f32 %v5017_v35, %v4644_v15  ;;  %v859_v10 = vmul.f32 0.01, %v820_v11  ;;  %vm5114_vm2 = vmand %vm269_vm6, %vm275_vm4 }
 0x176   :  { %938 = vmatpush.xpose.msrb.mxu3 %v877_v41  ;;  %v5101_v45 = vsel %vm5600_vm9, %v1335_v21, %v1300_v12  ;;  %vm839_vm10 = vcmp.gt.f32.partialorder %v820_v11, 0.0  ;;  %v791_v8 = vadd.f32 %v790_v3, %v4757_v5  ;;  %v814_v57 = vadd.f32 %v4997_v37, %v4770_v53 }
 0x177   :  { %v822_v33 = vpop.f32.mrf.mxu0  ;;  %v867_v26 = vsel %vm827_vm12, %v756_v55, %v847_v22  ;;  %v854_v42 = vmul.f32 0.01, %v817_v1  ;;  %v879_v43 = vsel %vm839_vm10, %v820_v11, %v859_v10  ;;  %vm834_vm13 = vcmp.gt.f32.partialorder %v817_v1, 0.0 }
 0x178   :  { %v823_v20 = vadd.f32 %v822_v33, %v4759_v60  ;;  %920 = vmatpush.xpose.msrb.mxu2 %v866_v2  ;;  %v788_v5 = vadd.f32 %v5051_v32, %v4644_v15  ;;  %vm838_vm9 = vcmp.gt.f32.partialorder %v791_v8, 0.0  ;;  %v849_v23 = vmul.f32 0.01, %v814_v57  ;;  %v5627_v33 = vld [vmem:[#allocation34_spill] sm:$0xff]  ;;  %v5629_v2 = vld [vmem:[#allocation27_spill] sm:$0xff] }
 0x179   :  { %v874_v13 = vsel %vm834_vm13, %v817_v1, %v854_v42  ;;  %v785_v37 = vadd.f32 %v5011_v19, %v4770_v53  ;;  %vm271_vm12 = vcmp.ge.s32.totalorder %v4484_v24, %v5005_v36  ;;  %vm277_vm6 = vcmp.lt.s32.totalorder %v4484_v24, %v5022_v40  ;;  %v5634_v1 = vld [vmem:[#allocation30_spill] sm:$0xff] }
 0x17a   :  { %vm844_vm1 = vcmp.gt.f32.partialorder %v823_v20, 0.0  ;;  %v864_v17 = vmul.f32 0.01, %v823_v20  ;;  %939 = vmatpush.xpose.msrb.mxu3 %v872_v30  ;;  %v853_v52 = vmul.f32 0.01, %v788_v5  ;;  %v1180_v15 = vsel %vm4492_vm14, %v4839_v34, 0.0  ;;  %vm5134_vm10 = vmand %vm271_vm12, %vm277_vm6 }
 0x17b   :  { %3050 = vmatmul.msk.f32.vlgmr.msrb.gmra.mxu2 %vm5096_vm5, %v5601_v54  ;;  %vm833_vm4 = vcmp.gt.f32.partialorder %v788_v5, 0.0  ;;  %v848_v19 = vmul.f32 0.01, %v785_v37  ;;  %vm828_vm13 = vcmp.gt.f32.partialorder %v785_v37, 0.0  ;;  %vm270_vm14 = vcmp.ge.s32.totalorder %v4548_v9, %v5005_v36 }
 0x17c   :  { %v884_v56 = vsel %vm844_vm1, %v823_v20, %v864_v17  ;;  %vm829_vm1 = vcmp.gt.f32.partialorder %v814_v57, 0.0  ;;  %v873_v48 = vsel %vm833_vm4, %v788_v5, %v853_v52  ;;  %v1179_v24 = vsel %vm4352_vm3, %v4833_v49, 0.0  ;;  %v5632_v20 = vld [vmem:[#allocation29_spill] sm:$0xff]  ;;  %v3651_v17 = vld [vmem:[%s5383_s3 + $0x8] sm:$0xff] }
 0x17d   :  { %v793_v47 = vpop.f32.mrf.mxu3  ;;  %977 = vmatpush.xpose.msra.mxu2 %v884_v56  ;;  %v869_v32 = vsel %vm829_vm1, %v814_v57, %v849_v23  ;;  %vm5607_vm1 = vcmask 769024   ;;  %v868_v3 = vsel %vm828_vm13, %v785_v37, %v848_v19  ;;  %v1129_v49 = vsel %vm4563_vm8, %v4930_v62, 0.0  ;;  %v3650_v57 = vld [vmem:[%s5383_s3] sm:$0xff] }
 0x17e   :  { %v794_v46 = vadd.f32 %v793_v47, %v4759_v60  ;;  %940 = vmatpush.xpose.msrb.mxu3 %v867_v26  ;;  %v858_v60 = vmul.f32 0.01, %v791_v8  ;;  %v1173_v34 = vsel %vm5607_vm1, %v4916_v27, %v1168_v28  ;;  %vm5611_vm3 = vcmask 72704  }
 0x17f   :  { %v1230_v27 = vrot.slane %v1102_v6, 5  ;;  %v4011_v36 = vunpack.i.h.bf16 %v4954_v50  ;;  %v1282_v25 = vrot.slane %v1156_v4, 2  ;;  %vm5614_vm13 = vmmov %vm5611_vm3  ;;  %vm5620_vm1 = vcmask 1045504  }
 0x180   :  { %vm843_vm15 = vcmp.gt.f32.partialorder %v794_v46, 0.0  ;;  %v863_v35 = vmul.f32 0.01, %v794_v46  ;;  %v878_v31 = vsel %vm838_vm9, %v791_v8, %v858_v60  ;;  %vm276_vm9 = vcmp.lt.s32.totalorder %v4548_v9, %v5022_v40  ;;  %vm5619_vm11 = vmmov %vm5611_vm3  ;;  %v5639_v8 = vld [vmem:[#allocation31_spill] sm:$0xff] }
 0x181   :  { %978 = vmatpush.xpose.msra.mxu2 %v879_v43  ;;  %3051 = vmatmul.msk.f32.vlgmr.msrb.gmra.mxu3 %vm5114_vm2, %v5601_v54  ;;  %vm5152_vm12 = vmand %vm270_vm14, %vm276_vm9  ;;  %v1183_v9 = vsel %vm4563_vm8, %v1173_v34, 0.0  ;;  %v1267_v40 = vrot.slane %v1129_v49, 3  ;;  %vm5616_vm8 = vcmask 777216   ;;  %vm5617_vm14 = vcmask 1043456   ;;  %v5643_v43 = vld [vmem:[#allocation32_spill] sm:$0xff] }
 0x182   :  { %v883_v55 = vsel %vm843_vm15, %v794_v46, %v863_v35  ;;  %vm5606_vm15 = vcmask 1040384   ;;  %v1304_v62 = vsel %vm5616_vm8, %v5615_v16, %v4011_v36  ;;  %vm5618_vm9 = vcmask 1044480   ;;  %1016 = vmatpush.bf16.msra.mxu3 %v3651_v17  ;;  %v5246_v36 = vpop.permute.xlu0 %1367 }
 0x183   :  { %957 = vmatpush.xpose.msrb.mxu1 %v883_v55  ;;  %vm5610_vm6 = vmmov %vm5606_vm15  ;;  %v5636_v56 = vunpack.i.h.bf16 %v4888_v58  ;;  %v5637_v47 = vunpack.i.l.bf16 %v4888_v58 }
 0x184   :  { %vm5612_vm4 = vmmov %vm5610_vm6 }
 0x185   :  { %979 = vmatpush.xpose.msra.mxu2 %v874_v13 }
 0x186   :  { %1017 = vmatpush.bf16.msra.mxu3 %v3650_v57 }
 0x187   :  { %958 = vmatpush.xpose.msrb.mxu1 %v878_v31 }
 0x189   :  { %980 = vmatpush.xpose.msra.mxu2 %v869_v32 }
 0x18b   :  { %959 = vmatpush.xpose.msrb.mxu1 %v873_v48 }
 0x18c   :  { %3053 = vmatmul.msk.f32.vlgmr.msra.gmra.mxu2 %vm5134_vm10, %v5601_v54 }
 0x18d   :  { %3078 = vmatpush.msk.msrb.mxu2 %vm5606_vm15, %v1180_v15  ;;  %vm5613_vm15 = vcmask 1042432  }
 0x18e   :  { %v1324_v12 = vsel %vm5613_vm15, %v4911_v0, %v1230_v27  ;;  %v5622_v0 = vld [vmem:[#allocation33_spill] sm:$0xff]  ;;  %vm5624_vm15 = vmmov %vm5611_vm3  ;;  %v5244_v27 = vpop.permute.xlu2 %1372 }
 0x18f   :  { %1446 = vmatpush.msrb.mxu2 %v5085_v18  ;;  %960 = vmatpush.xpose.msrb.mxu1 %v868_v3  ;;  %v1329_v44 = vsel %vm5617_vm14, %v1324_v12, %v4948_v14  ;;  %v5625_v14 = vld [vmem:[#allocation28_spill] sm:$0xff]  ;;  %v5630_v18 = vld [vmem:[#allocation26_spill] sm:$0xff]  ;;  %vm5633_vm14 = vmmov %vm5611_vm3 }
 0x190   :  { %v1334_v61 = vsel %vm5618_vm9, %v1329_v44, %v1267_v40  ;;  %v1100_v39 = vsel %vm5526_vm0, %v5625_v14, 0.0  ;;  %vm5631_vm8 = vnez %v5630_v18  ;;  %vm5635_vm9 = vcmask 1042432   ;;  %v5254_v44 = vpop.permute.xlu1 %1362 }
 0x191   :  { %v1339_v7 = vsel %vm5620_vm1, %v1334_v61, %v1282_v25  ;;  %v1127_v21 = vsel %vm5631_vm8, %v5629_v2, 0.0  ;;  %v1228_v11 = vrot.slane %v1100_v39, 5  ;;  %vm5641_vm1 = vcmask 1044480  }
 0x192   :  { %3052 = vmatmul.msk.f32.vlgmr.msrb.gmra.mxu1 %vm5152_vm12, %v5601_v54  ;;  %v1265_v30 = vrot.slane %v1127_v21, 3  ;;  %v1181_v5 = vsel %vm5631_vm8, %v5643_v43, 0.0  ;;  %vm1006_vm8 = vcmask 261120  }
 0x193   :  { %3073 = vmatpush.msk.msra.mxu1 %vm5610_vm6, %v1179_v24  ;;  %vm5621_vm6 = vcmask 1046528   ;;  %v1322_v10 = vsel %vm5635_vm9, %v5634_v1, %v1228_v11 }
 0x194   :  { %3079 = vmatmul.msk.f32.vlgmr.msrb.gmra.mxu2 %vm5611_vm3, %v4966_v63  ;;  %v1344_v38 = vsel %vm5621_vm6, %v1339_v7, %v1304_v62  ;;  %vm5642_vm6 = vcmask 1045504  }
 0x195   :  { %1417 = vmatpush.msra.mxu1 %v5101_v45  ;;  %v1154_v45 = vsel %vm5526_vm0, %v5632_v20, 0.0  ;;  %vm5640_vm0 = vcmask 1043456  }
 0x196   :  { %v1280_v22 = vrot.slane %v1154_v45, 2  ;;  %v1327_v46 = vsel %vm5640_vm0, %v1322_v10, %v5639_v8  ;;  %v5258_v18 = vpop.permute.xlu2 %1357 }
 0x197   :  { %3093 = vmatpush.msk.msrb.mxu1 %vm5612_vm4, %v1183_v9  ;;  %vm5623_vm4 = vmmov %vm5611_vm3  ;;  %v1332_v42 = vsel %vm5641_vm1, %v1327_v46, %v1265_v30 }
 0x198   :  { %v1337_v35 = vsel %vm5642_vm6, %v1332_v42, %v1280_v22 }
 0x199   :  { %1533 = vmatpush.msrb.mxu1 %v1344_v38 }
 0x19a   :  { %3074 = vmatmul.msk.f32.vlgmr.msra.gmra.mxu1 %vm5614_vm13, %v4966_v63  ;;  %vm5628_vm13 = vmmov %vm5611_vm3 }
 0x19b   :  { %vm5648_vm9 = vmmov %vm5628_vm13 }
 0x19c   :  { %3080 = vmatmul.msk.f32.gmra.mxu2 %vm5619_vm11, %v4975_v51  ;;  %vm5638_vm11 = vcmask 777216   ;;  %vm5650_vm0 = vmmov %vm5648_vm9 }
 0x19d   :  { %v1302_v26 = vsel %vm5638_vm11, %v5637_v47, %v5636_v56  ;;  %vm5649_vm11 = vmmov %vm5648_vm9 }
 0x1a2   :  { %3075 = vmatmul.msk.f32.gmra.mxu1 %vm5611_vm3, %v4975_v51  ;;  %vm5644_vm3 = vcmask 1046528  }
 0x1a3   :  { %v1342_v58 = vsel %vm5644_vm3, %v1337_v35, %v1302_v26 }
 0x1a4   :  { %3081 = vmatmul.msk.f32.gmra.mxu2 %vm5623_vm4, %v5622_v0  ;;  %vm5645_vm4 = vcmask 1040384  }
 0x1a5   :  { %3083 = vmatpush.msk.msrb.mxu3 %vm5645_vm4, %v1181_v5 }
 0x1a7   :  { %1475 = vmatpush.msrb.mxu3 %v1342_v58 }
 0x1aa   :  { %3076 = vmatmul.msk.f32.gmra.mxu1 %vm5624_vm15, %v5622_v0  ;;  %vm5646_vm15 = vmmov %vm5628_vm13 }
 0x1ac   :  { %3082 = vmatmul.msk.f32.gmra.mxu2 %vm5628_vm13, %v5627_v33 }
 0x1b2   :  { %3077 = vmatmul.msk.f32.gmra.mxu1 %vm5633_vm14, %v5627_v33  ;;  %vm5647_vm14 = vmmov %vm5628_vm13 }
 0x1b5   :  { %v5240_v28 = vpop.f32.mrf.mxu0 }
 0x1ba   :  { %3094 = vmatmul.msk.f32.vlgmr.msrb.gmra.mxu1 %vm5646_vm15, %v4966_v63  ;;  %vm5651_vm15 = vmmov %vm5650_vm0 }
 0x1bd   :  { %v1509_v9 = vpop.f32.mrf.mxu0 }
 0x1be   :  { %v1510_v43 = vadd.f32 %v1509_v9, %v5254_v44 }
 0x1c2   :  { %3095 = vmatmul.msk.f32.gmra.mxu1 %vm5628_vm13, %v4975_v51 }
 0x1c5   :  { %v1512_v4 = vpop.f32.mrf.mxu0 }
 0x1ca   :  { %3096 = vmatmul.msk.f32.gmra.mxu1 %vm5647_vm14, %v5622_v0 }
 0x1cc   :  { %v902_v60 = vpop.f32.mrf.mxu1 }
 0x1cd   :  { %v1515_v21 = vpop.f32.mrf.mxu0 }
 0x1ce   :  { %v1516_v10 = vadd.f32 %v1515_v21, %v5244_v27 }
 0x1d0   :  { %v1585_v46 = vmul.f32 0.01, %v1516_v10 }
 0x1d2   :  { %3097 = vmatmul.msk.f32.gmra.mxu1 %vm5648_vm9, %v5627_v33 }
 0x1fe   :  { %v922_v55 = vpop.f32.mrf.mxu2 }
 0x1ff   :  { %v923_v23 = vadd.f32 %v922_v55, %v902_v60  ;;  %v1507_v55 = vadd.f32 %v5240_v28, %v5258_v18 }
 0x204   :  { %v942_v13 = vpop.f32.mrf.mxu3 }
 0x205   :  { %v943_v37 = vadd.f32 %v942_v13, %v923_v23  ;;  %v1575_v23 = vmul.f32 0.01, %v1510_v43 }
 0x20f   :  { %v962_v52 = vpop.f32.mrf.mxu1  ;;  %v982_v31 = vpop.f32.mrf.mxu2 }
 0x210   :  { %v963_v15 = vadd.f32 %v962_v52, %v943_v37  ;;  %v1570_v37 = vmul.f32 0.01, %v1507_v55 }
 0x212   :  { %v983_v32 = vadd.f32 %v982_v31, %v963_v15 }
 0x214   :  { %v985_v19 = vpack.c.bf16 %v983_v32, %v983_v32 }
 0x216   :  { %3062 = vmatmul.msk.bf16.vlgmr.msra.gmra.mxu3 %vm1006_vm8, %v985_v19 }
 0x217   :  { %v1419_v48 = vpop.f32.mrf.mxu1  ;;  %v1448_v24 = vpop.f32.mrf.mxu2 }
 0x218   :  { %v1420_v11 = vadd.f32 %v1419_v48, %v5258_v18  ;;  %v1449_v20 = vadd.f32 %v1448_v24, %v5258_v18 }
 0x21a   :  { %v1567_v56 = vmul.f32 0.01, %v1420_v11  ;;  %v1568_v47 = vmul.f32 0.01, %v1449_v20  ;;  %vm1547_vm9 = vcmp.gt.f32.partialorder %v1420_v11, 0.0 }
 0x21c   :  { %v1587_v42 = vsel %vm1547_vm9, %v1420_v11, %v1567_v56 }
 0x21f   :  { %v1422_v34 = vpop.f32.mrf.mxu1  ;;  %v1451_v3 = vpop.f32.mrf.mxu2 }
 0x220   :  { %v1423_v38 = vadd.f32 %v1422_v34, %v5254_v44 }
 0x222   :  { %v1572_v30 = vmul.f32 0.01, %v1423_v38  ;;  %vm1552_vm13 = vcmp.gt.f32.partialorder %v1423_v38, 0.0 }
 0x224   :  { %v1592_v26 = vsel %vm1552_vm13, %v1423_v38, %v1572_v30 }
 0x226   :  { %3084 = vmatmul.msk.f32.vlgmr.msrb.gmra.mxu3 %vm5649_vm11, %v4966_v63  ;;  %vm1548_vm11 = vcmp.gt.f32.partialorder %v1449_v20, 0.0 }
 0x227   :  { %v1425_v6 = vpop.f32.mrf.mxu1  ;;  %v1454_v49 = vpop.f32.mrf.mxu2  ;;  %v1588_v35 = vsel %vm1548_vm11, %v1449_v20, %v1568_v47  ;;  %vm1751_vm11 = vcmask 523264  }
 0x228   :  { %v1426_v12 = vadd.f32 %v1425_v6, %v5246_v36  ;;  %v1455_v16 = vadd.f32 %v1454_v49, %v5246_v36 }
 0x22a   :  { %v1577_v14 = vmul.f32 0.01, %v1426_v12  ;;  %v1578_v50 = vmul.f32 0.01, %v1455_v16  ;;  %vm1557_vm3 = vcmp.gt.f32.partialorder %v1426_v12, 0.0  ;;  %vm1558_vm4 = vcmp.gt.f32.partialorder %v1455_v16, 0.0 }
 0x22c   :  { %v1597_v17 = vsel %vm1557_vm3, %v1426_v12, %v1577_v14  ;;  %v1598_v1 = vsel %vm1558_vm4, %v1455_v16, %v1578_v50  ;;  %vm1555_vm3 = vcmp.gt.f32.partialorder %v1510_v43, 0.0  ;;  %vm1550_vm4 = vcmp.gt.f32.partialorder %v1507_v55, 0.0 }
 0x22d   :  { %v1595_v52 = vsel %vm1555_vm3, %v1510_v43, %v1575_v23  ;;  %v1590_v31 = vsel %vm1550_vm4, %v1507_v55, %v1570_v37 }
 0x22e   :  { %3085 = vmatmul.msk.f32.gmra.mxu3 %vm5650_vm0, %v4975_v51  ;;  %v1452_v51 = vadd.f32 %v1451_v3, %v5254_v44  ;;  %vm1565_vm0 = vcmp.gt.f32.partialorder %v1516_v10, 0.0 }
 0x22f   :  { %v1428_v40 = vpop.f32.mrf.mxu1  ;;  %v1457_v25 = vpop.f32.mrf.mxu2  ;;  %v1605_v58 = vsel %vm1565_vm0, %v1516_v10, %v1585_v46  ;;  %v4013_v10 = vld [vmem:[%s5384_s4 + $0x1] ss:$0 sm:$0xff]  ;;  %v4012_v46 = vld [vmem:[%s5384_s4] ss:$0 sm:$0xff] }
 0x230   :  { %v1429_v62 = vadd.f32 %v1428_v40, %v5244_v27  ;;  %v1458_v63 = vadd.f32 %v1457_v25, %v5244_v27  ;;  %v1573_v22 = vmul.f32 0.01, %v1452_v51  ;;  %vm1553_vm14 = vcmp.gt.f32.partialorder %v1452_v51, 0.0 }
 0x232   :  { %vm1562_vm1 = vcmp.gt.f32.partialorder %v1429_v62, 0.0  ;;  %v1582_v61 = vmul.f32 0.01, %v1429_v62  ;;  %vm1563_vm6 = vcmp.gt.f32.partialorder %v1458_v63, 0.0  ;;  %v1583_v7 = vmul.f32 0.01, %v1458_v63 }
 0x233   :  { %v1593_v8 = vsel %vm1553_vm14, %v1452_v51, %v1573_v22 }
 0x234   :  { %v1602_v39 = vsel %vm1562_vm1, %v1429_v62, %v1582_v61  ;;  %v1603_v2 = vsel %vm1563_vm6, %v1458_v63, %v1583_v7  ;;  %vm5652_vm1 = vmmov %vm5651_vm15 }
 0x235   :  { %1619 = vmatpush.xpose.msra.mxu2 %v1602_v39  ;;  %1639 = vmatpush.xpose.msra.mxu3 %v1603_v2 }
 0x236   :  { %3086 = vmatmul.msk.f32.gmra.mxu3 %vm5651_vm15, %v5622_v0  ;;  %v1513_v0 = vadd.f32 %v1512_v4, %v5246_v36 }
 0x237   :  { %v1535_v45 = vpop.f32.mrf.mxu1 }
 0x238   :  { %v1580_v5 = vmul.f32 0.01, %v1513_v0  ;;  %vm1560_vm6 = vcmp.gt.f32.partialorder %v1513_v0, 0.0  ;;  %v1536_v34 = vadd.f32 %v1535_v45, %v5258_v18 }
 0x239   :  { %1620 = vmatpush.xpose.msra.mxu2 %v1597_v17  ;;  %1640 = vmatpush.xpose.msra.mxu3 %v1598_v1 }
 0x23a   :  { %v1571_v6 = vmul.f32 0.01, %v1536_v34  ;;  %vm1551_vm13 = vcmp.gt.f32.partialorder %v1536_v34, 0.0 }
 0x23c   :  { %v1591_v41 = vsel %vm1551_vm13, %v1536_v34, %v1571_v6 }
 0x23d   :  { %1621 = vmatpush.xpose.msra.mxu2 %v1592_v26  ;;  %1641 = vmatpush.xpose.msra.mxu3 %v1593_v8  ;;  %v1746_v8 = vld [vmem:[%s5385_s5] sm:$0x3] }
 0x23e   :  { %3087 = vmatmul.msk.f32.gmra.mxu3 %vm5652_vm1, %v5627_v33  ;;  %v1600_v33 = vsel %vm1560_vm6, %v1513_v0, %v1580_v5 }
 0x23f   :  { %v1538_v57 = vpop.f32.mrf.mxu1 }
 0x240   :  { %v1539_v29 = vadd.f32 %v1538_v57, %v5254_v44 }
 0x241   :  { %1622 = vmatpush.xpose.msra.mxu2 %v1587_v42  ;;  %1642 = vmatpush.xpose.msra.mxu3 %v1588_v35 }
 0x242   :  { %v1576_v3 = vmul.f32 0.01, %v1539_v29  ;;  %vm1556_vm15 = vcmp.gt.f32.partialorder %v1539_v29, 0.0 }
 0x244   :  { %3098 = vmatmul.msk.f32.vlgmr.msra.gmra.mxu2 %vm5035_vm7, %v5601_v54  ;;  %v1596_v49 = vsel %vm1556_vm15, %v1539_v29, %v1576_v3 }
 0x245   :  { %1679 = vmatpush.xpose.msrb.mxu2 %v1605_v58 }
 0x246   :  { %3099 = vmatmul.msk.f32.vlgmr.msra.gmra.mxu3 %vm5096_vm5, %v5601_v54 }
 0x247   :  { %v1541_v13 = vpop.f32.mrf.mxu1 }
 0x248   :  { %v1542_v32 = vadd.f32 %v1541_v13, %v5246_v36 }
 0x249   :  { %1680 = vmatpush.xpose.msrb.mxu2 %v1600_v33 }
 0x24a   :  { %v1581_v24 = vmul.f32 0.01, %v1542_v32  ;;  %vm1561_vm5 = vcmp.gt.f32.partialorder %v1542_v32, 0.0 }
 0x24c   :  { %v1601_v9 = vsel %vm1561_vm5, %v1542_v32, %v1581_v24 }
 0x24d   :  { %1681 = vmatpush.xpose.msrb.mxu2 %v1595_v52 }
 0x24f   :  { %v1544_v15 = vpop.f32.mrf.mxu1 }
 0x250   :  { %v1545_v19 = vadd.f32 %v1544_v15, %v5244_v27 }
 0x251   :  { %1682 = vmatpush.xpose.msrb.mxu2 %v1590_v31 }
 0x252   :  { %vm1566_vm7 = vcmp.gt.f32.partialorder %v1545_v19, 0.0  ;;  %v1586_v48 = vmul.f32 0.01, %v1545_v19 }
 0x254   :  { %3101 = vmatmul.msk.f32.vlgmr.msrb.gmra.mxu2 %vm5152_vm12, %v5601_v54  ;;  %v1606_v28 = vsel %vm1566_vm7, %v1545_v19, %v1586_v48 }
 0x255   :  { %1699 = vmatpush.xpose.msrb.mxu3 %v1606_v28 }
 0x259   :  { %1700 = vmatpush.xpose.msrb.mxu3 %v1601_v9 }
 0x25d   :  { %1701 = vmatpush.xpose.msrb.mxu3 %v1596_v49 }
 0x261   :  { %1702 = vmatpush.xpose.msrb.mxu3 %v1591_v41 }
 0x264   :  { %3102 = vmatmul.msk.f32.vlgmr.msrb.gmra.mxu3 %vm5134_vm10, %v5601_v54 }
 0x299   :  { %v1019_v4 = vpop.f32.mrf.mxu3 }
 0x29a   :  { %v1020_v57 = vadd.f32 %v4012_v46, %v1019_v4 }
 0x2a1   :  { %v1021_v40 = vpop.f32.mrf.mxu3 }
 0x2a9   :  { %v1477_v25 = vpop.f32.mrf.mxu3 }
 0x2aa   :  { %v1478_v53 = vadd.f32 %v1477_v25, %v5258_v18 }
 0x2ac   :  { %v1569_v2 = vmul.f32 0.01, %v1478_v53  ;;  %vm1549_vm9 = vcmp.gt.f32.partialorder %v1478_v53, 0.0 }
 0x2b1   :  { %v1480_v12 = vpop.f32.mrf.mxu3 }
 0x2b2   :  { %v1481_v38 = vadd.f32 %v1480_v12, %v5254_v44  ;;  %v3652_v44 = vld [vmem:[%s5383_s3 + $0x10] sm:$0xff] }
 0x2b4   :  { %v1574_v50 = vmul.f32 0.01, %v1481_v38  ;;  %vm1554_vm10 = vcmp.gt.f32.partialorder %v1481_v38, 0.0 }
 0x2b6   :  { %v1594_v21 = vsel %vm1554_vm10, %v1481_v38, %v1574_v50 }
 0x2b9   :  { %v1483_v16 = vpop.f32.mrf.mxu3 }
 0x2ba   :  { %v1484_v63 = vadd.f32 %v1483_v16, %v5246_v36  ;;  %v1589_v36 = vsel %vm1549_vm9, %v1478_v53, %v1569_v2 }
 0x2bc   :  { %v1579_v51 = vmul.f32 0.01, %v1484_v63  ;;  %vm1559_vm14 = vcmp.gt.f32.partialorder %v1484_v63, 0.0 }
 0x2be   :  { %v1599_v39 = vsel %vm1559_vm14, %v1484_v63, %v1579_v51 }
 0x2c1   :  { %v1486_v62 = vpop.f32.mrf.mxu3 }
 0x2c2   :  { %v1487_v61 = vadd.f32 %v1486_v62, %v5244_v27  ;;  %v3653_v27 = vld [vmem:[%s5383_s3 + $0x18] sm:$0xff]  ;;  %s4086_s3 = smov 64  }
 0x2c4   :  { %vm1564_vm12 = vcmp.gt.f32.partialorder %v1487_v61, 0.0  ;;  %v1584_v7 = vmul.f32 0.01, %v1487_v61 }
 0x2c6   :  { %v1604_v14 = vsel %vm1564_vm12, %v1487_v61, %v1584_v7 }
 0x2c7   :  { %1659 = vmatpush.xpose.msrb.mxu0 %v1604_v14  ;;  %v1624_v18 = vpop.f32.mrf.mxu2 }
 0x2c9   :  { %v1644_v11 = vpop.f32.mrf.mxu3 }
 0x2ca   :  { %v1645_v20 = vadd.f32 %v1644_v11, %v1624_v18 }
 0x2cb   :  { %1660 = vmatpush.xpose.msrb.mxu0 %v1599_v39 }
 0x2cf   :  { %1661 = vmatpush.xpose.msrb.mxu0 %v1594_v21 }
 0x2d3   :  { %1662 = vmatpush.xpose.msrb.mxu0 %v1589_v36 }
 0x2d6   :  { %3100 = vmatmul.msk.f32.vlgmr.msrb.gmra.mxu0 %vm5114_vm2, %v5601_v54  ;;  %vm1753_vm2 = vcmask 97280  }
 0x2d7   :  { %1739 = vmatpush.bf16.msra.mxu0 %v3653_v27  ;;  %v1684_v30 = vpop.f32.mrf.mxu2  ;;  %v1754_v0 = vsel %vm1753_vm2, %v1746_v8, 0.0 }
 0x2db   :  { %1740 = vmatpush.bf16.msra.mxu0 %v3652_v44 }
 0x2e7   :  { %v1704_v17 = vpop.f32.mrf.mxu3 }
 0x353   :  { %v1664_v45 = vpop.f32.mrf.mxu0 }
 0x354   :  { %v1665_v22 = vadd.f32 %v1664_v45, %v1645_v20 }
 0x356   :  { %v1685_v1 = vadd.f32 %v1684_v30, %v1665_v22 }
 0x358   :  { %v1705_v59 = vadd.f32 %v1704_v17, %v1685_v1 }
 0x35a   :  { %v1707_v54 = vpack.c.bf16 %v1705_v59, %v1705_v59 }
 0x35c   :  { %3116 = vmatmul.msk.bf16.vlgmr.msra.gmra.mxu0 %vm1006_vm8, %v1707_v54 }
 0x3d9   :  { %v1742_v56 = vpop.f32.mrf.mxu0 }
 0x3da   :  { %v1743_v47 = vadd.f32 %v4013_v10, %v1742_v56 }
 0x3dc   :  { %1748 = vrot.lane.b32.xlu0 %v1743_v47, %s4086_s3 }
 0x3e1   :  { %v1744_v26 = vpop.f32.mrf.mxu0 }
 0x44e   :  { %v1749_v42 = vpop.permute.xlu0 %1748 }
 0x44f   :  { %v5311_v35 = vsel %vm1751_vm11, %v1020_v57, %v1749_v42 }
 0x450   :  { %4062 = dma.done.wait [#allocation8], 4608 }
 0x451   :  { %4063 = vsyncadd [#allocation8], 4294962688  ;;  %vm1987_vm0 = vcmask 130048   ;;  %v3231_v43 = vld [vmem:[#allocation2 + $0xe0] sm:$0xf]  ;;  %v5313_v40 = vpack.c.bf16 %v1754_v0, %v1754_v0 }
 0x452   :  { %v3684_v5 = vld [vmem:[#allocation2 + $0xec] sm:$0xf0]  ;;  %v3682_v58 = vld [vmem:[#allocation2 + $0xe4] sm:$0xf]  ;;  %v3233_v55 = vld [vmem:[#allocation2 + $0xf0] sm:$0xf0] }
 0x453   :  { %v3232_v60 = vor.u32 %v3684_v5, %v3231_v43  ;;  %v3247_v23 = vld [vmem:[#allocation2 + $0x100] sm:$0xf]  ;;  %v3688_v33 = vld [vmem:[#allocation2 + $0x10c] sm:$0xf0]  ;;  %v3236_v13 = vor.u32 %v3682_v58, %v3233_v55  ;;  %v3239_v52 = vld [vmem:[#allocation2 + $0xe8] sm:$0xf] }
 0x454   :  { %v3248_v37 = vor.u32 %v3688_v33, %v3247_v23  ;;  %v3685_v31 = vld [vmem:[#allocation2 + $0xf4] sm:$0xf0]  ;;  %v3215_v15 = vld [vmem:[#allocation2 + $0xc0] sm:$0xf]  ;;  %v3680_v19 = vld [vmem:[#allocation2 + $0xcc] sm:$0xf0] }
 0x455   :  { %1991 = vmatpush.bf16.msra.mxu1 %v3232_v60  ;;  %v3240_v32 = vor.u32 %v3685_v31, %v3239_v52  ;;  %v3678_v48 = vld [vmem:[#allocation2 + $0xc4] sm:$0xf]  ;;  %v3217_v29 = vld [vmem:[#allocation2 + $0xd0] sm:$0xf0]  ;;  %2017 = vmatpush.bf16.msrb.mxu0 %v3236_v13  ;;  %v3216_v24 = vor.u32 %v3680_v19, %v3215_v15  ;;  %v3223_v34 = vld [vmem:[#allocation2 + $0xc8] sm:$0xf] }
 0x456   :  { %2011 = vmatpush.bf16.msra.mxu2 %v3248_v37  ;;  %v3220_v28 = vor.u32 %v3678_v48, %v3217_v29  ;;  %v3681_v3 = vld [vmem:[#allocation2 + $0xd4] sm:$0xf0]  ;;  %v3199_v9 = vld [vmem:[#allocation2 + $0xa0] sm:$0xf]  ;;  %v3676_v49 = vld [vmem:[#allocation2 + $0xac] sm:$0xf0] }
 0x457   :  { %v3224_v6 = vor.u32 %v3681_v3, %v3223_v34  ;;  %v3674_v41 = vld [vmem:[#allocation2 + $0xa4] sm:$0xf]  ;;  %v3201_v4 = vld [vmem:[#allocation2 + $0xb0] sm:$0xf0]  ;;  %v3207_v16 = vld [vmem:[#allocation2 + $0xa8] sm:$0xf]  ;;  %v3200_v62 = vor.u32 %v3676_v49, %v3199_v9 }
 0x458   :  { %v3686_v25 = vld [vmem:[#allocation2 + $0x104] sm:$0xf]  ;;  %v3249_v12 = vld [vmem:[#allocation2 + $0x110] sm:$0xf0]  ;;  %v3677_v61 = vld [vmem:[#allocation2 + $0xb4] sm:$0xf0]  ;;  %v3204_v7 = vor.u32 %v3674_v41, %v3201_v4 }
 0x459   :  { %1992 = vmatpush.bf16.msra.mxu1 %v3216_v24  ;;  %v3252_v63 = vor.u32 %v3686_v25, %v3249_v12  ;;  %3261 = vmatmul.msk.bf16.vlgmr.msra.gmra.mxu2 %vm1987_vm0, %v5313_v40  ;;  %v3183_v38 = vld [vmem:[#allocation2 + $0x80] sm:$0xf]  ;;  %v3672_v51 = vld [vmem:[#allocation2 + $0x8c] sm:$0xf0]  ;;  %v3208_v14 = vor.u32 %v3677_v61, %v3207_v16  ;;  %v3670_v53 = vld [vmem:[#allocation2 + $0x84] sm:$0xf]  ;;  %v1795_v16 = vpack.c.bf16 %v5311_v35, %v5311_v35 }
 0x45a   :  { %2043 = vmatpush.bf16.msrb.mxu2 %v3240_v32  ;;  %2018 = vmatpush.bf16.msrb.mxu0 %v3220_v28  ;;  %v3185_v50 = vld [vmem:[#allocation2 + $0x90] sm:$0xf0]  ;;  %v3191_v39 = vld [vmem:[#allocation2 + $0x88] sm:$0xf]  ;;  %v3673_v2 = vld [vmem:[#allocation2 + $0x94] sm:$0xf0]  ;;  %v3184_v21 = vor.u32 %v3672_v51, %v3183_v38 }
 0x45b   :  { %2037 = vmatpush.bf16.msra.mxu3 %v3252_v63  ;;  %v3188_v36 = vor.u32 %v3670_v53, %v3185_v50  ;;  %v3167_v27 = vld [vmem:[#allocation2 + $0x60] sm:$0xf]  ;;  %v3668_v44 = vld [vmem:[#allocation2 + $0x6c] sm:$0xf0]  ;;  %v3255_v18 = vld [vmem:[#allocation2 + $0x108] sm:$0xf]  ;;  %v3192_v11 = vor.u32 %v3673_v2, %v3191_v39 }
 0x45c   :  { %v3666_v20 = vld [vmem:[#allocation2 + $0x64] sm:$0xf]  ;;  %v3169_v45 = vld [vmem:[#allocation2 + $0x70] sm:$0xf0]  ;;  %v3689_v30 = vld [vmem:[#allocation2 + $0x114] sm:$0xf0]  ;;  %v3168_v59 = vor.u32 %v3668_v44, %v3167_v27 }
 0x45d   :  { %1993 = vmatpush.bf16.msra.mxu1 %v3200_v62  ;;  %v3175_v22 = vld [vmem:[#allocation2 + $0x68] sm:$0xf]  ;;  %v3669_v17 = vld [vmem:[#allocation2 + $0x74] sm:$0xf0]  ;;  %v3256_v1 = vor.u32 %v3689_v30, %v3255_v18  ;;  %v3172_v54 = vor.u32 %v3666_v20, %v3169_v45  ;;  %v3151_v10 = vld [vmem:[#allocation2 + $0x40] sm:$0xf] }
 0x45e   :  { %2044 = vmatpush.bf16.msrb.mxu2 %v3224_v6  ;;  %2019 = vmatpush.bf16.msrb.mxu0 %v3204_v7  ;;  %v3664_v56 = vld [vmem:[#allocation2 + $0x4c] sm:$0xf0]  ;;  %v3176_v47 = vor.u32 %v3669_v17, %v3175_v22  ;;  %v3662_v26 = vld [vmem:[#allocation2 + $0x44] sm:$0xf]  ;;  %v3153_v8 = vld [vmem:[#allocation2 + $0x50] sm:$0xf0] }
 0x45f   :  { %3262 = vmatmul.msk.bf16.vlgmr.msra.gmra.mxu3 %vm1987_vm0, %v5313_v40  ;;  %v3159_v0 = vld [vmem:[#allocation2 + $0x48] sm:$0xf]  ;;  %v3665_v46 = vld [vmem:[#allocation2 + $0x54] sm:$0xf0]  ;;  %v3152_v57 = vor.u32 %v3664_v56, %v3151_v10  ;;  %v3135_v42 = vld [vmem:[#allocation2 + $0x20] sm:$0xf]  ;;  %v3156_v43 = vor.u32 %v3662_v26, %v3153_v8 }
 0x460   :  { %2063 = vmatpush.bf16.msrb.mxu3 %v3256_v1  ;;  %v3660_v5 = vld [vmem:[#allocation2 + $0x2c] sm:$0xf0]  ;;  %v3687_v58 = vld [vmem:[#allocation2 + $0x10c] sm:$0xf]  ;;  %v3257_v60 = vld [vmem:[#allocation2 + $0x118] sm:$0xf0]  ;;  %v3160_v55 = vor.u32 %v3665_v46, %v3159_v0 }
 0x461   :  { %1994 = vmatpush.bf16.msra.mxu1 %v3184_v21  ;;  %v3658_v23 = vld [vmem:[#allocation2 + $0x24] sm:$0xf]  ;;  %v3137_v33 = vld [vmem:[#allocation2 + $0x30] sm:$0xf0]  ;;  %v3260_v13 = vor.u32 %v3687_v58, %v3257_v60  ;;  %v3143_v37 = vld [vmem:[#allocation2 + $0x28] sm:$0xf]  ;;  %v3136_v31 = vor.u32 %v3660_v5, %v3135_v42 }
 0x462   :  { %2045 = vmatpush.bf16.msrb.mxu2 %v3208_v14  ;;  %2020 = vmatpush.bf16.msrb.mxu0 %v3188_v36  ;;  %v3661_v52 = vld [vmem:[#allocation2 + $0x34] sm:$0xf0]  ;;  %v3140_v15 = vor.u32 %v3658_v23, %v3137_v33  ;;  %v3119_v32 = vld [vmem:[#allocation2] sm:$0xf]  ;;  %v3656_v19 = vld [vmem:[#allocation2 + $0xc] sm:$0xf0] }
 0x463   :  { %v3654_v48 = vld [vmem:[#allocation2 + $0x4] sm:$0xf]  ;;  %v3144_v29 = vor.u32 %v3661_v52, %v3143_v37  ;;  %v3121_v24 = vld [vmem:[#allocation2 + $0x10] sm:$0xf0]  ;;  %v3683_v28 = vld [vmem:[#allocation2 + $0xec] sm:$0xf]  ;;  %v3120_v6 = vor.u32 %v3656_v19, %v3119_v32 }
 0x464   :  { %2089 = vmatpush.bf16.msra.mxu3 %v3260_v13  ;;  %v3241_v34 = vld [vmem:[#allocation2 + $0xf8] sm:$0xf0]  ;;  %v3127_v3 = vld [vmem:[#allocation2 + $0x8] sm:$0xf]  ;;  %v3657_v9 = vld [vmem:[#allocation2 + $0x14] sm:$0xf0]  ;;  %v3124_v49 = vor.u32 %v3654_v48, %v3121_v24 }
 0x465   :  { %1995 = vmatpush.bf16.msra.mxu1 %v3168_v59  ;;  %v3244_v41 = vor.u32 %v3683_v28, %v3241_v34  ;;  %v3128_v4 = vor.u32 %v3657_v9, %v3127_v3  ;;  %v3679_v25 = vld [vmem:[#allocation2 + $0xcc] sm:$0xf]  ;;  %v3225_v12 = vld [vmem:[#allocation2 + $0xd8] sm:$0xf0] }
 0x466   :  { %2046 = vmatpush.bf16.msrb.mxu2 %v3192_v11  ;;  %2021 = vmatpush.bf16.msrb.mxu0 %v3172_v54  ;;  %v3228_v62 = vor.u32 %v3679_v25, %v3225_v12  ;;  %v3675_v63 = vld [vmem:[#allocation2 + $0xac] sm:$0xf]  ;;  %v3209_v61 = vld [vmem:[#allocation2 + $0xb8] sm:$0xf0] }
 0x467   :  { %v3212_v7 = vor.u32 %v3675_v63, %v3209_v61  ;;  %v3671_v38 = vld [vmem:[#allocation2 + $0x8c] sm:$0xf]  ;;  %v3193_v51 = vld [vmem:[#allocation2 + $0x98] sm:$0xf0] }
 0x468   :  { %v3196_v14 = vor.u32 %v3671_v38, %v3193_v51  ;;  %v3667_v53 = vld [vmem:[#allocation2 + $0x6c] sm:$0xf]  ;;  %v3177_v50 = vld [vmem:[#allocation2 + $0x78] sm:$0xf0] }
 0x469   :  { %1996 = vmatpush.bf16.msra.mxu1 %v3152_v57  ;;  %v3180_v39 = vor.u32 %v3667_v53, %v3177_v50  ;;  %v3663_v35 = vld [vmem:[#allocation2 + $0x4c] sm:$0xf]  ;;  %v3161_v2 = vld [vmem:[#allocation2 + $0x58] sm:$0xf0] }
 0x46a   :  { %2047 = vmatpush.bf16.msrb.mxu2 %v3176_v47  ;;  %2022 = vmatpush.bf16.msrb.mxu0 %v3156_v43  ;;  %v3164_v21 = vor.u32 %v3663_v35, %v3161_v2  ;;  %v3659_v36 = vld [vmem:[#allocation2 + $0x2c] sm:$0xf]  ;;  %v3145_v27 = vld [vmem:[#allocation2 + $0x38] sm:$0xf0] }
 0x46b   :  { %v3148_v44 = vor.u32 %v3659_v36, %v3145_v27  ;;  %v3655_v18 = vld [vmem:[#allocation2 + $0xc] sm:$0xf]  ;;  %v3129_v11 = vld [vmem:[#allocation2 + $0x18] sm:$0xf0] }
 0x46c   :  { %v3132_v20 = vor.u32 %v3655_v18, %v3129_v11 }
 0x46d   :  { %1997 = vmatpush.bf16.msra.mxu1 %v3136_v31 }
 0x46e   :  { %2048 = vmatpush.bf16.msrb.mxu2 %v3160_v55  ;;  %2023 = vmatpush.bf16.msrb.mxu0 %v3140_v15 }
 0x46f   :  { %3263 = vmatmul.msk.bf16.vlgmr.msrb.gmra.mxu3 %vm1987_vm0, %v5313_v40 }
 0x471   :  { %1998 = vmatpush.bf16.msra.mxu1 %v3120_v6 }
 0x472   :  { %2049 = vmatpush.bf16.msrb.mxu2 %v3144_v29  ;;  %2024 = vmatpush.bf16.msrb.mxu0 %v3124_v49 }
 0x474   :  { %1999 = vmatmul.bf16.vlgmr.msra.gmra.mxu1 %v1795_v16 }
 0x475   :  { %2069 = vmatpush.bf16.msrb.mxu1 %v3244_v41  ;;  %2025 = vmatmul.bf16.vlgmr.msrb.gmra.mxu0 %v1795_v16 }
 0x476   :  { %2050 = vmatpush.bf16.msrb.mxu2 %v3128_v4 }
 0x479   :  { %2070 = vmatpush.bf16.msrb.mxu1 %v3228_v62  ;;  %2051 = vmatmul.bf16.vlgmr.msrb.gmra.mxu2 %v1795_v16 }
 0x47d   :  { %2071 = vmatpush.bf16.msrb.mxu1 %v3212_v7 }
 0x47f   :  { %3264 = vmatmul.msk.bf16.vlgmr.msra.gmra.mxu3 %vm1987_vm0, %v5313_v40  ;;  %v1797_v40 = vld [vmem:[%s5386_s6] ss:$8 sm:$0xf] }
 0x480   :  { %v1799_v1 = vperm.slane %v1797_v40, 0  ;;  %v1800_v59 = vperm.slane %v1797_v40, 1  ;;  %v1801_v57 = vperm.slane %v1797_v40, 2  ;;  %v1802_v19 = vperm.slane %v1797_v40, 3 }
 0x481   :  { %2072 = vmatpush.bf16.msrb.mxu1 %v3196_v14 }
 0x485   :  { %2073 = vmatpush.bf16.msrb.mxu1 %v3180_v39 }
 0x489   :  { %2074 = vmatpush.bf16.msrb.mxu1 %v3164_v21 }
 0x48d   :  { %2075 = vmatpush.bf16.msrb.mxu1 %v3148_v44 }
 0x491   :  { %2076 = vmatpush.bf16.msrb.mxu1 %v3132_v20 }
 0x494   :  { %2077 = vmatmul.bf16.vlgmr.msrb.gmra.mxu1 %v1795_v16 }
 0x4dc   :  { %v2013_v45 = vpop.f32.mrf.mxu2 }
 0x4e2   :  { %v2039_v30 = vpop.f32.mrf.mxu3 }
 0x4e4   :  { %v2015_v22 = vpop.f32.mrf.mxu2 }
 0x4ea   :  { %v2041_v17 = vpop.f32.mrf.mxu3 }
 0x4f1   :  { %v2000_v54 = vpop.f32.mrf.mxu1 }
 0x4f2   :  { %v2065_v10 = vpop.f32.mrf.mxu3  ;;  %v2026_v56 = vpop.f32.mrf.mxu0  ;;  %v2001_v47 = vadd.f32 %v2000_v54, %v1799_v1 }
 0x4f3   :  { %v2027_v26 = vadd.f32 %v2026_v56, %v1800_v59 }
 0x4f4   :  { %v2014_v8 = vadd.f32 %v2013_v45, %v2001_v47 }
 0x4f5   :  { %v2040_v0 = vadd.f32 %v2039_v30, %v2027_v26 }
 0x4f6   :  { %vm2095_vm1 = vcmp.gt.f32.partialorder %v2014_v8, 0.0  ;;  %v2099_v46 = vmul.f32 0.01, %v2014_v8 }
 0x4f7   :  { %vm2096_vm6 = vcmp.gt.f32.partialorder %v2040_v0, 0.0  ;;  %v2100_v42 = vmul.f32 0.01, %v2040_v0 }
 0x4f8   :  { %v5328_v43 = vsel %vm2095_vm1, %v2014_v8, %v2099_v46 }
 0x4f9   :  { %v5330_v5 = vsel %vm2096_vm6, %v2040_v0, %v2100_v42  ;;  %v2002_v60 = vpop.f32.mrf.mxu1 }
 0x4fa   :  { %v2067_v23 = vpop.f32.mrf.mxu3  ;;  %v2028_v33 = vpop.f32.mrf.mxu0 }
 0x4fc   :  { %v2052_v58 = vpop.f32.mrf.mxu2 }
 0x4fd   :  { %v2053_v55 = vadd.f32 %v2052_v58, %v1801_v57 }
 0x4ff   :  { %v2066_v13 = vadd.f32 %v2065_v10, %v2053_v55 }
 0x501   :  { %vm2097_vm3 = vcmp.gt.f32.partialorder %v2066_v13, 0.0  ;;  %v2101_v37 = vmul.f32 0.01, %v2066_v13 }
 0x502   :  { %v2091_v15 = vpop.f32.mrf.mxu3 }
 0x503   :  { %v5332_v52 = vsel %vm2097_vm3, %v2066_v13, %v2101_v37 }
 0x504   :  { %v2054_v31 = vpop.f32.mrf.mxu2 }
 0x50a   :  { %v2093_v32 = vpop.f32.mrf.mxu3 }
 0x511   :  { %v2078_v48 = vpop.f32.mrf.mxu1 }
 0x512   :  { %v2079_v29 = vadd.f32 %v2078_v48, %v1802_v19 }
 0x514   :  { %v2092_v24 = vadd.f32 %v2091_v15, %v2079_v29 }
 0x516   :  { %vm2098_vm4 = vcmp.gt.f32.partialorder %v2092_v24, 0.0  ;;  %v2102_v28 = vmul.f32 0.01, %v2092_v24 }
 0x518   :  { %v5334_v34 = vsel %vm2098_vm4, %v2092_v24, %v2102_v28 }
 0x519   :  { %v2080_v3 = vpop.f32.mrf.mxu1 }
 0x51a   :  { %4064 = dma.done.wait [#allocation8 + $0x1], 8192 }
 0x51b   :  { %4065 = vsyncadd [#allocation8 + $0x1], 4294959104  ;;  %v3324_v9 = vld [vmem:[#allocation3 + $0x70] sm:$0xf]  ;;  %v3705_v6 = vld [vmem:[#allocation3 + $0x74] sm:$0xf0] }
 0x51c   :  { %v3388_v49 = vld [vmem:[#allocation3 + $0xf0] sm:$0xf]  ;;  %v3325_v41 = vor.u32 %v3705_v6, %v3324_v9  ;;  %v3721_v4 = vld [vmem:[#allocation3 + $0xf4] sm:$0xf0]  ;;  %v3316_v7 = vld [vmem:[#allocation3 + $0x60] sm:$0xf] }
 0x51d   :  { %v3452_v25 = vld [vmem:[#allocation3 + $0x170] sm:$0xf]  ;;  %v3737_v12 = vld [vmem:[#allocation3 + $0x174] sm:$0xf0]  ;;  %v3389_v16 = vor.u32 %v3721_v4, %v3388_v49  ;;  %v3703_v51 = vld [vmem:[#allocation3 + $0x64] sm:$0xf0] }
 0x51e   :  { %v3453_v62 = vor.u32 %v3737_v12, %v3452_v25  ;;  %v3516_v63 = vld [vmem:[#allocation3 + $0x1f0] sm:$0xf]  ;;  %v3753_v61 = vld [vmem:[#allocation3 + $0x1f4] sm:$0xf0]  ;;  %2506 = vmatpush.bf16.msra.mxu0 %v3325_v41  ;;  %v3380_v14 = vld [vmem:[#allocation3 + $0xe0] sm:$0xf]  ;;  %v3317_v50 = vor.u32 %v3703_v51, %v3316_v7 }
 0x51f   :  { %v3517_v38 = vor.u32 %v3753_v61, %v3516_v63  ;;  %v3719_v53 = vld [vmem:[#allocation3 + $0xe4] sm:$0xf0]  ;;  %2519 = vmatpush.bf16.msra.mxu2 %v3389_v16  ;;  %v3444_v35 = vld [vmem:[#allocation3 + $0x160] sm:$0xf]  ;;  %v3308_v44 = vld [vmem:[#allocation3 + $0x50] sm:$0xf] }
 0x520   :  { %2532 = vmatpush.bf16.msrb.mxu3 %v3453_v62  ;;  %v3381_v39 = vor.u32 %v3719_v53, %v3380_v14  ;;  %v3735_v2 = vld [vmem:[#allocation3 + $0x164] sm:$0xf0]  ;;  %v3508_v21 = vld [vmem:[#allocation3 + $0x1e0] sm:$0xf]  ;;  %v3701_v18 = vld [vmem:[#allocation3 + $0x54] sm:$0xf0] }
 0x521   :  { %2545 = vmatpush.bf16.msra.mxu1 %v3517_v38  ;;  %v3445_v36 = vor.u32 %v3735_v2, %v3444_v35  ;;  %v3751_v27 = vld [vmem:[#allocation3 + $0x1e4] sm:$0xf0]  ;;  %v3372_v20 = vld [vmem:[#allocation3 + $0xd0] sm:$0xf]  ;;  %v3717_v45 = vld [vmem:[#allocation3 + $0xd4] sm:$0xf0]  ;;  %v3309_v22 = vor.u32 %v3701_v18, %v3308_v44 }
 0x522   :  { %v3509_v11 = vor.u32 %v3751_v27, %v3508_v21  ;;  %v3436_v30 = vld [vmem:[#allocation3 + $0x150] sm:$0xf]  ;;  %2507 = vmatpush.bf16.msra.mxu0 %v3317_v50  ;;  %v3733_v17 = vld [vmem:[#allocation3 + $0x154] sm:$0xf0]  ;;  %v3373_v59 = vor.u32 %v3717_v45, %v3372_v20  ;;  %v3300_v10 = vld [vmem:[#allocation3 + $0x40] sm:$0xf] }
 0x523   :  { %v3500_v40 = vld [vmem:[#allocation3 + $0x1d0] sm:$0xf]  ;;  %v3749_v1 = vld [vmem:[#allocation3 + $0x1d4] sm:$0xf0]  ;;  %2520 = vmatpush.bf16.msra.mxu2 %v3381_v39  ;;  %v3437_v54 = vor.u32 %v3733_v17, %v3436_v30  ;;  %v3699_v56 = vld [vmem:[#allocation3 + $0x44] sm:$0xf0] }
 0x524   :  { %2533 = vmatpush.bf16.msrb.mxu3 %v3445_v36  ;;  %v3364_v47 = vld [vmem:[#allocation3 + $0xc0] sm:$0xf]  ;;  %v3501_v26 = vor.u32 %v3749_v1, %v3500_v40  ;;  %v3715_v8 = vld [vmem:[#allocation3 + $0xc4] sm:$0xf0]  ;;  %v3301_v58 = vor.u32 %v3699_v56, %v3300_v10  ;;  %v3292_v23 = vld [vmem:[#allocation3 + $0x30] sm:$0xf] }
 0x525   :  { %2546 = vmatpush.bf16.msra.mxu1 %v3509_v11  ;;  %v3428_v0 = vld [vmem:[#allocation3 + $0x140] sm:$0xf]  ;;  %v3731_v46 = vld [vmem:[#allocation3 + $0x144] sm:$0xf0]  ;;  %v3365_v60 = vor.u32 %v3715_v8, %v3364_v47  ;;  %v3697_v33 = vld [vmem:[#allocation3 + $0x34] sm:$0xf0] }
 0x526   :  { %v3492_v57 = vld [vmem:[#allocation3 + $0x1c0] sm:$0xf]  ;;  %v3747_v42 = vld [vmem:[#allocation3 + $0x1c4] sm:$0xf0]  ;;  %2508 = vmatpush.bf16.msra.mxu0 %v3309_v22  ;;  %v3429_v55 = vor.u32 %v3731_v46, %v3428_v0  ;;  %v3356_v13 = vld [vmem:[#allocation3 + $0xb0] sm:$0xf]  ;;  %v3293_v29 = vor.u32 %v3697_v33, %v3292_v23 }
 0x527   :  { %2521 = vmatpush.bf16.msra.mxu2 %v3373_v59  ;;  %v3493_v37 = vor.u32 %v3747_v42, %v3492_v57  ;;  %v3713_v31 = vld [vmem:[#allocation3 + $0xb4] sm:$0xf0]  ;;  %v3420_v15 = vld [vmem:[#allocation3 + $0x130] sm:$0xf]  ;;  %v3284_v3 = vld [vmem:[#allocation3 + $0x20] sm:$0xf] }
 0x528   :  { %2534 = vmatpush.bf16.msrb.mxu3 %v3437_v54  ;;  %v3729_v32 = vld [vmem:[#allocation3 + $0x134] sm:$0xf0]  ;;  %v3484_v19 = vld [vmem:[#allocation3 + $0x1b0] sm:$0xf]  ;;  %v3357_v24 = vor.u32 %v3713_v31, %v3356_v13  ;;  %v3695_v9 = vld [vmem:[#allocation3 + $0x24] sm:$0xf0] }
 0x529   :  { %2547 = vmatpush.bf16.msra.mxu1 %v3501_v26  ;;  %v3745_v48 = vld [vmem:[#allocation3 + $0x1b4] sm:$0xf0]  ;;  %v3421_v28 = vor.u32 %v3729_v32, %v3420_v15  ;;  %v3348_v6 = vld [vmem:[#allocation3 + $0xa0] sm:$0xf]  ;;  %v3711_v41 = vld [vmem:[#allocation3 + $0xa4] sm:$0xf0]  ;;  %v3285_v62 = vor.u32 %v3695_v9, %v3284_v3  ;;  %v5350_v9 = vpack.c.bf16 %v5334_v34, %v5334_v34 }
 0x52a   :  { %2509 = vmatpush.bf16.msra.mxu0 %v3301_v58  ;;  %v3485_v49 = vor.u32 %v3745_v48, %v3484_v19  ;;  %v3412_v4 = vld [vmem:[#allocation3 + $0x120] sm:$0xf]  ;;  %v3727_v25 = vld [vmem:[#allocation3 + $0x124] sm:$0xf0]  ;;  %v3349_v63 = vor.u32 %v3711_v41, %v3348_v6  ;;  %v3276_v7 = vld [vmem:[#allocation3 + $0x10] sm:$0xf]  ;;  %v5338_v19 = vpack.c.bf16 %v5330_v5, %v5330_v5 }
 0x52b   :  { %2522 = vmatpush.bf16.msra.mxu2 %v3365_v60  ;;  %v3476_v12 = vld [vmem:[#allocation3 + $0x1a0] sm:$0xf]  ;;  %v3743_v16 = vld [vmem:[#allocation3 + $0x1a4] sm:$0xf0]  ;;  %v3413_v61 = vor.u32 %v3727_v25, %v3412_v4  ;;  %v3693_v38 = vld [vmem:[#allocation3 + $0x14] sm:$0xf0] }
 0x52c   :  { %2535 = vmatpush.bf16.msrb.mxu3 %v3429_v55  ;;  %v3340_v51 = vld [vmem:[#allocation3 + $0x90] sm:$0xf]  ;;  %v3477_v14 = vor.u32 %v3743_v16, %v3476_v12  ;;  %v3709_v53 = vld [vmem:[#allocation3 + $0x94] sm:$0xf0]  ;;  %v3277_v21 = vor.u32 %v3693_v38, %v3276_v7  ;;  %v3268_v36 = vld [vmem:[#allocation3] sm:$0xf] }
 0x52d   :  { %2548 = vmatpush.bf16.msra.mxu1 %v3493_v37  ;;  %v3404_v50 = vld [vmem:[#allocation3 + $0x110] sm:$0xf]  ;;  %v3725_v39 = vld [vmem:[#allocation3 + $0x114] sm:$0xf0]  ;;  %v3691_v27 = vld [vmem:[#allocation3 + $0x4] sm:$0xf0]  ;;  %v3341_v44 = vor.u32 %v3709_v53, %v3340_v51 }
 0x52e   :  { %2510 = vmatpush.bf16.msra.mxu0 %v3293_v29  ;;  %v3468_v35 = vld [vmem:[#allocation3 + $0x190] sm:$0xf]  ;;  %v3741_v2 = vld [vmem:[#allocation3 + $0x194] sm:$0xf0]  ;;  %v3405_v18 = vor.u32 %v3725_v39, %v3404_v50  ;;  %v3332_v11 = vld [vmem:[#allocation3 + $0x80] sm:$0xf]  ;;  %v3269_v10 = vor.u32 %v3691_v27, %v3268_v36 }
 0x52f   :  { %2523 = vmatpush.bf16.msra.mxu2 %v3357_v24  ;;  %v3707_v20 = vld [vmem:[#allocation3 + $0x84] sm:$0xf0]  ;;  %v3396_v45 = vld [vmem:[#allocation3 + $0x100] sm:$0xf]  ;;  %v3469_v30 = vor.u32 %v3741_v2, %v3468_v35  ;;  %v3704_v1 = vld [vmem:[#allocation3 + $0x74] sm:$0xf]  ;;  %v5342_v24 = vpack.c.bf16 %v5332_v52, %v5332_v52 }
 0x530   :  { %2536 = vmatpush.bf16.msrb.mxu3 %v3421_v28  ;;  %v3723_v22 = vld [vmem:[#allocation3 + $0x104] sm:$0xf0]  ;;  %v3460_v17 = vld [vmem:[#allocation3 + $0x180] sm:$0xf]  ;;  %v3326_v59 = vld [vmem:[#allocation3 + $0x78] sm:$0xf0]  ;;  %v3333_v8 = vor.u32 %v3707_v20, %v3332_v11  ;;  %v5346_v28 = vpack.c.bf16 %v5328_v43, %v5328_v43 }
 0x531   :  { %2549 = vmatpush.bf16.msra.mxu1 %v3485_v49  ;;  %v3739_v40 = vld [vmem:[#allocation3 + $0x184] sm:$0xf0]  ;;  %v3720_v54 = vld [vmem:[#allocation3 + $0xf4] sm:$0xf]  ;;  %v3390_v56 = vld [vmem:[#allocation3 + $0xf8] sm:$0xf0]  ;;  %v3397_v0 = vor.u32 %v3723_v22, %v3396_v45  ;;  %v3329_v58 = vor.u32 %v3704_v1, %v3326_v59 }
 0x532   :  { %2511 = vmatpush.bf16.msra.mxu0 %v3285_v62  ;;  %v3736_v47 = vld [vmem:[#allocation3 + $0x174] sm:$0xf]  ;;  %v3454_v26 = vld [vmem:[#allocation3 + $0x178] sm:$0xf0]  ;;  %v3461_v42 = vor.u32 %v3739_v40, %v3460_v17  ;;  %v3393_v60 = vor.u32 %v3720_v54, %v3390_v56  ;;  %v3702_v23 = vld [vmem:[#allocation3 + $0x64] sm:$0xf] }
 0x533   :  { %2524 = vmatpush.bf16.msra.mxu2 %v3349_v63  ;;  %v3752_v46 = vld [vmem:[#allocation3 + $0x1f4] sm:$0xf]  ;;  %v3518_v57 = vld [vmem:[#allocation3 + $0x1f8] sm:$0xf0]  ;;  %v3457_v55 = vor.u32 %v3736_v47, %v3454_v26  ;;  %v3318_v33 = vld [vmem:[#allocation3 + $0x68] sm:$0xf0] }
 0x534   :  { %2537 = vmatpush.bf16.msrb.mxu3 %v3413_v61  ;;  %v3718_v13 = vld [vmem:[#allocation3 + $0xe4] sm:$0xf]  ;;  %v3521_v37 = vor.u32 %v3752_v46, %v3518_v57  ;;  %v3382_v31 = vld [vmem:[#allocation3 + $0xe8] sm:$0xf0]  ;;  %v3321_v3 = vor.u32 %v3702_v23, %v3318_v33  ;;  %v3700_v49 = vld [vmem:[#allocation3 + $0x54] sm:$0xf] }
 0x535   :  { %2550 = vmatpush.bf16.msra.mxu1 %v3477_v14  ;;  %v3734_v15 = vld [vmem:[#allocation3 + $0x164] sm:$0xf]  ;;  %v3446_v32 = vld [vmem:[#allocation3 + $0x168] sm:$0xf0]  ;;  %v3385_v5 = vor.u32 %v3718_v13, %v3382_v31  ;;  %v3310_v41 = vld [vmem:[#allocation3 + $0x58] sm:$0xf0] }
 0x536   :  { %2512 = vmatpush.bf16.msra.mxu0 %v3277_v21  ;;  %v3750_v48 = vld [vmem:[#allocation3 + $0x1e4] sm:$0xf]  ;;  %v3510_v29 = vld [vmem:[#allocation3 + $0x1e8] sm:$0xf0]  ;;  %v3449_v6 = vor.u32 %v3734_v15, %v3446_v32  ;;  %v3716_v4 = vld [vmem:[#allocation3 + $0xd4] sm:$0xf]  ;;  %v3313_v34 = vor.u32 %v3700_v49, %v3310_v41 }
 0x537   :  { %2525 = vmatpush.bf16.msra.mxu2 %v3341_v44  ;;  %v3513_v52 = vor.u32 %v3750_v48, %v3510_v29  ;;  %v3374_v43 = vld [vmem:[#allocation3 + $0xd8] sm:$0xf0]  ;;  %v3732_v25 = vld [vmem:[#allocation3 + $0x154] sm:$0xf]  ;;  %v3698_v7 = vld [vmem:[#allocation3 + $0x44] sm:$0xf] }
 0x538   :  { %2538 = vmatpush.bf16.msrb.mxu3 %v3405_v18  ;;  %v3438_v12 = vld [vmem:[#allocation3 + $0x158] sm:$0xf0]  ;;  %v3748_v16 = vld [vmem:[#allocation3 + $0x1d4] sm:$0xf]  ;;  %v3377_v63 = vor.u32 %v3716_v4, %v3374_v43  ;;  %v3302_v38 = vld [vmem:[#allocation3 + $0x48] sm:$0xf0] }
 0x539   :  { %2551 = vmatpush.bf16.msra.mxu1 %v3469_v30  ;;  %v3502_v62 = vld [vmem:[#allocation3 + $0x1d8] sm:$0xf0]  ;;  %v3441_v61 = vor.u32 %v3732_v25, %v3438_v12  ;;  %v3714_v51 = vld [vmem:[#allocation3 + $0xc4] sm:$0xf]  ;;  %v3366_v53 = vld [vmem:[#allocation3 + $0xc8] sm:$0xf0]  ;;  %v3305_v21 = vor.u32 %v3698_v7, %v3302_v38 }
 0x53a   :  { %2513 = vmatpush.bf16.msra.mxu0 %v3269_v10  ;;  %v3505_v14 = vor.u32 %v3748_v16, %v3502_v62  ;;  %v3730_v50 = vld [vmem:[#allocation3 + $0x144] sm:$0xf]  ;;  %v3430_v39 = vld [vmem:[#allocation3 + $0x148] sm:$0xf0]  ;;  %v3369_v36 = vor.u32 %v3714_v51, %v3366_v53  ;;  %v3696_v44 = vld [vmem:[#allocation3 + $0x34] sm:$0xf] }
 0x53b   :  { %2526 = vmatpush.bf16.msra.mxu2 %v3333_v8  ;;  %v3746_v35 = vld [vmem:[#allocation3 + $0x1c4] sm:$0xf]  ;;  %v3494_v2 = vld [vmem:[#allocation3 + $0x1c8] sm:$0xf0]  ;;  %v3433_v27 = vor.u32 %v3730_v50, %v3430_v39  ;;  %v3294_v18 = vld [vmem:[#allocation3 + $0x38] sm:$0xf0] }
 0x53c   :  { %2539 = vmatpush.bf16.msrb.mxu3 %v3397_v0  ;;  %v3712_v11 = vld [vmem:[#allocation3 + $0xb4] sm:$0xf]  ;;  %v3497_v20 = vor.u32 %v3746_v35, %v3494_v2  ;;  %v3358_v45 = vld [vmem:[#allocation3 + $0xb8] sm:$0xf0]  ;;  %v3297_v1 = vor.u32 %v3696_v44, %v3294_v18  ;;  %v3694_v10 = vld [vmem:[#allocation3 + $0x24] sm:$0xf] }
 0x53d   :  { %2552 = vmatpush.bf16.msra.mxu1 %v3461_v42  ;;  %2514 = vmatmul.bf16.vlgmr.msra.gmra.mxu0 %v5346_v28  ;;  %v3728_v30 = vld [vmem:[#allocation3 + $0x134] sm:$0xf]  ;;  %v3422_v22 = vld [vmem:[#allocation3 + $0x138] sm:$0xf0]  ;;  %v3361_v59 = vor.u32 %v3712_v11, %v3358_v45  ;;  %v3286_v56 = vld [vmem:[#allocation3 + $0x28] sm:$0xf0] }
 0x53e   :  { %2558 = vmatpush.bf16.msrb.mxu0 %v3329_v58  ;;  %2527 = vmatmul.bf16.vlgmr.msra.gmra.mxu2 %v5338_v19  ;;  %v3744_v17 = vld [vmem:[#allocation3 + $0x1b4] sm:$0xf]  ;;  %v3486_v40 = vld [vmem:[#allocation3 + $0x1b8] sm:$0xf0]  ;;  %v3425_v54 = vor.u32 %v3728_v30, %v3422_v22  ;;  %v3710_v47 = vld [vmem:[#allocation3 + $0xa4] sm:$0xf]  ;;  %v3289_v58 = vor.u32 %v3694_v10, %v3286_v56 }
 0x53f   :  { %2571 = vmatpush.bf16.msrb.mxu2 %v3393_v60  ;;  %2540 = vmatmul.bf16.vlgmr.msrb.gmra.mxu3 %v5342_v24  ;;  %v3489_v26 = vor.u32 %v3744_v17, %v3486_v40  ;;  %v3350_v8 = vld [vmem:[#allocation3 + $0xa8] sm:$0xf0]  ;;  %v3726_v0 = vld [vmem:[#allocation3 + $0x124] sm:$0xf]  ;;  %v3692_v23 = vld [vmem:[#allocation3 + $0x14] sm:$0xf] }
 0x540   :  { %2584 = vmatpush.bf16.msra.mxu3 %v3457_v55  ;;  %2553 = vmatmul.bf16.vlgmr.msra.gmra.mxu1 %v5350_v9  ;;  %v3414_v46 = vld [vmem:[#allocation3 + $0x128] sm:$0xf0]  ;;  %v3742_v57 = vld [vmem:[#allocation3 + $0x1a4] sm:$0xf]  ;;  %v3353_v60 = vor.u32 %v3710_v47, %v3350_v8  ;;  %v3278_v33 = vld [vmem:[#allocation3 + $0x18] sm:$0xf0] }
 0x541   :  { %2597 = vmatpush.bf16.msrb.mxu1 %v3521_v37  ;;  %v3478_v42 = vld [vmem:[#allocation3 + $0x1a8] sm:$0xf0]  ;;  %v3417_v55 = vor.u32 %v3726_v0, %v3414_v46  ;;  %v3708_v13 = vld [vmem:[#allocation3 + $0x94] sm:$0xf]  ;;  %v3342_v31 = vld [vmem:[#allocation3 + $0x98] sm:$0xf0] }
 0x542   :  { %2559 = vmatpush.bf16.msrb.mxu0 %v3321_v3  ;;  %v3481_v37 = vor.u32 %v3742_v57, %v3478_v42  ;;  %v3724_v15 = vld [vmem:[#allocation3 + $0x114] sm:$0xf]  ;;  %v3406_v32 = vld [vmem:[#allocation3 + $0x118] sm:$0xf0]  ;;  %v3281_v3 = vor.u32 %v3692_v23, %v3278_v33  ;;  %v3690_v49 = vld [vmem:[#allocation3 + $0x4] sm:$0xf] }
 0x543   :  { %2572 = vmatpush.bf16.msrb.mxu2 %v3385_v5  ;;  %v3740_v48 = vld [vmem:[#allocation3 + $0x194] sm:$0xf]  ;;  %v3470_v29 = vld [vmem:[#allocation3 + $0x198] sm:$0xf0]  ;;  %v3345_v5 = vor.u32 %v3708_v13, %v3342_v31  ;;  %v3270_v41 = vld [vmem:[#allocation3 + $0x8] sm:$0xf0] }
 0x544   :  { %2585 = vmatpush.bf16.msra.mxu3 %v3449_v6  ;;  %v3409_v6 = vor.u32 %v3724_v15, %v3406_v32  ;;  %v3706_v4 = vld [vmem:[#allocation3 + $0x84] sm:$0xf]  ;;  %v3334_v43 = vld [vmem:[#allocation3 + $0x88] sm:$0xf0] }
 0x545   :  { %2598 = vmatpush.bf16.msrb.mxu1 %v3513_v52  ;;  %v3473_v52 = vor.u32 %v3740_v48, %v3470_v29  ;;  %v3722_v25 = vld [vmem:[#allocation3 + $0x104] sm:$0xf]  ;;  %v3398_v12 = vld [vmem:[#allocation3 + $0x108] sm:$0xf0] }
 0x546   :  { %2560 = vmatpush.bf16.msrb.mxu0 %v3313_v34  ;;  %v3738_v16 = vld [vmem:[#allocation3 + $0x184] sm:$0xf]  ;;  %v3462_v62 = vld [vmem:[#allocation3 + $0x188] sm:$0xf0]  ;;  %v3273_v34 = vor.u32 %v3690_v49, %v3270_v41 }
 0x547   :  { %2573 = vmatpush.bf16.msrb.mxu2 %v3377_v63  ;;  %v3337_v63 = vor.u32 %v3706_v4, %v3334_v43  ;;  %v3465_v7 = vor.u32 %v3738_v16, %v3462_v62  ;;  %v3265_v38 = vld [vmem:[%s5386_s6 + $0x1] ss:$8 sm:$0x3] }
 0x548   :  { %2586 = vmatpush.bf16.msra.mxu3 %v3441_v61  ;;  %v3401_v61 = vor.u32 %v3722_v25, %v3398_v12  ;;  %v2182_v51 = vperm.slane %v3265_v38, 0  ;;  %v2183_v18 = vperm.slane %v3265_v38, 1 }
 0x549   :  { %2599 = vmatpush.bf16.msrb.mxu1 %v3505_v14 }
 0x54a   :  { %2561 = vmatpush.bf16.msrb.mxu0 %v3305_v21 }
 0x54b   :  { %2574 = vmatpush.bf16.msrb.mxu2 %v3369_v36 }
 0x54c   :  { %2587 = vmatpush.bf16.msra.mxu3 %v3433_v27 }
 0x54d   :  { %2600 = vmatpush.bf16.msrb.mxu1 %v3497_v20 }
 0x54e   :  { %2562 = vmatpush.bf16.msrb.mxu0 %v3297_v1 }
 0x54f   :  { %2575 = vmatpush.bf16.msrb.mxu2 %v3361_v59 }
 0x550   :  { %2588 = vmatpush.bf16.msra.mxu3 %v3425_v54 }
 0x551   :  { %2601 = vmatpush.bf16.msrb.mxu1 %v3489_v26 }
 0x552   :  { %2563 = vmatpush.bf16.msrb.mxu0 %v3289_v58 }
 0x553   :  { %2576 = vmatpush.bf16.msrb.mxu2 %v3353_v60 }
 0x554   :  { %2589 = vmatpush.bf16.msra.mxu3 %v3417_v55 }
 0x555   :  { %2602 = vmatpush.bf16.msrb.mxu1 %v3481_v37 }
 0x556   :  { %2564 = vmatpush.bf16.msrb.mxu0 %v3281_v3 }
 0x557   :  { %2577 = vmatpush.bf16.msrb.mxu2 %v3345_v5 }
 0x558   :  { %2590 = vmatpush.bf16.msra.mxu3 %v3409_v6 }
 0x559   :  { %2603 = vmatpush.bf16.msrb.mxu1 %v3473_v52 }
 0x55a   :  { %2565 = vmatpush.bf16.msrb.mxu0 %v3273_v34 }
 0x55b   :  { %2578 = vmatpush.bf16.msrb.mxu2 %v3337_v63 }
 0x55c   :  { %2591 = vmatpush.bf16.msra.mxu3 %v3401_v61 }
 0x55d   :  { %2604 = vmatpush.bf16.msrb.mxu1 %v3465_v7  ;;  %2566 = vmatmul.bf16.vlgmr.msrb.gmra.mxu0 %v5346_v28 }
 0x55e   :  { %2579 = vmatmul.bf16.vlgmr.msrb.gmra.mxu2 %v5338_v19 }
 0x55f   :  { %2592 = vmatmul.bf16.vlgmr.msra.gmra.mxu3 %v5342_v24 }
 0x560   :  { %2605 = vmatmul.bf16.vlgmr.msrb.gmra.mxu1 %v5350_v9 }
 0x5ba   :  { %v2515_v14 = vpop.f32.mrf.mxu0 }
 0x5bb   :  { %v2516_v50 = vadd.f32 %v2515_v14, %v2182_v51 }
 0x5bd   :  { %v2554_v53 = vpop.f32.mrf.mxu1 }
 0x5c1   :  { %v2528_v39 = vpop.f32.mrf.mxu2 }
 0x5c2   :  { %v2529_v35 = vadd.f32 %v2528_v39, %v2516_v50  ;;  %v2541_v2 = vpop.f32.mrf.mxu3  ;;  %v2517_v36 = vpop.f32.mrf.mxu0 }
 0x5c4   :  { %v2542_v21 = vadd.f32 %v2541_v2, %v2529_v35 }
 0x5c5   :  { %v2556_v28 = vpop.f32.mrf.mxu1 }
 0x5c6   :  { %v2555_v27 = vadd.f32 %v2554_v53, %v2542_v21 }
 0x5c8   :  { %vm2610_vm7 = vcmp.gt.f32.partialorder %v2555_v27, 0.0  ;;  %v2612_v19 = vmul.f32 0.01, %v2555_v27 }
 0x5c9   :  { %v2530_v24 = vpop.f32.mrf.mxu2 }
 0x5ca   :  { %v2614_v44 = vsel %vm2610_vm7, %v2555_v27, %v2612_v19  ;;  %v2543_v9 = vpop.f32.mrf.mxu3 }
 0x5da   :  { %v2567_v11 = vpop.f32.mrf.mxu0 }
 0x5db   :  { %v2568_v45 = vadd.f32 %v2567_v11, %v2183_v18 }
 0x5dd   :  { %v2606_v20 = vpop.f32.mrf.mxu1 }
 0x5e1   :  { %v2580_v30 = vpop.f32.mrf.mxu2 }
 0x5e2   :  { %v2593_v22 = vpop.f32.mrf.mxu3  ;;  %v2581_v17 = vadd.f32 %v2580_v30, %v2568_v45  ;;  %v2569_v40 = vpop.f32.mrf.mxu0 }
 0x5e4   :  { %v2594_v1 = vadd.f32 %v2593_v22, %v2581_v17 }
 0x5e5   :  { %v2608_v59 = vpop.f32.mrf.mxu1 }
 0x5e6   :  { %v2607_v54 = vadd.f32 %v2606_v20, %v2594_v1 }
 0x5e8   :  { %vm2611_vm5 = vcmp.gt.f32.partialorder %v2607_v54, 0.0  ;;  %v2613_v10 = vmul.f32 0.01, %v2607_v54 }
 0x5e9   :  { %v2582_v56 = vpop.f32.mrf.mxu2 }
 0x5ea   :  { %v2595_v47 = vpop.f32.mrf.mxu3  ;;  %v2615_v26 = vsel %vm2611_vm5, %v2607_v54, %v2613_v10 }
 0x5eb   :  { %4066 = dma.done.wait [#allocation8 + $0x2], 2048 }
 0x5ec   :  { %4067 = vsyncadd [#allocation8 + $0x2], 4294965248  ;;  %v3761_v8 = vld [vmem:[#allocation4 + $0x48] sm:$0xff]  ;;  %v3768_v57 = vld [vmem:[#allocation4 + $0x78] sm:$0xff]  ;;  %v2652_v29 = vpack.c.bf16 %v2614_v44, %v2614_v44  ;;  %v2653_v3 = vpack.c.bf16 %v2615_v26, %v2615_v26 }
 0x5ed   :  { %v3769_v0 = vld [vmem:[#allocation4 + $0x28] sm:$0xff]  ;;  %2751 = vmatpush.bf16.msra.mxu0 %v3761_v8  ;;  %v3767_v58 = vld [vmem:[#allocation4 + $0x70] sm:$0xff]  ;;  %v3766_v55 = vld [vmem:[#allocation4 + $0x60] sm:$0xff] }
 0x5ee   :  { %2764 = vmatpush.bf16.msra.mxu2 %v3769_v0  ;;  %v3760_v46 = vld [vmem:[#allocation4 + $0x8] sm:$0xff]  ;;  %v3758_v60 = vld [vmem:[#allocation4 + $0x50] sm:$0xff]  ;;  %v3757_v23 = vld [vmem:[#allocation4 + $0x18] sm:$0xff] }
 0x5ef   :  { %v3759_v42 = vld [vmem:[#allocation4 + $0x68] sm:$0xff]  ;;  %v3765_v33 = vld [vmem:[#allocation4 + $0x38] sm:$0xff]  ;;  %v3764_v37 = vld [vmem:[#allocation4 + $0x10] sm:$0xff] }
 0x5f0   :  { %v3756_v13 = vld [vmem:[#allocation4 + $0x58] sm:$0xff]  ;;  %v3755_v31 = vld [vmem:[#allocation4] sm:$0xff]  ;;  %v3754_v32 = vld [vmem:[#allocation4 + $0x30] sm:$0xff] }
 0x5f1   :  { %2752 = vmatpush.bf16.msra.mxu0 %v3760_v46  ;;  %v3763_v15 = vld [vmem:[#allocation4 + $0x20] sm:$0xff] }
 0x5f2   :  { %2765 = vmatpush.bf16.msra.mxu2 %v3768_v57  ;;  %v3762_v48 = vld [vmem:[#allocation4 + $0x40] sm:$0xff] }
 0x5f3   :  { %v2654_v5 = vld [vmem:[%s5386_s6 + $0x2] ss:$0 sm:$0xff] }
 0x5f5   :  { %2753 = vmatpush.bf16.msra.mxu0 %v3759_v42 }
 0x5f6   :  { %2766 = vmatpush.bf16.msra.mxu2 %v3767_v58 }
 0x5f9   :  { %2754 = vmatpush.bf16.msra.mxu0 %v3758_v60 }
 0x5fa   :  { %2767 = vmatpush.bf16.msra.mxu2 %v3766_v55 }
 0x5fd   :  { %2755 = vmatpush.bf16.msra.mxu0 %v3757_v23 }
 0x5fe   :  { %2768 = vmatpush.bf16.msra.mxu2 %v3765_v33 }
 0x601   :  { %2756 = vmatpush.bf16.msra.mxu0 %v3756_v13 }
 0x602   :  { %2769 = vmatpush.bf16.msra.mxu2 %v3764_v37 }
 0x605   :  { %2757 = vmatpush.bf16.msra.mxu0 %v3755_v31 }
 0x606   :  { %2770 = vmatpush.bf16.msra.mxu2 %v3763_v15 }
 0x609   :  { %2758 = vmatpush.bf16.msra.mxu0 %v3754_v32 }
 0x60a   :  { %2771 = vmatpush.bf16.msra.mxu2 %v3762_v48 }
 0x60c   :  { %2759 = vmatmul.bf16.vlgmr.msra.gmra.mxu0 %v2652_v29 }
 0x60d   :  { %2772 = vmatmul.bf16.vlgmr.msra.gmra.mxu2 %v2653_v3 }
 0x689   :  { %v2760_v6 = vpop.f32.mrf.mxu0 }
 0x68a   :  { %v2761_v49 = vadd.f32 %v2760_v6, %v2654_v5 }
 0x690   :  { %v2773_v41 = vpop.f32.mrf.mxu2 }
 0x691   :  { %v2774_v4 = vadd.f32 %v2773_v41, %v2761_v49  ;;  %v2762_v52 = vpop.f32.mrf.mxu0 }
 0x693   :  { %vm2777_vm15 = vcmp.gt.f32.partialorder %v2774_v4, 0.0  ;;  %v2778_v43 = vmul.f32 0.01, %v2774_v4 }
 0x695   :  { %v2779_v25 = vsel %vm2777_vm15, %v2774_v4, %v2778_v43 }
 0x698   :  { %v2775_v12 = vpop.f32.mrf.mxu2 }
 0x699   :  { %4068 = dma.done.wait [#allocation8 + $0x3], 1024 }
 0x69a   :  { %4069 = vsyncadd [#allocation8 + $0x3], 4294966272  ;;  %v3777_v16 = vld [vmem:[#allocation5 + $0x30] sm:$0xff]  ;;  %v3776_v62 = vld [vmem:[#allocation5 + $0x38] sm:$0xff]  ;;  %v2800_v14 = vpack.c.bf16 %v2779_v25, %v2779_v25 }
 0x69b   :  { %2850 = vmatpush.bf16.msrb.mxu3 %v3777_v16  ;;  %v3775_v34 = vld [vmem:[#allocation5 + $0x8] sm:$0xff]  ;;  %v3774_v63 = vld [vmem:[#allocation5 + $0x18] sm:$0xff]  ;;  %v3773_v61 = vld [vmem:[#allocation5 + $0x20] sm:$0xff] }
 0x69c   :  { %v3772_v7 = vld [vmem:[#allocation5 + $0x10] sm:$0xff]  ;;  %v3771_v38 = vld [vmem:[#allocation5] sm:$0xff]  ;;  %v3770_v51 = vld [vmem:[#allocation5 + $0x28] sm:$0xff] }
 0x69d   :  { %v2801_v53 = vld [vmem:[%s5386_s6 + $0x3] ss:$0 sm:$0xff] }
 0x69f   :  { %2851 = vmatpush.bf16.msrb.mxu3 %v3776_v62 }
 0x6a3   :  { %2852 = vmatpush.bf16.msrb.mxu3 %v3775_v34 }
 0x6a7   :  { %2853 = vmatpush.bf16.msrb.mxu3 %v3774_v63 }
 0x6ab   :  { %2854 = vmatpush.bf16.msrb.mxu3 %v3773_v61 }
 0x6af   :  { %2855 = vmatpush.bf16.msrb.mxu3 %v3772_v7 }
 0x6b3   :  { %2856 = vmatpush.bf16.msrb.mxu3 %v3771_v38 }
 0x6b7   :  { %2857 = vmatpush.bf16.msrb.mxu3 %v3770_v51 }
 0x6ba   :  { %2858 = vmatmul.bf16.vlgmr.msrb.gmra.mxu3 %v2800_v14 }
 0x73d   :  { %v2859_v50 = vpop.f32.mrf.mxu3 }
 0x73e   :  { %v2860_v39 = vadd.f32 %v2859_v50, %v2801_v53 }
 0x740   :  { %vm2863_vm13 = vcmp.gt.f32.partialorder %v2860_v39, 0.0  ;;  %v2864_v35 = vmul.f32 0.01, %v2860_v39 }
 0x742   :  { %v2865_v2 = vsel %vm2863_vm13, %v2860_v39, %v2864_v35 }
 0x745   :  { %v2861_v21 = vpop.f32.mrf.mxu3 }
 0x746   :  { %4070 = dma.done.wait [#allocation8 + $0x4], 512 }
 0x747   :  { %4071 = vsyncadd [#allocation8 + $0x4], 4294966784  ;;  %v3781_v36 = vld [vmem:[#allocation6 + $0x18] sm:$0xff]  ;;  %v3780_v28 = vld [vmem:[#allocation6 + $0x8] sm:$0xff]  ;;  %v2878_v24 = vpack.c.bf16 %v2865_v2, %v2865_v2 }
 0x748   :  { %2911 = vmatpush.bf16.msra.mxu1 %v3781_v36  ;;  %v3779_v27 = vld [vmem:[#allocation6] sm:$0xff]  ;;  %v3778_v19 = vld [vmem:[#allocation6 + $0x10] sm:$0xff] }
 0x749   :  { %v2879_v44 = vld [vmem:[%s5386_s6 + $0x4] ss:$0 sm:$0xff] }
 0x74c   :  { %2912 = vmatpush.bf16.msra.mxu1 %v3780_v28 }
 0x750   :  { %2913 = vmatpush.bf16.msra.mxu1 %v3779_v27 }
 0x754   :  { %2914 = vmatpush.bf16.msra.mxu1 %v3778_v19 }
 0x757   :  { %3634 = vmatmul.msk.bf16.vlgmr.msra.gmra.mxu1 %vm1751_vm11, %v2878_v24 }
 0x7d4   :  { %v2916_v9 = vpop.f32.mrf.mxu1 }
 0x7d5   :  { %v2917_v18 = vadd.f32 %v2916_v9, %v2879_v44 }
 0x7d7   :  { %vm2920_vm12 = vcmp.gt.f32.partialorder %v2917_v18, 0.0  ;;  %v2921_v11 = vmul.f32 0.01, %v2917_v18 }
 0x7d9   :  { %v2922_v20 = vsel %vm2920_vm12, %v2917_v18, %v2921_v11 }
 0x7dc   :  { %v2918_v45 = vpop.f32.mrf.mxu1 }
 0x7dd   :  { %4072 = dma.done.wait [#allocation8 + $0x5], 256 }
 0x7de   :  { %4073 = vsyncadd [#allocation8 + $0x5], 4294967040  ;;  %v3783_v30 = vld [vmem:[#allocation7 + $0x8] sm:$0xff]  ;;  %v3782_v22 = vld [vmem:[#allocation7] sm:$0xff]  ;;  %v2931_v17 = vpack.c.bf16 %v2922_v20, %v2922_v20  ;;  %vm2961_vm14 = vcmask 1024  }
 0x7df   :  { %2954 = vmatpush.bf16.msrb.mxu0 %v3783_v30  ;;  %v2932_v40 = vld [vmem:[%s5386_s6 + $0x5] ss:$0 sm:$0xff] }
 0x7e3   :  { %2955 = vmatpush.bf16.msrb.mxu0 %v3782_v22 }
 0x7e6   :  { %3643 = vmatmul.msk.bf16.vlgmr.msrb.gmra.mxu0 %vm1006_vm8, %v2931_v17 }
 0x863   :  { %v2957_v1 = vpop.f32.mrf.mxu0 }
 0x864   :  { %v2958_v59 = vadd.f32 %v2957_v1, %v2932_v40 }
 0x866   :  { %2962 = vst.msk [vmem:[%s5391_s13] sm:$0x3] %vm2961_vm14, %v2958_v59 }
 0x86b   :  { %v2959_v54 = vpop.f32.mrf.mxu0 }
 0x86c   :  { %2967 = vsyncmov [#allocation8] }
 0x86f   :  { %s2968_s1 = vpop.sfrf %2967 }
 0x870   :  { %p3644_p0 = scmp.ne.s32.totalorder %s2968_s1, 0 }
 0x872   :  { %2972 = shalt.err (%p3644_p0)  }
 0x873   :  { %2974 = vsyncmov [#allocation8 + $0x1] }
 0x876   :  { %s2975_s19 = vpop.sfrf %2974 }
 0x877   :  { %p3645_p1 = scmp.ne.s32.totalorder %s2975_s19, 0 }
 0x879   :  { %2979 = shalt.err (%p3645_p1)  }
 0x87a   :  { %2981 = vsyncmov [#allocation8 + $0x2] }
 0x87d   :  { %s2982_s9 = vpop.sfrf %2981 }
 0x87e   :  { %p3646_p2 = scmp.ne.s32.totalorder %s2982_s9, 0 }
 0x880   :  { %2986 = shalt.err (%p3646_p2)  }
 0x881   :  { %2988 = vsyncmov [#allocation8 + $0x3] }
 0x884   :  { %s2989_s6 = vpop.sfrf %2988 }
 0x885   :  { %p3647_p3 = scmp.ne.s32.totalorder %s2989_s6, 0 }
 0x887   :  { %2993 = shalt.err (%p3647_p3)  }
 0x888   :  { %2995 = vsyncmov [#allocation8 + $0x4] }
 0x88b   :  { %s2996_s20 = vpop.sfrf %2995 }
 0x88c   :  { %p3648_p4 = scmp.ne.s32.totalorder %s2996_s20, 0 }
 0x88e   :  { %3000 = shalt.err (%p3648_p4)  }
 0x88f   :  { %3002 = vsyncmov [#allocation8 + $0x5] }
 0x892   :  { %s3003_s13 = vpop.sfrf %3002 }
 0x893   :  { %p3649_p5 = scmp.ne.s32.totalorder %s3003_s13, 0 }
 0x895   :  { %3007 = shalt.err (%p3649_p5)  }

</bundles_post_ra>
